<compile_context>
chip_gen: v7x
topology: tpu7x:2x2x1
jax: 0.10.0
libtpu: 0.0.40
codegen_flags: <defaults>
</compile_context>

<pallas_src>
import functools

import numpy as np
import jax
import jax.numpy as jnp
from jax.experimental import pallas as pl
from jax.experimental.pallas import tpu as pltpu  # TPU backend (kept for future tuning hooks)


# ----------------------------------------------------------------------------
# Fused Pallas kernel: the entire conv stack in one call
# ----------------------------------------------------------------------------
def _critic_kernel(x_ref,
                   l1_ref, r1_ref, a1_ref,
                   l2_ref, r2_ref, a2_ref, m2_ref,
                   l3_ref, r3_ref, a3_ref, m3_ref,
                   l4_ref, w4_ref, a4_ref,
                   o_ref):
    """Whole Critic conv stack; all intermediates stay resident in VMEM."""

    def conv(x, l_ref, r_ref, k):
        # Y = sum_kh (L_kh @ X) @ R_kh    (row-select matmul, then weight matmul)
        acc = None
        for kh in range(k):                                   # tiny static unroll
            z = jnp.dot(l_ref[kh], x, preferred_element_type=jnp.float32)
            t = jnp.dot(z, r_ref[kh], preferred_element_type=jnp.float32)
            acc = t if acc is None else acc + t
        return acc

    def leaky(y):                                             # LeakyReLU(0.2)
        return jnp.maximum(y, 0.2 * y)

    def batch_norm(y, aff_ref, m_ref):
        # training-mode BN (batch statistics, biased variance, eps=1e-5), f32.
        # aff rows: 0 = conv bias, 1 = gamma, 2 = beta (lane-tiled per channel)
        y = y + aff_ref[0:1, :]
        mean = jnp.dot(jnp.sum(y, axis=0, keepdims=True), m_ref[...],
                       preferred_element_type=jnp.float32)
        d = y - mean
        var = jnp.dot(jnp.sum(d * d, axis=0, keepdims=True), m_ref[...],
                      preferred_element_type=jnp.float32)
        return d * jax.lax.rsqrt(var + 1e-5) * aff_ref[1:2, :] + aff_ref[2:3, :]

    x = x_ref[...]                                                       # (B*28, 28*2)
    y = leaky(conv(x, l1_ref, r1_ref, 4) + a1_ref[0:1, :])               # (B*14, 14*fm)
    y = leaky(batch_norm(conv(y, l2_ref, r2_ref, 4), a2_ref, m2_ref))    # (B*7,  7*2fm)
    y = leaky(batch_norm(conv(y, l3_ref, r3_ref, 3), a3_ref, m3_ref))    # (B*4,  4*4fm)

    # final 4x4 conv -> one scalar per sample: VPU multiply + lane reduction
    out = None
    for kh in range(4):
        sel = jnp.dot(l4_ref[kh], y, preferred_element_type=jnp.float32)  # (B, 4*4fm)
        contrib = jnp.sum(sel * w4_ref[kh], axis=1, keepdims=True)        # (B, 1)
        out = contrib if out is None else out + contrib
    o_ref[...] = out + a4_ref[0:1, :]


# ----------------------------------------------------------------------------
# Structural constants (shape-only, numpy, baked at trace time)
# ----------------------------------------------------------------------------
@functools.lru_cache(maxsize=None)
def _row_select_stack(batch, k, s, p, h_in, h_out):
    """L_kh[b*h_out+oh, b*h_in+ih] = 1  iff  ih == s*oh + kh - p (in range)."""
    L = np.zeros((k, batch * h_out, batch * h_in), np.float32)
    for kh in range(k):
        for b in range(batch):
            for oh in range(h_out):
                ih = s * oh + kh - p
                if 0 <= ih < h_in:
                    L[kh, b * h_out + oh, b * h_in + ih] = 1.0
    return L


@functools.lru_cache(maxsize=None)
def _bn_avg_matrix(batch, h_out, w_out, ch):
    """(w_out*ch, w_out*ch) matrix: rowsum @ M = per-channel mean, lane-tiled."""
    n = w_out * ch
    m = np.zeros((n, n), np.float32)
    inv = 1.0 / float(batch * h_out * w_out)
    for ow_a in range(w_out):
        for ow_b in range(w_out):
            for c in range(ch):
                m[ow_a * ch + c, ow_b * ch + c] = inv
    return m


# ----------------------------------------------------------------------------
# One-time weight transforms (hoisted out of the forward pass)
# ----------------------------------------------------------------------------
def _conv_col_matrices(w_oihw, s, p, w_in, w_out):
    """Per-kh weight matrices R_kh, stacked: (k, w_in*Cin, w_out*Cout).

    R_kh[w*Cin+ci, ow*Cout+co] = W[co, ci, kh, kw] with w = s*ow + kw - p,
    zero where that tap falls into the zero padding.
    """
    c_out, c_in, k, _ = w_oihw.shape
    place = np.zeros((k, w_out, w_in), np.float32)
    for kw in range(k):
        for ow in range(w_out):
            w = s * ow + kw - p
            if 0 <= w < w_in:
                place[kw, ow, w] = 1.0
    place = jnp.asarray(place)
    mats = []
    for kh in range(k):
        wk = w_oihw[:, :, kh, :].astype(jnp.float32)       # (Cout, Cin, k)
        r = jnp.einsum("kow,cik->wioc", place, wk)         # (w_in, Cin, w_out, Cout)
        mats.append(r.reshape(w_in * c_in, w_out * c_out))
    return jnp.stack(mats, axis=0)


def _tile_channels(v, w_out):
    """(C,) per-channel vector -> (1, w_out*C) lane-tiled row (lane = ow*C+c)."""
    return jnp.tile(v.astype(jnp.float32), (w_out,)).reshape(1, -1)


def init_params(key, num_classes=10, fm=16):
    ks = jax.random.split(key, 9)

    def w(k, shape, scale=0.05):
        return jax.random.normal(k, shape, jnp.float32) * scale

    return {
        "emb": w(ks[0], (num_classes, 28 * 28), 0.1),
        "w1": w(ks[1], (fm, 2, 4, 4)),          "b1": w(ks[2], (fm,), 0.01),
        "w2": w(ks[3], (fm * 2, fm, 4, 4)),     "b2": w(ks[4], (fm * 2,), 0.01),
        "g2": jnp.ones((fm * 2,), jnp.float32), "be2": jnp.zeros((fm * 2,), jnp.float32),
        "w3": w(ks[5], (fm * 4, fm * 2, 3, 3)), "b3": w(ks[6], (fm * 4,), 0.01),
        "g3": jnp.ones((fm * 4,), jnp.float32), "be3": jnp.zeros((fm * 4,), jnp.float32),
        "w4": w(ks[7], (1, fm * 4, 4, 4)),      "b4": w(ks[8], (1,), 0.01),
    }


def prepare_params(raw):
    """One-time transform of PyTorch-layout weights into fused-kernel operands."""
    prep = {"emb": raw["emb"].astype(jnp.float32)}
    # layer 1: Conv2d(2, fm, 4, 2, 1)            28 -> 14
    prep["r1"] = _conv_col_matrices(raw["w1"], 2, 1, 28, 14)
    prep["a1"] = _tile_channels(raw["b1"], 14)
    # layer 2: Conv2d(fm, 2fm, 4, 2, 1) + BN     14 -> 7
    prep["r2"] = _conv_col_matrices(raw["w2"], 2, 1, 14, 7)
    prep["a2"] = jnp.concatenate([_tile_channels(raw["b2"], 7),
                                  _tile_channels(raw["g2"], 7),
                                  _tile_channels(raw["be2"], 7)], axis=0)
    # layer 3: Conv2d(2fm, 4fm, 3, 2, 1) + BN    7 -> 4
    prep["r3"] = _conv_col_matrices(raw["w3"], 2, 1, 7, 4)
    prep["a3"] = jnp.concatenate([_tile_channels(raw["b3"], 4),
                                  _tile_channels(raw["g3"], 4),
                                  _tile_channels(raw["be3"], 4)], axis=0)
    # layer 4: Conv2d(4fm, 1, 4, 1, 0)           4 -> 1 ; stored as (k, 1, 4*4fm)
    prep["w4"] = jnp.transpose(_conv_col_matrices(raw["w4"], 1, 0, 4, 1), (0, 2, 1))
    prep["a4"] = _tile_channels(raw["b4"], 1)
    return prep


# ----------------------------------------------------------------------------
# Tiny input-side glue + the fused forward pass
# ----------------------------------------------------------------------------
def _interp_matrix(out_size, in_size):
    # PyTorch bilinear, align_corners=False
    scale = in_size / out_size
    dst = np.arange(out_size, dtype=np.float64)
    src = np.clip((dst + 0.5) * scale - 0.5, 0.0, None)
    i0 = np.minimum(np.floor(src).astype(np.int64), in_size - 1)
    i1 = np.minimum(i0 + 1, in_size - 1)
    lam = (src - i0).astype(np.float32)
    R = np.zeros((out_size, in_size), np.float32)
    R[np.arange(out_size), i0] += 1.0 - lam
    R[np.arange(out_size), i1] += lam
    return R


def critic_forward(prep, img_nchw, labels):
    B = img_nchw.shape[0]
    Hin, Win = img_nchw.shape[2], img_nchw.shape[3]

    # input-side glue (cheap, stays in JAX): resize + embedding lookup,
    # built channel-last directly (no NCHW->NHWC transpose of activations)
    img = img_nchw.astype(jnp.float32)[:, 0]                       # (B, Hin, Win)
    Rh = jnp.asarray(_interp_matrix(28, Hin))
    Rw = jnp.asarray(_interp_matrix(28, Win))
    img28 = jnp.einsum("oh,bhw,pw->bop", Rh, img, Rw)              # (B, 28, 28)
    lbl = jnp.take(prep["emb"], labels, axis=0).reshape(B, 28, 28)
    # rows = b*28 + h, lanes = w*2 + c  (c0 = image, c1 = label map)
    x0 = jnp.stack([img28, lbl], axis=-1).reshape(B * 28, 28 * 2)

    # structural constants (depend only on B and static layer geometry)
    l1 = jnp.asarray(_row_select_stack(B, 4, 2, 1, 28, 14))
    l2 = jnp.asarray(_row_select_stack(B, 4, 2, 1, 14, 7))
    l3 = jnp.asarray(_row_select_stack(B, 3, 2, 1, 7, 4))
    l4 = jnp.asarray(_row_select_stack(B, 4, 1, 0, 4, 1))
    c2 = prep["a2"].shape[1] // 7
    c3 = prep["a3"].shape[1] // 4
    m2 = jnp.asarray(_bn_avg_matrix(B, 7, 7, c2))
    m3 = jnp.asarray(_bn_avg_matrix(B, 4, 4, c3))

    # the whole conv stack: ONE pallas_call, default whole-array VMEM blocks
    # (total operand footprint ~2.3 MiB at fm=16, B=2 -> fits scoped VMEM on
    #  v5e/v6e/v7x; for large B/fm, add a "parallel" row grid and/or bf16 operands)
    out = pl.pallas_call(
        _critic_kernel,
        out_shape=jax.ShapeDtypeStruct((B, 1), jnp.float32),
    )(x0,
      l1, prep["r1"], prep["a1"],
      l2, prep["r2"], prep["a2"], m2,
      l3, prep["r3"], prep["a3"], m3,
      l4, prep["w4"], prep["a4"])
    return out.reshape(-1)                                         # (B,)


if __name__ == "__main__":
    key = jax.random.PRNGKey(0)
    k_par, k_img, k_lab = jax.random.split(key, 3)

    num_classes = 10
    feature_map_size = 16       # small but consistent with the module's constructor
    raw_params = init_params(k_par, num_classes=num_classes, fm=feature_map_size)
    params = prepare_params(raw_params)

    B, Hin, Win = 2, 16, 16
    img = jax.random.normal(k_img, (B, 1, Hin, Win), jnp.float32)   # NCHW like PyTorch
    labels = jax.random.randint(k_lab, (B,), 0, num_classes, jnp.int32)

    out = jax.jit(critic_forward)(params, img, labels)
    out = jax.block_until_ready(out)
    assert out.shape == (B,) and out.dtype == jnp.float32
    assert bool(jnp.all(jnp.isfinite(out)))
    print("KERNEL_OK")
</pallas_src>

<mosaic_0001>
module attributes {stable_mosaic.version = 11 : i64} {
  func.func @_critic_kernel(%arg0: memref<56x56xf32, #tpu.memory_space<vmem>>, %arg1: memref<4x28x56xf32, #tpu.memory_space<vmem>>, %arg2: memref<4x56x224xf32, #tpu.memory_space<vmem>>, %arg3: memref<1x224xf32, #tpu.memory_space<vmem>>, %arg4: memref<4x14x28xf32, #tpu.memory_space<vmem>>, %arg5: memref<4x224x224xf32, #tpu.memory_space<vmem>>, %arg6: memref<3x224xf32, #tpu.memory_space<vmem>>, %arg7: memref<224x224xf32, #tpu.memory_space<vmem>>, %arg8: memref<3x8x14xf32, #tpu.memory_space<vmem>>, %arg9: memref<3x224x256xf32, #tpu.memory_space<vmem>>, %arg10: memref<3x256xf32, #tpu.memory_space<vmem>>, %arg11: memref<256x256xf32, #tpu.memory_space<vmem>>, %arg12: memref<4x2x8xf32, #tpu.memory_space<vmem>>, %arg13: memref<4x1x256xf32, #tpu.memory_space<vmem>>, %arg14: memref<1x1xf32, #tpu.memory_space<vmem>>, %arg15: memref<2x1xf32, #tpu.memory_space<vmem>>) attributes {dimension_semantics = [], scalar_prefetch = 0 : i64, scratch_operands = 0 : i64, tpu.core_type = #tpu.core_type<tc>} {
    %c0 = arith.constant 0 : index
    %c0_0 = arith.constant 0 : index
    %0 = vector.load %arg0[%c0, %c0_0] : memref<56x56xf32, #tpu.memory_space<vmem>>, vector<56x56xf32>
    %c0_1 = arith.constant 0 : index
    %c0_2 = arith.constant 0 : index
    %c0_3 = arith.constant 0 : index
    %1 = vector.load %arg1[%c0_1, %c0_2, %c0_3] : memref<4x28x56xf32, #tpu.memory_space<vmem>>, vector<1x28x56xf32>
    %2 = vector.shape_cast %1 : vector<1x28x56xf32> to vector<28x56xf32>
    %cst = arith.constant dense<0.000000e+00> : vector<28x56xf32>
    %3 = tpu.matmul %2, %0, %cst {dimension_numbers = #tpu.dot_dimension_numbers<[1], [0], [0], [1], [0, 0, 1, 1], [], []>} : vector<28x56xf32>, vector<56x56xf32>, vector<28x56xf32> -> vector<28x56xf32>
    %c0_4 = arith.constant 0 : index
    %c0_5 = arith.constant 0 : index
    %c0_6 = arith.constant 0 : index
    %4 = vector.load %arg2[%c0_4, %c0_5, %c0_6] : memref<4x56x224xf32, #tpu.memory_space<vmem>>, vector<1x56x224xf32>
    %5 = vector.shape_cast %4 : vector<1x56x224xf32> to vector<56x224xf32>
    %cst_7 = arith.constant dense<0.000000e+00> : vector<28x224xf32>
    %6 = tpu.matmul %3, %5, %cst_7 {dimension_numbers = #tpu.dot_dimension_numbers<[1], [0], [0], [1], [0, 0, 1, 1], [], []>} : vector<28x56xf32>, vector<56x224xf32>, vector<28x224xf32> -> vector<28x224xf32>
    %c1 = arith.constant 1 : index
    %c0_8 = arith.constant 0 : index
    %c0_9 = arith.constant 0 : index
    %7 = vector.load %arg1[%c1, %c0_8, %c0_9] : memref<4x28x56xf32, #tpu.memory_space<vmem>>, vector<1x28x56xf32>
    %8 = vector.shape_cast %7 : vector<1x28x56xf32> to vector<28x56xf32>
    %cst_10 = arith.constant dense<0.000000e+00> : vector<28x56xf32>
    %9 = tpu.matmul %8, %0, %cst_10 {dimension_numbers = #tpu.dot_dimension_numbers<[1], [0], [0], [1], [0, 0, 1, 1], [], []>} : vector<28x56xf32>, vector<56x56xf32>, vector<28x56xf32> -> vector<28x56xf32>
    %c1_11 = arith.constant 1 : index
    %c0_12 = arith.constant 0 : index
    %c0_13 = arith.constant 0 : index
    %10 = vector.load %arg2[%c1_11, %c0_12, %c0_13] : memref<4x56x224xf32, #tpu.memory_space<vmem>>, vector<1x56x224xf32>
    %11 = vector.shape_cast %10 : vector<1x56x224xf32> to vector<56x224xf32>
    %cst_14 = arith.constant dense<0.000000e+00> : vector<28x224xf32>
    %12 = tpu.matmul %9, %11, %cst_14 {dimension_numbers = #tpu.dot_dimension_numbers<[1], [0], [0], [1], [0, 0, 1, 1], [], []>} : vector<28x56xf32>, vector<56x224xf32>, vector<28x224xf32> -> vector<28x224xf32>
    %13 = arith.addf %6, %12 : vector<28x224xf32>
    %c2 = arith.constant 2 : index
    %c0_15 = arith.constant 0 : index
    %c0_16 = arith.constant 0 : index
    %14 = vector.load %arg1[%c2, %c0_15, %c0_16] : memref<4x28x56xf32, #tpu.memory_space<vmem>>, vector<1x28x56xf32>
    %15 = vector.shape_cast %14 : vector<1x28x56xf32> to vector<28x56xf32>
    %cst_17 = arith.constant dense<0.000000e+00> : vector<28x56xf32>
    %16 = tpu.matmul %15, %0, %cst_17 {dimension_numbers = #tpu.dot_dimension_numbers<[1], [0], [0], [1], [0, 0, 1, 1], [], []>} : vector<28x56xf32>, vector<56x56xf32>, vector<28x56xf32> -> vector<28x56xf32>
    %c2_18 = arith.constant 2 : index
    %c0_19 = arith.constant 0 : index
    %c0_20 = arith.constant 0 : index
    %17 = vector.load %arg2[%c2_18, %c0_19, %c0_20] : memref<4x56x224xf32, #tpu.memory_space<vmem>>, vector<1x56x224xf32>
    %18 = vector.shape_cast %17 : vector<1x56x224xf32> to vector<56x224xf32>
    %cst_21 = arith.constant dense<0.000000e+00> : vector<28x224xf32>
    %19 = tpu.matmul %16, %18, %cst_21 {dimension_numbers = #tpu.dot_dimension_numbers<[1], [0], [0], [1], [0, 0, 1, 1], [], []>} : vector<28x56xf32>, vector<56x224xf32>, vector<28x224xf32> -> vector<28x224xf32>
    %20 = arith.addf %13, %19 : vector<28x224xf32>
    %c3 = arith.constant 3 : index
    %c0_22 = arith.constant 0 : index
    %c0_23 = arith.constant 0 : index
    %21 = vector.load %arg1[%c3, %c0_22, %c0_23] : memref<4x28x56xf32, #tpu.memory_space<vmem>>, vector<1x28x56xf32>
    %22 = vector.shape_cast %21 : vector<1x28x56xf32> to vector<28x56xf32>
    %cst_24 = arith.constant dense<0.000000e+00> : vector<28x56xf32>
    %23 = tpu.matmul %22, %0, %cst_24 {dimension_numbers = #tpu.dot_dimension_numbers<[1], [0], [0], [1], [0, 0, 1, 1], [], []>} : vector<28x56xf32>, vector<56x56xf32>, vector<28x56xf32> -> vector<28x56xf32>
    %c3_25 = arith.constant 3 : index
    %c0_26 = arith.constant 0 : index
    %c0_27 = arith.constant 0 : index
    %24 = vector.load %arg2[%c3_25, %c0_26, %c0_27] : memref<4x56x224xf32, #tpu.memory_space<vmem>>, vector<1x56x224xf32>
    %25 = vector.shape_cast %24 : vector<1x56x224xf32> to vector<56x224xf32>
    %cst_28 = arith.constant dense<0.000000e+00> : vector<28x224xf32>
    %26 = tpu.matmul %23, %25, %cst_28 {dimension_numbers = #tpu.dot_dimension_numbers<[1], [0], [0], [1], [0, 0, 1, 1], [], []>} : vector<28x56xf32>, vector<56x224xf32>, vector<28x224xf32> -> vector<28x224xf32>
    %27 = arith.addf %20, %26 : vector<28x224xf32>
    %c0_29 = arith.constant 0 : index
    %c0_30 = arith.constant 0 : index
    %28 = vector.load %arg3[%c0_29, %c0_30] : memref<1x224xf32, #tpu.memory_space<vmem>>, vector<1x224xf32>
    %29 = vector.broadcast %28 : vector<1x224xf32> to vector<28x224xf32>
    %30 = arith.addf %27, %29 : vector<28x224xf32>
    %cst_31 = arith.constant 2.000000e-01 : f32
    %31 = vector.broadcast %cst_31 : f32 to vector<28x224xf32>
    %32 = arith.mulf %31, %30 : vector<28x224xf32>
    %33 = arith.maximumf %30, %32 : vector<28x224xf32>
    %c0_32 = arith.constant 0 : index
    %c0_33 = arith.constant 0 : index
    %c0_34 = arith.constant 0 : index
    %34 = vector.load %arg4[%c0_32, %c0_33, %c0_34] : memref<4x14x28xf32, #tpu.memory_space<vmem>>, vector<1x14x28xf32>
    %35 = vector.shape_cast %34 : vector<1x14x28xf32> to vector<14x28xf32>
    %cst_35 = arith.constant dense<0.000000e+00> : vector<14x224xf32>
    %36 = tpu.matmul %35, %33, %cst_35 {dimension_numbers = #tpu.dot_dimension_numbers<[1], [0], [0], [1], [0, 0, 1, 1], [], []>} : vector<14x28xf32>, vector<28x224xf32>, vector<14x224xf32> -> vector<14x224xf32>
    %c0_36 = arith.constant 0 : index
    %c0_37 = arith.constant 0 : index
    %c0_38 = arith.constant 0 : index
    %37 = vector.load %arg5[%c0_36, %c0_37, %c0_38] : memref<4x224x224xf32, #tpu.memory_space<vmem>>, vector<1x224x224xf32>
    %38 = vector.shape_cast %37 : vector<1x224x224xf32> to vector<224x224xf32>
    %cst_39 = arith.constant dense<0.000000e+00> : vector<14x224xf32>
    %39 = tpu.matmul %36, %38, %cst_39 {dimension_numbers = #tpu.dot_dimension_numbers<[1], [0], [0], [1], [0, 0, 1, 1], [], []>} : vector<14x224xf32>, vector<224x224xf32>, vector<14x224xf32> -> vector<14x224xf32>
    %c1_40 = arith.constant 1 : index
    %c0_41 = arith.constant 0 : index
    %c0_42 = arith.constant 0 : index
    %40 = vector.load %arg4[%c1_40, %c0_41, %c0_42] : memref<4x14x28xf32, #tpu.memory_space<vmem>>, vector<1x14x28xf32>
    %41 = vector.shape_cast %40 : vector<1x14x28xf32> to vector<14x28xf32>
    %cst_43 = arith.constant dense<0.000000e+00> : vector<14x224xf32>
    %42 = tpu.matmul %41, %33, %cst_43 {dimension_numbers = #tpu.dot_dimension_numbers<[1], [0], [0], [1], [0, 0, 1, 1], [], []>} : vector<14x28xf32>, vector<28x224xf32>, vector<14x224xf32> -> vector<14x224xf32>
    %c1_44 = arith.constant 1 : index
    %c0_45 = arith.constant 0 : index
    %c0_46 = arith.constant 0 : index
    %43 = vector.load %arg5[%c1_44, %c0_45, %c0_46] : memref<4x224x224xf32, #tpu.memory_space<vmem>>, vector<1x224x224xf32>
    %44 = vector.shape_cast %43 : vector<1x224x224xf32> to vector<224x224xf32>
    %cst_47 = arith.constant dense<0.000000e+00> : vector<14x224xf32>
    %45 = tpu.matmul %42, %44, %cst_47 {dimension_numbers = #tpu.dot_dimension_numbers<[1], [0], [0], [1], [0, 0, 1, 1], [], []>} : vector<14x224xf32>, vector<224x224xf32>, vector<14x224xf32> -> vector<14x224xf32>
    %46 = arith.addf %39, %45 : vector<14x224xf32>
    %c2_48 = arith.constant 2 : index
    %c0_49 = arith.constant 0 : index
    %c0_50 = arith.constant 0 : index
    %47 = vector.load %arg4[%c2_48, %c0_49, %c0_50] : memref<4x14x28xf32, #tpu.memory_space<vmem>>, vector<1x14x28xf32>
    %48 = vector.shape_cast %47 : vector<1x14x28xf32> to vector<14x28xf32>
    %cst_51 = arith.constant dense<0.000000e+00> : vector<14x224xf32>
    %49 = tpu.matmul %48, %33, %cst_51 {dimension_numbers = #tpu.dot_dimension_numbers<[1], [0], [0], [1], [0, 0, 1, 1], [], []>} : vector<14x28xf32>, vector<28x224xf32>, vector<14x224xf32> -> vector<14x224xf32>
    %c2_52 = arith.constant 2 : index
    %c0_53 = arith.constant 0 : index
    %c0_54 = arith.constant 0 : index
    %50 = vector.load %arg5[%c2_52, %c0_53, %c0_54] : memref<4x224x224xf32, #tpu.memory_space<vmem>>, vector<1x224x224xf32>
    %51 = vector.shape_cast %50 : vector<1x224x224xf32> to vector<224x224xf32>
    %cst_55 = arith.constant dense<0.000000e+00> : vector<14x224xf32>
    %52 = tpu.matmul %49, %51, %cst_55 {dimension_numbers = #tpu.dot_dimension_numbers<[1], [0], [0], [1], [0, 0, 1, 1], [], []>} : vector<14x224xf32>, vector<224x224xf32>, vector<14x224xf32> -> vector<14x224xf32>
    %53 = arith.addf %46, %52 : vector<14x224xf32>
    %c3_56 = arith.constant 3 : index
    %c0_57 = arith.constant 0 : index
    %c0_58 = arith.constant 0 : index
    %54 = vector.load %arg4[%c3_56, %c0_57, %c0_58] : memref<4x14x28xf32, #tpu.memory_space<vmem>>, vector<1x14x28xf32>
    %55 = vector.shape_cast %54 : vector<1x14x28xf32> to vector<14x28xf32>
    %cst_59 = arith.constant dense<0.000000e+00> : vector<14x224xf32>
    %56 = tpu.matmul %55, %33, %cst_59 {dimension_numbers = #tpu.dot_dimension_numbers<[1], [0], [0], [1], [0, 0, 1, 1], [], []>} : vector<14x28xf32>, vector<28x224xf32>, vector<14x224xf32> -> vector<14x224xf32>
    %c3_60 = arith.constant 3 : index
    %c0_61 = arith.constant 0 : index
    %c0_62 = arith.constant 0 : index
    %57 = vector.load %arg5[%c3_60, %c0_61, %c0_62] : memref<4x224x224xf32, #tpu.memory_space<vmem>>, vector<1x224x224xf32>
    %58 = vector.shape_cast %57 : vector<1x224x224xf32> to vector<224x224xf32>
    %cst_63 = arith.constant dense<0.000000e+00> : vector<14x224xf32>
    %59 = tpu.matmul %56, %58, %cst_63 {dimension_numbers = #tpu.dot_dimension_numbers<[1], [0], [0], [1], [0, 0, 1, 1], [], []>} : vector<14x224xf32>, vector<224x224xf32>, vector<14x224xf32> -> vector<14x224xf32>
    %60 = arith.addf %53, %59 : vector<14x224xf32>
    %c0_64 = arith.constant 0 : index
    %c0_65 = arith.constant 0 : index
    %61 = vector.load %arg6[%c0_64, %c0_65] : memref<3x224xf32, #tpu.memory_space<vmem>>, vector<1x224xf32>
    %62 = vector.broadcast %61 : vector<1x224xf32> to vector<14x224xf32>
    %63 = arith.addf %60, %62 : vector<14x224xf32>
    %cst_66 = arith.constant dense<0.000000e+00> : vector<224xf32>
    %64 = vector.multi_reduction <add>, %63, %cst_66 [0] : vector<14x224xf32> to vector<224xf32>
    %65 = vector.shape_cast %64 : vector<224xf32> to vector<1x224xf32>
    %c0_67 = arith.constant 0 : index
    %c0_68 = arith.constant 0 : index
    %66 = vector.load %arg7[%c0_67, %c0_68] : memref<224x224xf32, #tpu.memory_space<vmem>>, vector<224x224xf32>
    %cst_69 = arith.constant dense<0.000000e+00> : vector<1x224xf32>
    %67 = tpu.matmul %65, %66, %cst_69 {dimension_numbers = #tpu.dot_dimension_numbers<[1], [0], [0], [1], [0, 0, 1, 1], [], []>} : vector<1x224xf32>, vector<224x224xf32>, vector<1x224xf32> -> vector<1x224xf32>
    %68 = vector.broadcast %67 : vector<1x224xf32> to vector<14x224xf32>
    %69 = arith.subf %63, %68 : vector<14x224xf32>
    %70 = arith.mulf %69, %69 : vector<14x224xf32>
    %cst_70 = arith.constant dense<0.000000e+00> : vector<224xf32>
    %71 = vector.multi_reduction <add>, %70, %cst_70 [0] : vector<14x224xf32> to vector<224xf32>
    %72 = vector.shape_cast %71 : vector<224xf32> to vector<1x224xf32>
    %c0_71 = arith.constant 0 : index
    %c0_72 = arith.constant 0 : index
    %73 = vector.load %arg7[%c0_71, %c0_72] : memref<224x224xf32, #tpu.memory_space<vmem>>, vector<224x224xf32>
    %cst_73 = arith.constant dense<0.000000e+00> : vector<1x224xf32>
    %74 = tpu.matmul %72, %73, %cst_73 {dimension_numbers = #tpu.dot_dimension_numbers<[1], [0], [0], [1], [0, 0, 1, 1], [], []>} : vector<1x224xf32>, vector<224x224xf32>, vector<1x224xf32> -> vector<1x224xf32>
    %cst_74 = arith.constant 9.99999974E-6 : f32
    %75 = vector.broadcast %cst_74 : f32 to vector<1x224xf32>
    %76 = arith.addf %74, %75 : vector<1x224xf32>
    %77 = math.rsqrt %76 : vector<1x224xf32>
    %78 = vector.broadcast %77 : vector<1x224xf32> to vector<14x224xf32>
    %79 = arith.mulf %69, %78 : vector<14x224xf32>
    %c1_75 = arith.constant 1 : index
    %c0_76 = arith.constant 0 : index
    %80 = vector.load %arg6[%c1_75, %c0_76] : memref<3x224xf32, #tpu.memory_space<vmem>>, vector<1x224xf32>
    %81 = vector.broadcast %80 : vector<1x224xf32> to vector<14x224xf32>
    %82 = arith.mulf %79, %81 : vector<14x224xf32>
    %c2_77 = arith.constant 2 : index
    %c0_78 = arith.constant 0 : index
    %83 = vector.load %arg6[%c2_77, %c0_78] : memref<3x224xf32, #tpu.memory_space<vmem>>, vector<1x224xf32>
    %84 = vector.broadcast %83 : vector<1x224xf32> to vector<14x224xf32>
    %85 = arith.addf %82, %84 : vector<14x224xf32>
    %cst_79 = arith.constant 2.000000e-01 : f32
    %86 = vector.broadcast %cst_79 : f32 to vector<14x224xf32>
    %87 = arith.mulf %86, %85 : vector<14x224xf32>
    %88 = arith.maximumf %85, %87 : vector<14x224xf32>
    %c0_80 = arith.constant 0 : index
    %c0_81 = arith.constant 0 : index
    %c0_82 = arith.constant 0 : index
    %89 = vector.load %arg8[%c0_80, %c0_81, %c0_82] : memref<3x8x14xf32, #tpu.memory_space<vmem>>, vector<1x8x14xf32>
    %90 = vector.shape_cast %89 : vector<1x8x14xf32> to vector<8x14xf32>
    %cst_83 = arith.constant dense<0.000000e+00> : vector<8x224xf32>
    %91 = tpu.matmul %90, %88, %cst_83 {dimension_numbers = #tpu.dot_dimension_numbers<[1], [0], [0], [1], [0, 0, 1, 1], [], []>} : vector<8x14xf32>, vector<14x224xf32>, vector<8x224xf32> -> vector<8x224xf32>
    %c0_84 = arith.constant 0 : index
    %c0_85 = arith.constant 0 : index
    %c0_86 = arith.constant 0 : index
    %92 = vector.load %arg9[%c0_84, %c0_85, %c0_86] : memref<3x224x256xf32, #tpu.memory_space<vmem>>, vector<1x224x256xf32>
    %93 = vector.shape_cast %92 : vector<1x224x256xf32> to vector<224x256xf32>
    %cst_87 = arith.constant dense<0.000000e+00> : vector<8x256xf32>
    %94 = tpu.matmul %91, %93, %cst_87 {dimension_numbers = #tpu.dot_dimension_numbers<[1], [0], [0], [1], [0, 0, 1, 1], [], []>} : vector<8x224xf32>, vector<224x256xf32>, vector<8x256xf32> -> vector<8x256xf32>
    %c1_88 = arith.constant 1 : index
    %c0_89 = arith.constant 0 : index
    %c0_90 = arith.constant 0 : index
    %95 = vector.load %arg8[%c1_88, %c0_89, %c0_90] : memref<3x8x14xf32, #tpu.memory_space<vmem>>, vector<1x8x14xf32>
    %96 = vector.shape_cast %95 : vector<1x8x14xf32> to vector<8x14xf32>
    %cst_91 = arith.constant dense<0.000000e+00> : vector<8x224xf32>
    %97 = tpu.matmul %96, %88, %cst_91 {dimension_numbers = #tpu.dot_dimension_numbers<[1], [0], [0], [1], [0, 0, 1, 1], [], []>} : vector<8x14xf32>, vector<14x224xf32>, vector<8x224xf32> -> vector<8x224xf32>
    %c1_92 = arith.constant 1 : index
    %c0_93 = arith.constant 0 : index
    %c0_94 = arith.constant 0 : index
    %98 = vector.load %arg9[%c1_92, %c0_93, %c0_94] : memref<3x224x256xf32, #tpu.memory_space<vmem>>, vector<1x224x256xf32>
    %99 = vector.shape_cast %98 : vector<1x224x256xf32> to vector<224x256xf32>
    %cst_95 = arith.constant dense<0.000000e+00> : vector<8x256xf32>
    %100 = tpu.matmul %97, %99, %cst_95 {dimension_numbers = #tpu.dot_dimension_numbers<[1], [0], [0], [1], [0, 0, 1, 1], [], []>} : vector<8x224xf32>, vector<224x256xf32>, vector<8x256xf32> -> vector<8x256xf32>
    %101 = arith.addf %94, %100 : vector<8x256xf32>
    %c2_96 = arith.constant 2 : index
    %c0_97 = arith.constant 0 : index
    %c0_98 = arith.constant 0 : index
    %102 = vector.load %arg8[%c2_96, %c0_97, %c0_98] : memref<3x8x14xf32, #tpu.memory_space<vmem>>, vector<1x8x14xf32>
    %103 = vector.shape_cast %102 : vector<1x8x14xf32> to vector<8x14xf32>
    %cst_99 = arith.constant dense<0.000000e+00> : vector<8x224xf32>
    %104 = tpu.matmul %103, %88, %cst_99 {dimension_numbers = #tpu.dot_dimension_numbers<[1], [0], [0], [1], [0, 0, 1, 1], [], []>} : vector<8x14xf32>, vector<14x224xf32>, vector<8x224xf32> -> vector<8x224xf32>
    %c2_100 = arith.constant 2 : index
    %c0_101 = arith.constant 0 : index
    %c0_102 = arith.constant 0 : index
    %105 = vector.load %arg9[%c2_100, %c0_101, %c0_102] : memref<3x224x256xf32, #tpu.memory_space<vmem>>, vector<1x224x256xf32>
    %106 = vector.shape_cast %105 : vector<1x224x256xf32> to vector<224x256xf32>
    %cst_103 = arith.constant dense<0.000000e+00> : vector<8x256xf32>
    %107 = tpu.matmul %104, %106, %cst_103 {dimension_numbers = #tpu.dot_dimension_numbers<[1], [0], [0], [1], [0, 0, 1, 1], [], []>} : vector<8x224xf32>, vector<224x256xf32>, vector<8x256xf32> -> vector<8x256xf32>
    %108 = arith.addf %101, %107 : vector<8x256xf32>
    %c0_104 = arith.constant 0 : index
    %c0_105 = arith.constant 0 : index
    %109 = vector.load %arg10[%c0_104, %c0_105] : memref<3x256xf32, #tpu.memory_space<vmem>>, vector<1x256xf32>
    %110 = vector.broadcast %109 : vector<1x256xf32> to vector<8x256xf32>
    %111 = arith.addf %108, %110 : vector<8x256xf32>
    %cst_106 = arith.constant dense<0.000000e+00> : vector<256xf32>
    %112 = vector.multi_reduction <add>, %111, %cst_106 [0] : vector<8x256xf32> to vector<256xf32>
    %113 = vector.shape_cast %112 : vector<256xf32> to vector<1x256xf32>
    %c0_107 = arith.constant 0 : index
    %c0_108 = arith.constant 0 : index
    %114 = vector.load %arg11[%c0_107, %c0_108] : memref<256x256xf32, #tpu.memory_space<vmem>>, vector<256x256xf32>
    %cst_109 = arith.constant dense<0.000000e+00> : vector<1x256xf32>
    %115 = tpu.matmul %113, %114, %cst_109 {dimension_numbers = #tpu.dot_dimension_numbers<[1], [0], [0], [1], [0, 0, 1, 1], [], []>} : vector<1x256xf32>, vector<256x256xf32>, vector<1x256xf32> -> vector<1x256xf32>
    %116 = vector.broadcast %115 : vector<1x256xf32> to vector<8x256xf32>
    %117 = arith.subf %111, %116 : vector<8x256xf32>
    %118 = arith.mulf %117, %117 : vector<8x256xf32>
    %cst_110 = arith.constant dense<0.000000e+00> : vector<256xf32>
    %119 = vector.multi_reduction <add>, %118, %cst_110 [0] : vector<8x256xf32> to vector<256xf32>
    %120 = vector.shape_cast %119 : vector<256xf32> to vector<1x256xf32>
    %c0_111 = arith.constant 0 : index
    %c0_112 = arith.constant 0 : index
    %121 = vector.load %arg11[%c0_111, %c0_112] : memref<256x256xf32, #tpu.memory_space<vmem>>, vector<256x256xf32>
    %cst_113 = arith.constant dense<0.000000e+00> : vector<1x256xf32>
    %122 = tpu.matmul %120, %121, %cst_113 {dimension_numbers = #tpu.dot_dimension_numbers<[1], [0], [0], [1], [0, 0, 1, 1], [], []>} : vector<1x256xf32>, vector<256x256xf32>, vector<1x256xf32> -> vector<1x256xf32>
    %cst_114 = arith.constant 9.99999974E-6 : f32
    %123 = vector.broadcast %cst_114 : f32 to vector<1x256xf32>
    %124 = arith.addf %122, %123 : vector<1x256xf32>
    %125 = math.rsqrt %124 : vector<1x256xf32>
    %126 = vector.broadcast %125 : vector<1x256xf32> to vector<8x256xf32>
    %127 = arith.mulf %117, %126 : vector<8x256xf32>
    %c1_115 = arith.constant 1 : index
    %c0_116 = arith.constant 0 : index
    %128 = vector.load %arg10[%c1_115, %c0_116] : memref<3x256xf32, #tpu.memory_space<vmem>>, vector<1x256xf32>
    %129 = vector.broadcast %128 : vector<1x256xf32> to vector<8x256xf32>
    %130 = arith.mulf %127, %129 : vector<8x256xf32>
    %c2_117 = arith.constant 2 : index
    %c0_118 = arith.constant 0 : index
    %131 = vector.load %arg10[%c2_117, %c0_118] : memref<3x256xf32, #tpu.memory_space<vmem>>, vector<1x256xf32>
    %132 = vector.broadcast %131 : vector<1x256xf32> to vector<8x256xf32>
    %133 = arith.addf %130, %132 : vector<8x256xf32>
    %cst_119 = arith.constant 2.000000e-01 : f32
    %134 = vector.broadcast %cst_119 : f32 to vector<8x256xf32>
    %135 = arith.mulf %134, %133 : vector<8x256xf32>
    %136 = arith.maximumf %133, %135 : vector<8x256xf32>
    %c0_120 = arith.constant 0 : index
    %c0_121 = arith.constant 0 : index
    %c0_122 = arith.constant 0 : index
    %137 = vector.load %arg12[%c0_120, %c0_121, %c0_122] : memref<4x2x8xf32, #tpu.memory_space<vmem>>, vector<1x2x8xf32>
    %138 = vector.shape_cast %137 : vector<1x2x8xf32> to vector<2x8xf32>
    %cst_123 = arith.constant dense<0.000000e+00> : vector<2x256xf32>
    %139 = tpu.matmul %138, %136, %cst_123 {dimension_numbers = #tpu.dot_dimension_numbers<[1], [0], [0], [1], [0, 0, 1, 1], [], []>} : vector<2x8xf32>, vector<8x256xf32>, vector<2x256xf32> -> vector<2x256xf32>
    %c0_124 = arith.constant 0 : index
    %c0_125 = arith.constant 0 : index
    %c0_126 = arith.constant 0 : index
    %140 = vector.load %arg13[%c0_124, %c0_125, %c0_126] : memref<4x1x256xf32, #tpu.memory_space<vmem>>, vector<1x1x256xf32>
    %141 = vector.shape_cast %140 : vector<1x1x256xf32> to vector<1x256xf32>
    %142 = vector.broadcast %141 : vector<1x256xf32> to vector<2x256xf32>
    %143 = arith.mulf %139, %142 : vector<2x256xf32>
    %cst_127 = arith.constant dense<0.000000e+00> : vector<2xf32>
    %144 = vector.multi_reduction <add>, %143, %cst_127 [1] : vector<2x256xf32> to vector<2xf32>
    %145 = vector.shape_cast %144 : vector<2xf32> to vector<2x1xf32>
    %c1_128 = arith.constant 1 : index
    %c0_129 = arith.constant 0 : index
    %c0_130 = arith.constant 0 : index
    %146 = vector.load %arg12[%c1_128, %c0_129, %c0_130] : memref<4x2x8xf32, #tpu.memory_space<vmem>>, vector<1x2x8xf32>
    %147 = vector.shape_cast %146 : vector<1x2x8xf32> to vector<2x8xf32>
    %cst_131 = arith.constant dense<0.000000e+00> : vector<2x256xf32>
    %148 = tpu.matmul %147, %136, %cst_131 {dimension_numbers = #tpu.dot_dimension_numbers<[1], [0], [0], [1], [0, 0, 1, 1], [], []>} : vector<2x8xf32>, vector<8x256xf32>, vector<2x256xf32> -> vector<2x256xf32>
    %c1_132 = arith.constant 1 : index
    %c0_133 = arith.constant 0 : index
    %c0_134 = arith.constant 0 : index
    %149 = vector.load %arg13[%c1_132, %c0_133, %c0_134] : memref<4x1x256xf32, #tpu.memory_space<vmem>>, vector<1x1x256xf32>
    %150 = vector.shape_cast %149 : vector<1x1x256xf32> to vector<1x256xf32>
    %151 = vector.broadcast %150 : vector<1x256xf32> to vector<2x256xf32>
    %152 = arith.mulf %148, %151 : vector<2x256xf32>
    %cst_135 = arith.constant dense<0.000000e+00> : vector<2xf32>
    %153 = vector.multi_reduction <add>, %152, %cst_135 [1] : vector<2x256xf32> to vector<2xf32>
    %154 = vector.shape_cast %153 : vector<2xf32> to vector<2x1xf32>
    %155 = arith.addf %145, %154 : vector<2x1xf32>
    %c2_136 = arith.constant 2 : index
    %c0_137 = arith.constant 0 : index
    %c0_138 = arith.constant 0 : index
    %156 = vector.load %arg12[%c2_136, %c0_137, %c0_138] : memref<4x2x8xf32, #tpu.memory_space<vmem>>, vector<1x2x8xf32>
    %157 = vector.shape_cast %156 : vector<1x2x8xf32> to vector<2x8xf32>
    %cst_139 = arith.constant dense<0.000000e+00> : vector<2x256xf32>
    %158 = tpu.matmul %157, %136, %cst_139 {dimension_numbers = #tpu.dot_dimension_numbers<[1], [0], [0], [1], [0, 0, 1, 1], [], []>} : vector<2x8xf32>, vector<8x256xf32>, vector<2x256xf32> -> vector<2x256xf32>
    %c2_140 = arith.constant 2 : index
    %c0_141 = arith.constant 0 : index
    %c0_142 = arith.constant 0 : index
    %159 = vector.load %arg13[%c2_140, %c0_141, %c0_142] : memref<4x1x256xf32, #tpu.memory_space<vmem>>, vector<1x1x256xf32>
    %160 = vector.shape_cast %159 : vector<1x1x256xf32> to vector<1x256xf32>
    %161 = vector.broadcast %160 : vector<1x256xf32> to vector<2x256xf32>
    %162 = arith.mulf %158, %161 : vector<2x256xf32>
    %cst_143 = arith.constant dense<0.000000e+00> : vector<2xf32>
    %163 = vector.multi_reduction <add>, %162, %cst_143 [1] : vector<2x256xf32> to vector<2xf32>
    %164 = vector.shape_cast %163 : vector<2xf32> to vector<2x1xf32>
    %165 = arith.addf %155, %164 : vector<2x1xf32>
    %c3_144 = arith.constant 3 : index
    %c0_145 = arith.constant 0 : index
    %c0_146 = arith.constant 0 : index
    %166 = vector.load %arg12[%c3_144, %c0_145, %c0_146] : memref<4x2x8xf32, #tpu.memory_space<vmem>>, vector<1x2x8xf32>
    %167 = vector.shape_cast %166 : vector<1x2x8xf32> to vector<2x8xf32>
    %cst_147 = arith.constant dense<0.000000e+00> : vector<2x256xf32>
    %168 = tpu.matmul %167, %136, %cst_147 {dimension_numbers = #tpu.dot_dimension_numbers<[1], [0], [0], [1], [0, 0, 1, 1], [], []>} : vector<2x8xf32>, vector<8x256xf32>, vector<2x256xf32> -> vector<2x256xf32>
    %c3_148 = arith.constant 3 : index
    %c0_149 = arith.constant 0 : index
    %c0_150 = arith.constant 0 : index
    %169 = vector.load %arg13[%c3_148, %c0_149, %c0_150] : memref<4x1x256xf32, #tpu.memory_space<vmem>>, vector<1x1x256xf32>
    %170 = vector.shape_cast %169 : vector<1x1x256xf32> to vector<1x256xf32>
    %171 = vector.broadcast %170 : vector<1x256xf32> to vector<2x256xf32>
    %172 = arith.mulf %168, %171 : vector<2x256xf32>
    %cst_151 = arith.constant dense<0.000000e+00> : vector<2xf32>
    %173 = vector.multi_reduction <add>, %172, %cst_151 [1] : vector<2x256xf32> to vector<2xf32>
    %174 = vector.shape_cast %173 : vector<2xf32> to vector<2x1xf32>
    %175 = arith.addf %165, %174 : vector<2x1xf32>
    %c0_152 = arith.constant 0 : index
    %c0_153 = arith.constant 0 : index
    %176 = vector.load %arg14[%c0_152, %c0_153] : memref<1x1xf32, #tpu.memory_space<vmem>>, vector<1x1xf32>
    %177 = vector.broadcast %176 : vector<1x1xf32> to vector<2x1xf32>
    %178 = arith.addf %175, %177 : vector<2x1xf32>
    %c0_154 = arith.constant 0 : index
    %c0_155 = arith.constant 0 : index
    %179 = vector.load %arg15[%c0_154, %c0_155] : memref<2x1xf32, #tpu.memory_space<vmem>>, vector<2x1xf32>
    tpu.vector_store %arg15[%c0_154, %c0_155], %178 {strides = array<i32>} : memref<2x1xf32, #tpu.memory_space<vmem>>, vector<2x1xf32>,
    return
  }
}

</mosaic_0001>

<bundles_post_ra>
// kernel: critic_forward.1
= control target key start
LH: loop header
LB: loop body
LE: loop exit
PB: predicated region body
PF: predicated region fallthrough
CT: control target
= control target key end

     0   :  { %s5921_s0 = inlined_call_operand.vmem [shape: f32[56,56], index: 0, kind: input, shape index: {}]   ;;  %s5922_s1 = inlined_call_operand.vmem [shape: f32[4,28,56], index: 1, kind: input, shape index: {}]   ;;  %s5923_s2 = inlined_call_operand.vmem [shape: f32[4,56,224], index: 2, kind: input, shape index: {}]   ;;  %s5924_s3 = inlined_call_operand.vmem [shape: f32[1,224], index: 3, kind: input, shape index: {}]   ;;  %s5925_s4 = inlined_call_operand.vmem [shape: f32[4,14,28], index: 4, kind: input, shape index: {}]   ;;  %s5926_s5 = inlined_call_operand.hbm [shape: f32[4,224,224], index: 5, kind: input, shape index: {}]   ;;  %s5927_s6 = inlined_call_operand.vmem [shape: f32[3,224], index: 6, kind: input, shape index: {}]   ;;  %s5928_s7 = inlined_call_operand.hbm [shape: f32[224,224], index: 7, kind: input, shape index: {}]   ;;  %s5929_s8 = inlined_call_operand.vmem [shape: f32[3,8,14], index: 8, kind: input, shape index: {}]   ;;  %s5930_s9 = inlined_call_operand.hbm [shape: f32[3,224,256], index: 9, kind: input, shape index: {}]   ;;  %s5931_s10 = inlined_call_operand.vmem [shape: f32[3,256], index: 10, kind: input, shape index: {}]   ;;  %s5932_s11 = inlined_call_operand.vmem [shape: f32[256,256], index: 11, kind: input, shape index: {}]   ;;  %s5933_s12 = inlined_call_operand.vmem [shape: f32[4,2,8], index: 12, kind: input, shape index: {}]   ;;  %s5934_s13 = inlined_call_operand.vmem [shape: f32[4,1,256], index: 13, kind: input, shape index: {}]   ;;  %s5935_s14 = inlined_call_operand.<no memory space> [shape: f32[1,1], index: 14, kind: input, shape index: {}]   ;;  %s5936_s15 = inlined_call_operand.vmem [shape: f32[2,1], index: 15, kind: output, shape index: {}]  }
   0x1   :  { %v20_v0 = vstv %s5935_s14 }
   0x2   :  { %21 = vst [vmem:[#allocation2] sm:$0x1] %v20_v0 }
   0x3   :  { %22 = vsyncpa [#allocation4], 0 }
   0x4   :  { %23 = vsyncpa [#allocation6], 0  ;;  %s4785_s20 = smov [#allocation5]   ;;  %s4786_s22 = smov [#allocation3]  }
   0x5   :  { %s53_s21 = sshll.u32 %s4785_s20, 4  ;;  %s39_s23 = sshll.u32 %s4786_s22, 4  ;;  %s54_s21 = int_to_ptr.vmem [resolvable:$true] %s53_s21  ;;  %s4875_s23 = int_to_ptr.vmem [resolvable:$true] %s39_s23 }
   0x6   :  { %s4715_s26 = scalar_lea.hbm %s5928_s7, 7168 }
   0x7   :  { %p4716_p0 = scmp.ne.s32.totalorder %s5928_s7, %s4715_s26  ;;  %p4719_p1 = scmp.lt.u32.totalorder %s4715_s26, %s5928_s7 }
   0x9   :  { %p4721_p2 = pnand %p4719_p1, %p4716_p0 }
   0xb   :  { %4724 = shalt.err (!%p4721_p2)
}
   0xc   :  { %s4725_s30 = scalar_lea.vmem %s54_s21, 7168  ;;  %p4730_p4 = scmp.lt.s32.totalorder %s54_s21, %s54_s21 }
   0xd   :  { %p4726_p3 = scmp.ne.s32.totalorder %s54_s21, %s4725_s30  ;;  %p4731_p5 = scmp.lt.s32.totalorder %s4725_s30, %s4725_s30 }
   0xf   :  { %p4732_p6 = por %p4731_p5, %p4730_p4 }
  0x11   :  { %p4733_p7 = pnand %p4732_p6, %p4726_p3 }
  0x13   :  { %4736 = shalt.err (!%p4733_p7)
}
  0x14   :  { %s4787_s16 = smov 256   ;;  %s4788_s17 = smov 16  }
  0x15   :  { %59 = dma.hbm_to_vmem [thread:$0]  %s5928_s7, 7168, %s54_s21, [#allocation6], %s4787_s16, %s4787_s16, %s4788_s17  }
  0x16   :  { %s4737_s24 = scalar_lea.hbm %s5926_s5, 28672 }
  0x17   :  { %p4738_p8 = scmp.ne.s32.totalorder %s5926_s5, %s4737_s24  ;;  %p4741_p9 = scmp.lt.u32.totalorder %s4737_s24, %s5926_s5 }
  0x19   :  { %p4743_p10 = pnand %p4741_p9, %p4738_p8 }
  0x1b   :  { %4746 = shalt.err (!%p4743_p10)
}
  0x1c   :  { %s4747_s29 = scalar_lea.vmem %s4875_s23, 28672  ;;  %p4752_p12 = scmp.lt.s32.totalorder %s4875_s23, %s4875_s23 }
  0x1d   :  { %p4748_p11 = scmp.ne.s32.totalorder %s4875_s23, %s4747_s29  ;;  %p4753_p13 = scmp.lt.s32.totalorder %s4747_s29, %s4747_s29 }
  0x1f   :  { %p4754_p0 = por %p4753_p13, %p4752_p12 }
  0x21   :  { %p4755_p1 = pnand %p4754_p0, %p4748_p11 }
  0x23   :  { %4758 = shalt.err (!%p4755_p1)
}
  0x24   :  { %45 = dma.hbm_to_vmem [thread:$0]  %s5926_s5, 28672, %s4875_s23, [#allocation4], %s4787_s16, %s4787_s16, %s4788_s17  }
  0x25   :  { %s4789_s14 = smov [#allocation7]   ;;  %s4759_s20 = scalar_lea.hbm %s5930_s9, 21504 }
  0x26   :  { %s67_s30 = sshll.u32 %s4789_s14, 4  ;;  %p4760_p2 = scmp.ne.s32.totalorder %s5930_s9, %s4759_s20  ;;  %s68_s30 = int_to_ptr.vmem [resolvable:$true] %s67_s30 }
  0x27   :  { %p4763_p3 = scmp.lt.u32.totalorder %s4759_s20, %s5930_s9 }
  0x29   :  { %p4765_p4 = pnand %p4763_p3, %p4760_p2 }
  0x2b   :  { %4768 = shalt.err (!%p4765_p4)
}
  0x2c   :  { %s4769_s27 = scalar_lea.vmem %s68_s30, 21504  ;;  %p4774_p6 = scmp.lt.s32.totalorder %s68_s30, %s68_s30 }
  0x2d   :  { %p4770_p5 = scmp.ne.s32.totalorder %s68_s30, %s4769_s27  ;;  %p4775_p7 = scmp.lt.s32.totalorder %s4769_s27, %s4769_s27 }
  0x2f   :  { %p4776_p8 = por %p4775_p7, %p4774_p6 }
  0x31   :  { %p4777_p9 = pnand %p4776_p8, %p4770_p5 }
  0x33   :  { %4780 = shalt.err (!%p4777_p9)
}
  0x34   :  { %73 = dma.hbm_to_vmem [thread:$0]  %s5930_s9, 21504, %s68_s30, [#allocation6], %s4787_s16, %s4787_s16, %s4788_s17  }
  0x35   :  { %4781 = dma.done.wait [#allocation4], 28672  }
  0x36   :  { %4782 = vsyncadd [#allocation4], 4294938624 }
  0x37   :  { %4783 = dma.done.wait [#allocation6], 28672  }
  0x38   :  { %4784 = vsyncadd [#allocation6], 4294938624  ;;  %v93_v1 = vld [vmem:[%s5921_s0] sm:$0xff]  ;;  %v94_v2 = vld [vmem:[%s5921_s0 + $0x8] sm:$0xff]  ;;  %vm104_vm0 = vcmask 457728   ;;  %v4790_v47 = vmov 0.0  }
  0x39   :  { %v95_v3 = vld [vmem:[%s5921_s0 + $0x10] sm:$0xff]  ;;  %v4936_v4 = vpack.c.bf16 %v94_v2, %v93_v1  ;;  %v96_v5 = vld [vmem:[%s5921_s0 + $0x18] sm:$0xff]  ;;  %v97_v7 = vld [vmem:[%s5921_s0 + $0x20] sm:$0xff]  ;;  %vm1032_vm1 = vcmask 1043456   ;;  %vm4791_vm2 = vmmov 1   ;;  %vm1025_vm4 = vcmask 228352  }
  0x3a   :  { %v4941_v6 = vpack.c.bf16 %v96_v5, %v95_v3  ;;  %v98_v8 = vld [vmem:[%s5921_s0 + $0x28] sm:$0xff]  ;;  %v3607_v9 = vld [vmem:[%s5922_s1 + $0x20] sm:$0xff]  ;;  %v4971_v12 = vld [vmem:[%s5921_s0 + $0x30] sm:$0xff]  ;;  %vm1315_vm5 = vcmask 785408   ;;  %vm1958_vm6 = vcmask 1045504   ;;  %vm1968_vm7 = vcmask 783360  }
  0x3b   :  { %3887 = vmatprep.subr.bf16.mxu1 %v4936_v4  ;;  %3828 = vmatprep.mubr.msk.f32.mxu1 %vm104_vm0, %v3607_v9  ;;  %v100_v10 = vld [vmem:[%s5922_s1] sm:$0xff]  ;;  %v4960_v11 = vpack.c.bf16 %v98_v8, %v97_v7  ;;  %v3616_v13 = vld [vmem:[%s5923_s2 + $0x78] sm:$0xff]  ;;  %v3618_v14 = vld [vmem:[%s5923_s2 + $0x88] sm:$0xff]  ;;  %vm2271_vm9 = vcmask 113664   ;;  %vm3201_vm10 = vcmask 64512   ;;  %vm3290_vm11 = vcmask 1041408  }
  0x3c   :  { %3889 = vmatpush3.bf16.msra.mxu1 %v4936_v4  ;;  %3875 = vmatprep.subr.bf16.mxu0 %v4936_v4  ;;  %v3608_v15 = vld [vmem:[%s5922_s1 + $0x28] sm:$0xff]  ;;  %v3609_v16 = vld [vmem:[%s5922_s1 + $0x30] sm:$0xff]  ;;  %v3898_v19 = vpack.c.bf16 %v3618_v14, %v3616_v13  ;;  %v3617_v21 = vld [vmem:[%s5923_s2 + $0x80] sm:$0xff]  ;;  %vm3595_vm12 = vcmask 1024  }
  0x3d   :  { %3891 = vmatprep.subr.bf16.mxu1 %v4941_v6  ;;  %3877 = vmatpush3.bf16.msra.mxu0 %v4936_v4  ;;  %v101_v17 = vld [vmem:[%s5922_s1 + $0x8] sm:$0xff]  ;;  %v102_v18 = vld [vmem:[%s5922_s1 + $0x10] sm:$0xff]  ;;  %v3620_v22 = vld [vmem:[%s5923_s2 + $0x98] sm:$0xff] }
  0x3e   :  { %3879 = vmatprep.subr.bf16.mxu0 %v4941_v6  ;;  %3808 = vmatprep.mubr.msk.f32.mxu0 %vm104_vm0, %v100_v10  ;;  %v3615_v20 = vld [vmem:[%s5923_s2 + $0x70] sm:$0xff]  ;;  %v3622_v23 = vld [vmem:[%s5923_s2 + $0xa8] sm:$0xff]  ;;  %v3610_v24 = vld [vmem:[%s5922_s1 + $0x38] sm:$0xf] }
  0x3f   :  { %v103_v25 = vld [vmem:[%s5922_s1 + $0x18] sm:$0xf]  ;;  %v3637_v26 = vld [vmem:[%s5922_s1 + $0x40] sm:$0xff]  ;;  %v3900_v27 = vpack.c.bf16 %v3617_v21, %v3615_v20  ;;  %v3902_v28 = vpack.c.bf16 %v3622_v23, %v3620_v22  ;;  %v3619_v29 = vld [vmem:[%s5923_s2 + $0x90] sm:$0xff] }
  0x40   :  { %3893 = vmatpush3.bf16.msra.mxu1 %v4941_v6  ;;  %v3621_v30 = vld [vmem:[%s5923_s2 + $0xa0] sm:$0xff]  ;;  %v3624_v31 = vld [vmem:[%s5923_s2 + $0xb8] sm:$0xff]  ;;  %v3626_v32 = vld [vmem:[%s5923_s2 + $0xc8] sm:$0xff] }
  0x41   :  { %3895 = vmatprep.subr.bf16.mxu1 %v4960_v11  ;;  %3881 = vmatpush3.bf16.msra.mxu0 %v4941_v6  ;;  %v3904_v33 = vpack.c.bf16 %v3621_v30, %v3619_v29  ;;  %v3906_v34 = vpack.c.bf16 %v3626_v32, %v3624_v31  ;;  %v3623_v35 = vld [vmem:[%s5923_s2 + $0xb0] sm:$0xff]  ;;  %v3625_v36 = vld [vmem:[%s5923_s2 + $0xc0] sm:$0xff]  ;;  %v3638_v38 = vld [vmem:[%s5922_s1 + $0x48] sm:$0xff] }
  0x42   :  { %3883 = vmatprep.subr.bf16.mxu0 %v4960_v11  ;;  %v3908_v37 = vpack.c.bf16 %v3625_v36, %v3623_v35  ;;  %v3639_v39 = vld [vmem:[%s5922_s1 + $0x50] sm:$0xff]  ;;  %v3640_v40 = vld [vmem:[%s5922_s1 + $0x58] sm:$0xf]  ;;  %v3663_v41 = vld [vmem:[%s5922_s1 + $0x60] sm:$0xff] }
  0x43   :  { %v3664_v42 = vld [vmem:[%s5922_s1 + $0x68] sm:$0xff]  ;;  %v3665_v43 = vld [vmem:[%s5922_s1 + $0x70] sm:$0xff]  ;;  %v3666_v44 = vld [vmem:[%s5922_s1 + $0x78] sm:$0xf] }
  0x44   :  { %3897 = vmatpush3.bf16.msra.mxu1 %v4960_v11  ;;  %v3628_v45 = vld [vmem:[%s5923_s2 + $0xd8] sm:$0xff]  ;;  %v3627_v46 = vld [vmem:[%s5923_s2 + $0xd0] sm:$0xff]  ;;  %v203_v48 = vld [vmem:[%s5923_s2 + $0x8] sm:$0xff] }
  0x45   :  { %3826 = vmatprep.subr.mxu1 %v4971_v12  ;;  %3885 = vmatpush3.bf16.msra.mxu0 %v4960_v11  ;;  %v205_v49 = vld [vmem:[%s5923_s2 + $0x18] sm:$0xff]  ;;  %v202_v51 = vld [vmem:[%s5923_s2] sm:$0xff]  ;;  %v204_v52 = vld [vmem:[%s5923_s2 + $0x10] sm:$0xff] }
  0x46   :  { %3806 = vmatprep.subr.mxu0 %v4971_v12  ;;  %v3910_v50 = vpack.c.bf16 %v205_v49, %v203_v48  ;;  %v207_v53 = vld [vmem:[%s5923_s2 + $0x28] sm:$0xff]  ;;  %v209_v54 = vld [vmem:[%s5923_s2 + $0x38] sm:$0xff]  ;;  %v3912_v55 = vpack.c.bf16 %v204_v52, %v202_v51  ;;  %v206_v58 = vld [vmem:[%s5923_s2 + $0x20] sm:$0xff] }
  0x47   :  { %v3914_v57 = vpack.c.bf16 %v209_v54, %v207_v53  ;;  %v208_v59 = vld [vmem:[%s5923_s2 + $0x30] sm:$0xff]  ;;  %v211_v61 = vld [vmem:[%s5923_s2 + $0x48] sm:$0xff]  ;;  %v213_v62 = vld [vmem:[%s5923_s2 + $0x58] sm:$0xff] }
  0x48   :  { %3827 = vmatpush3.msra.mxu1 %v4971_v12  ;;  %v3916_v1 = vpack.c.bf16 %v208_v59, %v206_v58  ;;  %v3918_v3 = vpack.c.bf16 %v213_v62, %v211_v61  ;;  %v212_v5 = vld [vmem:[%s5923_s2 + $0x50] sm:$0xff]  ;;  %v215_v10 = vld [vmem:[%s5923_s2 + $0x68] sm:$0xff]  ;;  %v214_v13 = vld [vmem:[%s5923_s2 + $0x60] sm:$0xff]  ;;  %v989_v61 = vlaneseq }
  0x49   :  { %3829 = vmatmul.mubr.msk.f32.vlgmr.msra.gmra.mrb[0].mxu1 %vm104_vm0, %v3608_v15  ;;  %3807 = vmatpush3.msra.mxu0 %v4971_v12  ;;  %v3645_v15 = vld [vmem:[%s5923_s2 + $0xe0] sm:$0xff]  ;;  %v3651_v22 = vld [vmem:[%s5923_s2 + $0x110] sm:$0xff]  ;;  %v3672_v35 = vld [vmem:[%s5923_s2 + $0x158] sm:$0xff] }
  0x4a   :  { %3831 = vmatprep.mubr.msk.f32.mxu1 %vm104_vm0, %v3609_v16  ;;  %3809 = vmatmul.mubr.msk.f32.vlgmr.msra.gmra.mrb[0].mxu0 %vm104_vm0, %v101_v17  ;;  %v3647_v16 = vld [vmem:[%s5923_s2 + $0xf0] sm:$0xff]  ;;  %v3650_v17 = vld [vmem:[%s5923_s2 + $0x108] sm:$0xff]  ;;  %v3649_v21 = vld [vmem:[%s5923_s2 + $0x100] sm:$0xff]  ;;  %v990_v62 = vshrl.u32 %v989_v61, 7 }
  0x4b   :  { %3923 = vmatprep.subr.bf16.mxu1 %v4936_v4  ;;  %3811 = vmatprep.mubr.msk.f32.mxu0 %vm104_vm0, %v102_v18  ;;  %v3652_v18 = vld [vmem:[%s5923_s2 + $0x118] sm:$0xff]  ;;  %v3653_v29 = vld [vmem:[%s5923_s2 + $0x120] sm:$0xff]  ;;  %v3655_v30 = vld [vmem:[%s5923_s2 + $0x130] sm:$0xff] }
  0x4c   :  { %3925 = vmatpush3.bf16.msra.mxu1 %v4936_v4  ;;  %3899 = vmatprep.subr.bf16.mxu0 %v3898_v19  ;;  %v3936_v19 = vpack.c.bf16 %v3647_v16, %v3645_v15  ;;  %v3938_v20 = vpack.c.bf16 %v3652_v18, %v3650_v17  ;;  %v3674_v36 = vld [vmem:[%s5923_s2 + $0x168] sm:$0xff]  ;;  %v3675_v48 = vld [vmem:[%s5923_s2 + $0x170] sm:$0xff]  ;;  %v3677_v49 = vld [vmem:[%s5923_s2 + $0x180] sm:$0xff] }
  0x4d   :  { %3832 = vmatmul.mubr.msk.f32.gmra.mrb[2].mxu1 %vm104_vm0, %v3610_v24  ;;  %3927 = vmatprep.subr.bf16.mxu1 %v4941_v6  ;;  %v3654_v24 = vld [vmem:[%s5923_s2 + $0x128] sm:$0xff]  ;;  %v3964_v53 = vpack.c.bf16 %v3677_v49, %v3675_v48  ;;  %v3684_v59 = vld [vmem:[%s5923_s2 + $0x1b8] sm:$0xff]  ;;  %vm5264_vm3 = vmpackc.low %vm1032_vm1, %vm4791_vm2 }
  0x4e   :  { %3812 = vmatmul.mubr.msk.f32.gmra.mrb[2].mxu0 %vm104_vm0, %v103_v25  ;;  %3848 = vmatprep.mubr.msk.f32.mxu1 %vm104_vm0, %v3637_v26  ;;  %v3656_v25 = vld [vmem:[%s5923_s2 + $0x138] sm:$0xff]  ;;  %v3682_v51 = vld [vmem:[%s5923_s2 + $0x1a8] sm:$0xff]  ;;  %vm5501_vm8 = vmpackc.low %vm1958_vm6, %vm4791_vm2 }
  0x4f   :  { %3901 = vmatpush1.bf16.msra.mxu0 %v3900_v27  ;;  %409 = vmatprep.mubr.f32.mxu0 %v4790_v47  ;;  %v3940_v27 = vpack.c.bf16 %v3651_v22, %v3649_v21  ;;  %v1259_v49 = vld [vmem:[#allocation3 + $0x1c0] sm:$0xff]  ;;  %v3694_v61 = vld [vmem:[%s5925_s4 + $0x18] sm:$0x3f] }
  0x50   :  { %3929 = vmatpush3.bf16.msra.mxu1 %v4941_v6  ;;  %3903 = vmatprep.subr.bf16.mxu0 %v3902_v28  ;;  %v3942_v28 = vpack.c.bf16 %v3656_v25, %v3654_v24 }
  0x51   :  { %3931 = vmatprep.subr.bf16.mxu1 %v4960_v11 }
  0x53   :  { %3905 = vmatpush1.bf16.msra.mxu0 %v3904_v33  ;;  %v3944_v33 = vpack.c.bf16 %v3655_v30, %v3653_v29 }
  0x54   :  { %3933 = vmatpush3.bf16.msra.mxu1 %v4960_v11  ;;  %3907 = vmatprep.subr.bf16.mxu0 %v3906_v34  ;;  %v3658_v34 = vld [vmem:[%s5923_s2 + $0x148] sm:$0xff] }
  0x55   :  { %3846 = vmatprep.subr.mxu1 %v4971_v12 }
  0x57   :  { %3909 = vmatpush1.bf16.msra.mxu0 %v3908_v37  ;;  %v3657_v37 = vld [vmem:[%s5923_s2 + $0x140] sm:$0xff] }
  0x58   :  { %3847 = vmatpush3.msra.mxu1 %v4971_v12  ;;  %357 = vmatprep.subr.mxu0 %v3628_v45 }
  0x59   :  { %3849 = vmatmul.mubr.msk.f32.vlgmr.msra.gmra.mrb[4].mxu1 %vm104_vm0, %v3638_v38  ;;  %3947 = vmatprep.subr.bf16.mxu1 %v4936_v4  ;;  %v3958_v38 = vpack.c.bf16 %v3674_v36, %v3672_v35 }
  0x5a   :  { %3949 = vmatpush3.bf16.msra.mxu1 %v4936_v4  ;;  %3851 = vmatprep.mubr.msk.f32.mxu1 %vm104_vm0, %v3639_v39  ;;  %v210_v4 = vld [vmem:[%s5923_s2 + $0x40] sm:$0xff]  ;;  %v3671_v39 = vld [vmem:[%s5923_s2 + $0x150] sm:$0xff] }
  0x5b   :  { %3951 = vmatprep.subr.bf16.mxu1 %v4941_v6  ;;  %358 = vmatpush1.msra.mxu0 %v3627_v46  ;;  %v3920_v9 = vpack.c.bf16 %v212_v5, %v210_v4 }
  0x5c   :  { %3911 = vmatprep.subr.bf16.mxu0 %v3910_v50  ;;  %v3680_v50 = vld [vmem:[%s5923_s2 + $0x198] sm:$0xff] }
  0x5d   :  { %3852 = vmatmul.mubr.msk.f32.gmra.mrb[6].mxu1 %vm104_vm0, %v3640_v40  ;;  %v3673_v40 = vld [vmem:[%s5923_s2 + $0x160] sm:$0xff] }
  0x5e   :  { %3953 = vmatpush3.bf16.msra.mxu1 %v4941_v6  ;;  %3868 = vmatprep.mubr.msk.f32.mxu1 %vm104_vm0, %v3663_v41  ;;  %v3676_v41 = vld [vmem:[%s5923_s2 + $0x178] sm:$0xff] }
  0x5f   :  { %3955 = vmatprep.subr.bf16.mxu1 %v4960_v11 }
  0x62   :  { %3957 = vmatpush3.bf16.msra.mxu1 %v4960_v11  ;;  %v3646_v11 = vld [vmem:[%s5923_s2 + $0xe8] sm:$0xff] }
  0x63   :  { %3866 = vmatprep.subr.mxu1 %v4971_v12 }
  0x66   :  { %3867 = vmatpush3.msra.mxu1 %v4971_v12  ;;  %v3648_v12 = vld [vmem:[%s5923_s2 + $0xf8] sm:$0xff] }
  0x67   :  { %3869 = vmatmul.mubr.msk.f32.vlgmr.msra.gmra.mrb[8].mxu1 %vm104_vm0, %v3664_v42  ;;  %v3934_v14 = vpack.c.bf16 %v3648_v12, %v3646_v11  ;;  %v3678_v42 = vld [vmem:[%s5923_s2 + $0x188] sm:$0xff] }
  0x68   :  { %3871 = vmatprep.mubr.msk.f32.mxu1 %vm104_vm0, %v3665_v43  ;;  %v3962_v46 = vpack.c.bf16 %v3678_v42, %v3676_v41  ;;  %v1023_v41 = vld [vmem:[%s5925_s4] sm:$0xff] }
  0x69   :  { %v3703_v42 = vld [vmem:[%s5925_s4 + $0x20] sm:$0xff] }
  0x6b   :  { %3872 = vmatmul.mubr.msk.f32.gmra.mrb[10].mxu1 %vm104_vm0, %v3666_v44  ;;  %v3960_v44 = vpack.c.bf16 %v3673_v40, %v3671_v39  ;;  %v1291_v39 = vld [vmem:[#allocation3 + $0x2c0] sm:$0xff] }
  0x6c   :  { %1103 = vmatprep.mubr.f32.mxu1 %v4790_v47 }
 0x11c   :  { %v3830_v56 = vpop.f32.mrb[0].mxu1 }
 0x11d   :  { %v299_v60 = vpop.f32.mrb[1].mxu1  ;;  %v3810_v63 = vpop.f32.mrb[0].mxu0 }
 0x11e   :  { %3629 = vmatmul.mubr.msk.f32.vlgmr.msra.gmra.mrb[4].mxu0 %vm104_vm0, %v299_v60  ;;  %v183_v0 = vpop.f32.mrb[1].mxu0  ;;  %v3683_v60 = vld [vmem:[%s5923_s2 + $0x1b0] sm:$0xff] }
 0x11f   :  { %415 = vmatprep.mubr.f32.mxu0 %v4790_v47  ;;  %3913 = vmatpush1.bf16.msra.mxu0 %v3912_v55  ;;  %v3966_v55 = vpack.c.bf16 %v3682_v51, %v3680_v50  ;;  %v1261_v50 = vld [vmem:[#allocation3 + $0x1d0] sm:$0xff]  ;;  %v1264_v51 = vld [vmem:[#allocation3 + $0x1e8] sm:$0xff] }
 0x120   :  { %v3833_v2 = vpop.f32.mrb[2].mxu1  ;;  %3915 = vmatprep.subr.bf16.mxu0 %v3914_v57  ;;  %v3681_v57 = vld [vmem:[%s5923_s2 + $0x1a0] sm:$0xff] }
 0x121   :  { %v309_v6 = vpop.f32.mrb[3].mxu1  ;;  %v3813_v7 = vpop.f32.mrb[2].mxu0 }
 0x122   :  { %3630 = vmatmul.mubr.msk.f32.gmra.mrb[6].mxu0 %vm104_vm0, %v3830_v56  ;;  %v193_v8 = vpop.f32.mrb[3].mxu0  ;;  %v3679_v56 = vld [vmem:[%s5923_s2 + $0x190] sm:$0xff] }
 0x123   :  { %421 = vmatprep.mubr.f32.mxu0 %v4790_v47  ;;  %3917 = vmatpush1.bf16.msra.mxu0 %v3916_v1  ;;  %v3968_v58 = vpack.c.bf16 %v3681_v57, %v3679_v56  ;;  %v5259_v1 = vsub.s32 1, %v990_v62  ;;  %v1263_v57 = vld [vmem:[#allocation3 + $0x1e0] sm:$0xff] }
 0x124   :  { %3919 = vmatprep.subr.bf16.mxu0 %v3918_v3 }
 0x126   :  { %3631 = vmatmul.mubr.msk.f32.gmra.mrb[8].mxu0 %vm104_vm0, %v309_v6 }
 0x127   :  { %427 = vmatprep.mubr.f32.mxu0 %v4790_v47  ;;  %3921 = vmatpush1.bf16.msra.mxu0 %v3920_v9 }
 0x128   :  { %458 = vmatprep.subr.mxu0 %v215_v10 }
 0x12a   :  { %3632 = vmatmul.mubr.msk.f32.gmra.mrb[10].mxu0 %vm104_vm0, %v3833_v2 }
 0x12b   :  { %459 = vmatpush1.msra.mxu0 %v214_v13  ;;  %510 = vmatprep.mubr.f32.mxu0 %v4790_v47 }
 0x12c   :  { %3935 = vmatprep.subr.bf16.mxu0 %v3934_v14  ;;  %v3850_v23 = vpop.f32.mrb[4].mxu1 }
 0x12d   :  { %v618_v26 = vpop.f32.mrb[5].mxu1 }
 0x12e   :  { %3633 = vmatmul.mubr.msk.f32.vlgmr.msra.gmra.mrb[4].mxu0 %vm104_vm0, %v183_v0  ;;  %v987_v0 = vld [vmem:[%s5924_s3] sm:$0x3] }
 0x12f   :  { %516 = vmatprep.mubr.f32.mxu0 %v4790_v47  ;;  %3937 = vmatpush1.bf16.msra.mxu0 %v3936_v19  ;;  %v996_v3 = vrot.slane %v987_v0, %v5259_v1 }
 0x130   :  { %3939 = vmatprep.subr.bf16.mxu0 %v3938_v20  ;;  %v3853_v31 = vpop.f32.mrb[6].mxu1 }
 0x131   :  { %v628_v32 = vpop.f32.mrb[7].mxu1 }
 0x132   :  { %3634 = vmatmul.mubr.msk.f32.gmra.mrb[6].mxu0 %vm104_vm0, %v3810_v63  ;;  %v5254_v63 = vsub.s32 0, %v990_v62 }
 0x133   :  { %522 = vmatprep.mubr.f32.mxu0 %v4790_v47  ;;  %3941 = vmatpush1.bf16.msra.mxu0 %v3940_v27 }
 0x134   :  { %3943 = vmatprep.subr.bf16.mxu0 %v3942_v28  ;;  %v992_v2 = vrot.slane %v987_v0, %v5254_v63  ;;  %v3712_v0 = vld [vmem:[%s5925_s4 + $0x38] sm:$0x3f] }
 0x136   :  { %3635 = vmatmul.mubr.msk.f32.gmra.mrb[8].mxu0 %vm104_vm0, %v193_v8 }
 0x137   :  { %528 = vmatprep.mubr.f32.mxu0 %v4790_v47  ;;  %3945 = vmatpush1.bf16.msra.mxu0 %v3944_v33 }
 0x138   :  { %676 = vmatprep.subr.mxu0 %v3658_v34 }
 0x13a   :  { %3636 = vmatmul.mubr.msk.f32.gmra.mrb[10].mxu0 %vm104_vm0, %v3813_v7  ;;  %v3870_v43 = vpop.f32.mrb[8].mxu1 }
 0x13b   :  { %677 = vmatpush1.msra.mxu0 %v3657_v37  ;;  %728 = vmatprep.mubr.f32.mxu0 %v4790_v47  ;;  %v844_v45 = vpop.f32.mrb[9].mxu1 }
 0x13c   :  { %3959 = vmatprep.subr.bf16.mxu0 %v3958_v38 }
 0x13e   :  { %3659 = vmatmul.mubr.msk.f32.vlgmr.msra.gmra.mrb[4].mxu0 %vm104_vm0, %v618_v26  ;;  %v3873_v52 = vpop.f32.mrb[10].mxu1 }
 0x13f   :  { %734 = vmatprep.mubr.f32.mxu0 %v4790_v47  ;;  %3961 = vmatpush1.bf16.msra.mxu0 %v3960_v44  ;;  %v854_v54 = vpop.f32.mrb[11].mxu1  ;;  %v1262_v44 = vld [vmem:[#allocation3 + $0x1d8] sm:$0xff] }
 0x140   :  { %3963 = vmatprep.subr.bf16.mxu0 %v3962_v46  ;;  %v3704_v46 = vld [vmem:[%s5925_s4 + $0x28] sm:$0x3f] }
 0x142   :  { %3660 = vmatmul.mubr.msk.f32.gmra.mrb[6].mxu0 %vm104_vm0, %v3850_v23 }
 0x143   :  { %740 = vmatprep.mubr.f32.mxu0 %v4790_v47  ;;  %3965 = vmatpush1.bf16.msra.mxu0 %v3964_v53  ;;  %v3693_v53 = vld [vmem:[%s5925_s4 + $0x10] sm:$0xff] }
 0x144   :  { %3967 = vmatprep.subr.bf16.mxu0 %v3966_v55  ;;  %v3711_v55 = vld [vmem:[%s5925_s4 + $0x30] sm:$0xff] }
 0x146   :  { %3661 = vmatmul.mubr.msk.f32.gmra.mrb[8].mxu0 %vm104_vm0, %v628_v32 }
 0x147   :  { %746 = vmatprep.mubr.f32.mxu0 %v4790_v47  ;;  %3969 = vmatpush1.bf16.msra.mxu0 %v3968_v58  ;;  %v1265_v58 = vld [vmem:[#allocation3 + $0x1f0] sm:$0xff] }
 0x148   :  { %902 = vmatprep.subr.mxu0 %v3684_v59  ;;  %v1268_v59 = vld [vmem:[#allocation3 + $0x208] sm:$0xff]  ;;  %v3996_v62 = vpack.c.bf16 %v1265_v58, %v1263_v57  ;;  %v1303_v58 = vld [vmem:[#allocation3 + $0x320] sm:$0xff] }
 0x14a   :  { %3662 = vmatmul.mubr.msk.f32.gmra.mrb[10].mxu0 %vm104_vm0, %v3853_v31 }
 0x14b   :  { %903 = vmatpush1.msra.mxu0 %v3683_v60  ;;  %954 = vmatprep.mubr.f32.mxu0 %v4790_v47  ;;  %v1270_v60 = vld [vmem:[#allocation3 + $0x218] sm:$0xff] }
 0x14e   :  { %3685 = vmatmul.mubr.msk.f32.vlgmr.msra.gmra.mrb[4].mxu0 %vm104_vm0, %v844_v45  ;;  %v1024_v45 = vld [vmem:[%s5925_s4 + $0x8] sm:$0x3f] }
 0x14f   :  { %960 = vmatprep.mubr.f32.mxu0 %v4790_v47 }
 0x152   :  { %3686 = vmatmul.mubr.msk.f32.gmra.mrb[6].mxu0 %vm104_vm0, %v3870_v43  ;;  %v1260_v43 = vld [vmem:[#allocation3 + $0x1c8] sm:$0xff] }
 0x153   :  { %966 = vmatprep.mubr.f32.mxu0 %v4790_v47  ;;  %v3990_v48 = vpack.c.bf16 %v1262_v44, %v1260_v43 }
 0x156   :  { %3687 = vmatmul.mubr.msk.f32.gmra.mrb[8].mxu0 %vm104_vm0, %v854_v54  ;;  %v3992_v54 = vpack.c.bf16 %v1261_v50, %v1259_v49  ;;  %v1302_v49 = vld [vmem:[#allocation3 + $0x318] sm:$0xff] }
 0x157   :  { %972 = vmatprep.mubr.f32.mxu0 %v4790_v47 }
 0x15a   :  { %3688 = vmatmul.mubr.msk.f32.gmra.mrb[10].mxu0 %vm104_vm0, %v3873_v52  ;;  %v1266_v52 = vld [vmem:[#allocation3 + $0x1f8] sm:$0xff] }
 0x15b   :  { %1555 = vmatprep.mubr.f32.mxu0 %v4790_v47  ;;  %v3994_v56 = vpack.c.bf16 %v1266_v52, %v1264_v51  ;;  %v1299_v52 = vld [vmem:[#allocation3 + $0x300] sm:$0xff] }
 0x221   :  { %v956_v4 = vpop.f32.mrb[4].mxu0 }
 0x222   :  { %v999_v5 = vadd.f32 %v992_v2, %v956_v4  ;;  %v958_v6 = vpop.f32.mrb[5].mxu0  ;;  %v1269_v4 = vld [vmem:[#allocation3 + $0x210] sm:$0xff] }
 0x223   :  { %v1000_v7 = vadd.f32 %v996_v3, %v958_v6  ;;  %v1274_v6 = vld [vmem:[#allocation3 + $0x238] sm:$0xff] }
 0x224   :  { %v1007_v9 = vmul.f32 0.2, %v999_v5 }
 0x225   :  { %v962_v8 = vpop.f32.mrb[6].mxu0  ;;  %v1008_v12 = vmul.f32 0.2, %v1000_v7 }
 0x226   :  { %v1001_v10 = vadd.f32 %v992_v2, %v962_v8  ;;  %v964_v11 = vpop.f32.mrb[7].mxu0  ;;  %v1015_v17 = vmax.f32 %v999_v5, %v1007_v9  ;;  %v1272_v5 = vld [vmem:[#allocation3 + $0x228] sm:$0xff]  ;;  %v1271_v9 = vld [vmem:[#allocation3 + $0x220] sm:$0xff] }
 0x227   :  { %v1002_v13 = vadd.f32 %v996_v3, %v964_v11  ;;  %v1016_v21 = vmax.f32 %v1000_v7, %v1008_v12  ;;  %v4002_v8 = vpack.c.bf16 %v1274_v6, %v1272_v5  ;;  %v1276_v11 = vld [vmem:[#allocation3 + $0x248] sm:$0xff]  ;;  %v1278_v12 = vld [vmem:[#allocation3 + $0x258] sm:$0xff] }
 0x228   :  { %v1009_v14 = vmul.f32 0.2, %v1001_v10  ;;  %v1312_v5 = vld [vmem:[#allocation3 + $0x368] sm:$0xff]  ;;  %v1314_v6 = vld [vmem:[#allocation3 + $0x378] sm:$0xff] }
 0x229   :  { %v1010_v15 = vmul.f32 0.2, %v1002_v13  ;;  %v968_v16 = vpop.f32.mrb[8].mxu0 }
 0x22a   :  { %v1017_v18 = vmax.f32 %v1001_v10, %v1009_v14  ;;  %v1003_v19 = vadd.f32 %v992_v2, %v968_v16  ;;  %v970_v20 = vpop.f32.mrb[9].mxu0  ;;  %v1273_v10 = vld [vmem:[#allocation3 + $0x230] sm:$0xff]  ;;  %v4006_v14 = vpack.c.bf16 %v1278_v12, %v1276_v11  ;;  %v1117_v11 = vld [vmem:[#allocation3 + $0x8] sm:$0xff]  ;;  %v1119_v12 = vld [vmem:[#allocation3 + $0x18] sm:$0xff] }
 0x22b   :  { %v1018_v22 = vmax.f32 %v1002_v13, %v1010_v15  ;;  %v1004_v23 = vadd.f32 %v996_v3, %v970_v20  ;;  %v4004_v13 = vpack.c.bf16 %v1273_v10, %v1271_v9  ;;  %v1275_v15 = vld [vmem:[#allocation3 + $0x240] sm:$0xff]  ;;  %v1277_v16 = vld [vmem:[#allocation3 + $0x250] sm:$0xff] }
 0x22c   :  { %v3972_v24 = vpack.c.bf16 %v1017_v18, %v1015_v17  ;;  %v1011_v27 = vmul.f32 0.2, %v1003_v19  ;;  %v1280_v17 = vld [vmem:[#allocation3 + $0x268] sm:$0xff]  ;;  %v1282_v18 = vld [vmem:[#allocation3 + $0x278] sm:$0xff]  ;;  %v1313_v9 = vld [vmem:[#allocation3 + $0x370] sm:$0xff] }
 0x22d   :  { %v3970_v25 = vpack.c.bf16 %v1018_v22, %v1016_v21  ;;  %v974_v26 = vpop.f32.mrb[10].mxu0  ;;  %v1012_v30 = vmul.f32 0.2, %v1004_v23  ;;  %v4010_v20 = vpack.c.bf16 %v1282_v18, %v1280_v17  ;;  %v1279_v21 = vld [vmem:[#allocation3 + $0x260] sm:$0xff]  ;;  %v1281_v22 = vld [vmem:[#allocation3 + $0x270] sm:$0xff] }
 0x22e   :  { %v1005_v28 = vadd.f32 %v992_v2, %v974_v26  ;;  %v976_v29 = vpop.f32.mrb[11].mxu0  ;;  %v1019_v34 = vmax.f32 %v1003_v19, %v1011_v27  ;;  %v3998_v2 = vpack.c.bf16 %v1270_v60, %v1268_v59  ;;  %v4008_v19 = vpack.c.bf16 %v1277_v16, %v1275_v15  ;;  %v1283_v27 = vld [vmem:[#allocation3 + $0x280] sm:$0xff]  ;;  %v1305_v59 = vld [vmem:[#allocation3 + $0x330] sm:$0xff] }
 0x22f   :  { %v1006_v31 = vadd.f32 %v996_v3, %v976_v29  ;;  %3971 = vmatprep.subr.bf16.mxu1 %v3970_v25  ;;  %4103 = vmatprep.subr.bf16.mxu0 %v3970_v25  ;;  %v1020_v36 = vmax.f32 %v1004_v23, %v1012_v30  ;;  %v1267_v3 = vld [vmem:[#allocation3 + $0x200] sm:$0xff]  ;;  %v1284_v23 = vld [vmem:[#allocation3 + $0x288] sm:$0xff]  ;;  %v1290_v30 = vld [vmem:[#allocation3 + $0x2b8] sm:$0xff]  ;;  %v4036_v60 = vpack.c.bf16 %v1305_v59, %v1303_v58 }
 0x230   :  { %v1013_v32 = vmul.f32 0.2, %v1005_v28  ;;  %3973 = vmatpush1.bf16.msra.mxu1 %v3972_v24  ;;  %4105 = vmatpush1.bf16.msra.mxu0 %v3972_v24  ;;  %v4000_v7 = vpack.c.bf16 %v1269_v4, %v1267_v3  ;;  %v1288_v29 = vld [vmem:[#allocation3 + $0x2a8] sm:$0xff]  ;;  %v1309_v3 = vld [vmem:[#allocation3 + $0x350] sm:$0xff]  ;;  %v1143_v58 = vld [vmem:[#allocation3 + $0xd8] sm:$0xff] }
 0x231   :  { %v1014_v33 = vmul.f32 0.2, %v1006_v31 }
 0x232   :  { %v1021_v35 = vmax.f32 %v1005_v28, %v1013_v32  ;;  %v1285_v28 = vld [vmem:[#allocation3 + $0x290] sm:$0xff]  ;;  %v4018_v32 = vpack.c.bf16 %v1290_v30, %v1288_v29  ;;  %v1125_v30 = vld [vmem:[#allocation3 + $0x48] sm:$0xff] }
 0x233   :  { %v1022_v37 = vmax.f32 %v1006_v31, %v1014_v33  ;;  %v4016_v31 = vpack.c.bf16 %v1285_v28, %v1283_v27  ;;  %v1287_v33 = vld [vmem:[#allocation3 + $0x2a0] sm:$0xff]  ;;  %v1122_v29 = vld [vmem:[#allocation3 + $0x30] sm:$0xff] }
 0x234   :  { %v3977_v38 = vpack.c.bf16 %v1021_v35, %v1019_v34  ;;  %v1289_v34 = vld [vmem:[#allocation3 + $0x2b0] sm:$0xff]  ;;  %v1292_v35 = vld [vmem:[#allocation3 + $0x2c8] sm:$0xff]  ;;  %v1120_v28 = vld [vmem:[#allocation3 + $0x20] sm:$0xff] }
 0x235   :  { %v3974_v40 = vpack.c.bf16 %v1022_v37, %v1020_v36  ;;  %v1294_v36 = vld [vmem:[#allocation3 + $0x2d8] sm:$0xff]  ;;  %v4020_v37 = vpack.c.bf16 %v1289_v34, %v1287_v33  ;;  %v4052_v33 = vpack.c.bf16 %v1122_v29, %v1120_v28 }
 0x237   :  { %3976 = vmatprep.subr.msk.bf16.mxu1 %vm5264_vm3, %v3974_v40  ;;  %4108 = vmatprep.subr.msk.bf16.mxu0 %vm5264_vm3, %v3974_v40 }
 0x238   :  { %3979 = vmatpush1.bf16.msk.msra.mxu1 %vm5264_vm3, %v3977_v38  ;;  %4111 = vmatpush1.bf16.msk.msra.mxu0 %vm5264_vm3, %v3977_v38 }
 0x239   :  { %3981 = vmatprep.subr.bf16.mxu1 %v3970_v25  ;;  %4169 = vmatprep.subr.bf16.mxu0 %v3970_v25  ;;  %v4012_v25 = vpack.c.bf16 %v1281_v22, %v1279_v21  ;;  %v1118_v21 = vld [vmem:[#allocation3 + $0x10] sm:$0xff]  ;;  %v1121_v22 = vld [vmem:[#allocation3 + $0x28] sm:$0xff] }
 0x23b   :  { %3691 = vmatmul.mubr.msk.f32.vlgmr.msra.gmra.mrb[12].mxu1 %vm1025_vm4, %v1023_v41  ;;  %3707 = vmatmul.mubr.msk.f32.vlgmr.msra.gmra.mrb[12].mxu0 %vm1025_vm4, %v3703_v42  ;;  %v1296_v41 = vld [vmem:[#allocation3 + $0x2e8] sm:$0xff]  ;;  %v1298_v42 = vld [vmem:[#allocation3 + $0x2f8] sm:$0xff] }
 0x23c   :  { %3983 = vmatpush1.bf16.msra.mxu1 %v3972_v24  ;;  %4171 = vmatpush1.bf16.msra.mxu0 %v3972_v24  ;;  %v1286_v24 = vld [vmem:[#allocation3 + $0x298] sm:$0xff]  ;;  %v4026_v44 = vpack.c.bf16 %v1298_v42, %v1296_v41  ;;  %v1128_v42 = vld [vmem:[#allocation3 + $0x60] sm:$0xff] }
 0x23d   :  { %3986 = vmatprep.subr.msk.bf16.mxu1 %vm5264_vm3, %v3974_v40  ;;  %4174 = vmatprep.subr.msk.bf16.mxu0 %vm5264_vm3, %v3974_v40  ;;  %v4014_v26 = vpack.c.bf16 %v1286_v24, %v1284_v23  ;;  %v1293_v40 = vld [vmem:[#allocation3 + $0x2d0] sm:$0xff]  ;;  %v1123_v23 = vld [vmem:[#allocation3 + $0x38] sm:$0xff] }
 0x23e   :  { %1109 = vmatprep.mubr.f32.mxu1 %v4790_v47  ;;  %1561 = vmatprep.mubr.f32.mxu0 %v4790_v47  ;;  %v4024_v43 = vpack.c.bf16 %v1293_v40, %v1291_v39  ;;  %v4050_v27 = vpack.c.bf16 %v1123_v23, %v1121_v22  ;;  %v1131_v39 = vld [vmem:[#allocation3 + $0x78] sm:$0xff]  ;;  %v1152_v23 = vld [vmem:[#allocation3 + $0x120] sm:$0xff] }
 0x23f   :  { %3692 = vmatmul.mubr.msk.f32.gmra.mrb[14].mxu1 %vm1025_vm4, %v1024_v45  ;;  %3708 = vmatmul.mubr.msk.f32.gmra.mrb[14].mxu0 %vm1025_vm4, %v3704_v46  ;;  %v1295_v45 = vld [vmem:[#allocation3 + $0x2e0] sm:$0xff]  ;;  %v1297_v46 = vld [vmem:[#allocation3 + $0x2f0] sm:$0xff] }
 0x240   :  { %3989 = vmatpush1.bf16.msk.msra.mxu1 %vm5264_vm3, %v3977_v38  ;;  %4177 = vmatpush1.bf16.msk.msra.mxu0 %vm5264_vm3, %v3977_v38  ;;  %v4022_v38 = vpack.c.bf16 %v1294_v36, %v1292_v35  ;;  %v4028_v50 = vpack.c.bf16 %v1297_v46, %v1295_v45  ;;  %v1124_v36 = vld [vmem:[#allocation3 + $0x40] sm:$0xff]  ;;  %v1135_v45 = vld [vmem:[#allocation3 + $0x98] sm:$0xff] }
 0x241   :  { %1245 = vmatprep.mubr.f32.mxu1 %v4790_v47  ;;  %3991 = vmatprep.subr.bf16.mxu1 %v3990_v48  ;;  %v1300_v48 = vld [vmem:[#allocation3 + $0x308] sm:$0xff] }
 0x242   :  { %1785 = vmatprep.mubr.f32.mxu0 %v4790_v47  ;;  %v4030_v51 = vpack.c.bf16 %v1302_v49, %v1300_v48  ;;  %v1132_v49 = vld [vmem:[#allocation3 + $0x80] sm:$0xff] }
 0x243   :  { %3697 = vmatmul.mubr.msk.f32.vlgmr.msra.gmra.mrb[16].mxu1 %vm1025_vm4, %v3693_v53  ;;  %3715 = vmatmul.mubr.msk.f32.vlgmr.msra.gmra.mrb[16].mxu0 %vm1025_vm4, %v3711_v55  ;;  %v1301_v53 = vld [vmem:[#allocation3 + $0x310] sm:$0xff]  ;;  %v1306_v55 = vld [vmem:[#allocation3 + $0x338] sm:$0xff] }
 0x244   :  { %1251 = vmatprep.mubr.f32.mxu1 %v4790_v47  ;;  %3993 = vmatpush1.bf16.msra.mxu1 %v3992_v54  ;;  %v1304_v54 = vld [vmem:[#allocation3 + $0x328] sm:$0xff] }
 0x245   :  { %3995 = vmatprep.subr.bf16.mxu1 %v3994_v56  ;;  %1791 = vmatprep.mubr.f32.mxu0 %v4790_v47  ;;  %v4032_v56 = vpack.c.bf16 %v1301_v53, %v1299_v52  ;;  %v4034_v57 = vpack.c.bf16 %v1306_v55, %v1304_v54  ;;  %v1139_v52 = vld [vmem:[#allocation3 + $0xb8] sm:$0xff]  ;;  %v1136_v55 = vld [vmem:[#allocation3 + $0xa0] sm:$0xff] }
 0x247   :  { %3698 = vmatmul.mubr.msk.f32.gmra.mrb[18].mxu1 %vm1025_vm4, %v3694_v61  ;;  %3716 = vmatmul.mubr.msk.f32.gmra.mrb[18].mxu0 %vm1025_vm4, %v3712_v0  ;;  %v1308_v61 = vld [vmem:[#allocation3 + $0x348] sm:$0xff] }
 0x248   :  { %3997 = vmatpush1.bf16.msra.mxu1 %v3996_v62  ;;  %v1310_v62 = vld [vmem:[#allocation3 + $0x358] sm:$0xff] }
 0x249   :  { %3999 = vmatprep.subr.bf16.mxu1 %v3998_v2  ;;  %v4038_v0 = vpack.c.bf16 %v1310_v62, %v1308_v61  ;;  %v1307_v2 = vld [vmem:[#allocation3 + $0x340] sm:$0xff]  ;;  %v1142_v62 = vld [vmem:[#allocation3 + $0xd0] sm:$0xff] }
 0x24a   :  { %v4040_v4 = vpack.c.bf16 %v1309_v3, %v1307_v2  ;;  %v1140_v61 = vld [vmem:[#allocation3 + $0xc0] sm:$0xff]  ;;  %v1147_v2 = vld [vmem:[#allocation3 + $0xf8] sm:$0xff] }
 0x24b   :  { %v4072_v3 = vpack.c.bf16 %v1142_v62, %v1140_v61 }
 0x24c   :  { %4001 = vmatpush1.bf16.msra.mxu1 %v4000_v7  ;;  %v4042_v7 = vpack.c.bf16 %v1314_v6, %v1312_v5  ;;  %v1144_v5 = vld [vmem:[#allocation3 + $0xe0] sm:$0xff]  ;;  %v1146_v6 = vld [vmem:[#allocation3 + $0xf0] sm:$0xff] }
 0x24d   :  { %4003 = vmatprep.subr.bf16.mxu1 %v4002_v8  ;;  %v1311_v8 = vld [vmem:[#allocation3 + $0x360] sm:$0xff] }
 0x24e   :  { %v4044_v10 = vpack.c.bf16 %v1313_v9, %v1311_v8  ;;  %v1151_v8 = vld [vmem:[#allocation3 + $0x118] sm:$0xff]  ;;  %v4076_v9 = vpack.c.bf16 %v1146_v6, %v1144_v5  ;;  %v1570_v5 = vld [vmem:[#allocation3 + $0x388] sm:$0xff] }
 0x24f   :  { %v1572_v6 = vld [vmem:[#allocation3 + $0x398] sm:$0xff] }
 0x250   :  { %4005 = vmatpush1.bf16.msra.mxu1 %v4004_v13  ;;  %v4046_v13 = vpack.c.bf16 %v1119_v12, %v1117_v11  ;;  %v1148_v11 = vld [vmem:[#allocation3 + $0x100] sm:$0xff]  ;;  %v1150_v12 = vld [vmem:[#allocation3 + $0x110] sm:$0xff] }
 0x251   :  { %4007 = vmatprep.subr.bf16.mxu1 %v4006_v14 }
 0x254   :  { %4009 = vmatpush1.bf16.msra.mxu1 %v4008_v19 }
 0x255   :  { %4011 = vmatprep.subr.bf16.mxu1 %v4010_v20  ;;  %v1116_v20 = vld [vmem:[#allocation3] sm:$0xff] }
 0x258   :  { %4013 = vmatpush1.bf16.msra.mxu1 %v4012_v25  ;;  %v4048_v25 = vpack.c.bf16 %v1118_v21, %v1116_v20  ;;  %v4080_v20 = vpack.c.bf16 %v1150_v12, %v1148_v11  ;;  %v1985_v11 = vld [vmem:[#allocation5 + $0x40] sm:$0xff]  ;;  %v1987_v12 = vld [vmem:[#allocation5 + $0x50] sm:$0xff] }
 0x259   :  { %4015 = vmatprep.subr.bf16.mxu1 %v4014_v26 }
 0x25c   :  { %4017 = vmatpush1.bf16.msra.mxu1 %v4016_v31  ;;  %v1127_v31 = vld [vmem:[#allocation3 + $0x58] sm:$0xff] }
 0x25d   :  { %4019 = vmatprep.subr.bf16.mxu1 %v4018_v32  ;;  %v4054_v35 = vpack.c.bf16 %v1127_v31, %v1125_v30  ;;  %v1156_v31 = vld [vmem:[#allocation3 + $0x140] sm:$0xff] }
 0x260   :  { %4021 = vmatpush1.bf16.msra.mxu1 %v4020_v37  ;;  %v1126_v37 = vld [vmem:[#allocation3 + $0x50] sm:$0xff] }
 0x261   :  { %4023 = vmatprep.subr.bf16.mxu1 %v4022_v38  ;;  %v1129_v38 = vld [vmem:[#allocation3 + $0x68] sm:$0xff]  ;;  %v4056_v40 = vpack.c.bf16 %v1126_v37, %v1124_v36 }
 0x262   :  { %v4058_v41 = vpack.c.bf16 %v1131_v39, %v1129_v38  ;;  %v1160_v39 = vld [vmem:[#allocation3 + $0x160] sm:$0xff] }
 0x264   :  { %4025 = vmatpush1.bf16.msra.mxu1 %v4024_v43  ;;  %v1130_v43 = vld [vmem:[#allocation3 + $0x70] sm:$0xff] }
 0x265   :  { %4027 = vmatprep.subr.bf16.mxu1 %v4026_v44  ;;  %v1133_v44 = vld [vmem:[#allocation3 + $0x88] sm:$0xff]  ;;  %v4060_v46 = vpack.c.bf16 %v1130_v43, %v1128_v42  ;;  %v1167_v42 = vld [vmem:[#allocation3 + $0x198] sm:$0xff] }
 0x266   :  { %v4062_v48 = vpack.c.bf16 %v1135_v45, %v1133_v44 }
 0x268   :  { %4029 = vmatpush1.bf16.msra.mxu1 %v4028_v50  ;;  %v1134_v50 = vld [vmem:[#allocation3 + $0x90] sm:$0xff] }
 0x269   :  { %4031 = vmatprep.subr.bf16.mxu1 %v4030_v51  ;;  %v1137_v51 = vld [vmem:[#allocation3 + $0xa8] sm:$0xff]  ;;  %v4064_v53 = vpack.c.bf16 %v1134_v50, %v1132_v49  ;;  %v1171_v50 = vld [vmem:[#allocation3 + $0x1b8] sm:$0xff] }
 0x26a   :  { %v4066_v54 = vpack.c.bf16 %v1139_v52, %v1137_v51  ;;  %v1169_v49 = vld [vmem:[#allocation3 + $0x1a8] sm:$0xff]  ;;  %v1168_v51 = vld [vmem:[#allocation3 + $0x1a0] sm:$0xff]  ;;  %v1170_v52 = vld [vmem:[#allocation3 + $0x1b0] sm:$0xff] }
 0x26b   :  { %v4098_v61 = vpack.c.bf16 %v1171_v50, %v1169_v49  ;;  %v1579_v50 = vld [vmem:[#allocation3 + $0x3d0] sm:$0xff] }
 0x26c   :  { %4033 = vmatpush1.bf16.msra.mxu1 %v4032_v56  ;;  %v1138_v56 = vld [vmem:[#allocation3 + $0xb0] sm:$0xff] }
 0x26d   :  { %4035 = vmatprep.subr.bf16.mxu1 %v4034_v57  ;;  %v1141_v57 = vld [vmem:[#allocation3 + $0xc8] sm:$0xff]  ;;  %v4068_v59 = vpack.c.bf16 %v1138_v56, %v1136_v55  ;;  %v1977_v55 = vld [vmem:[#allocation5] sm:$0xff] }
 0x270   :  { %4037 = vmatpush1.bf16.msra.mxu1 %v4036_v60  ;;  %v4070_v60 = vpack.c.bf16 %v1143_v58, %v1141_v57  ;;  %v1979_v58 = vld [vmem:[#allocation5 + $0x10] sm:$0xff] }
 0x271   :  { %4039 = vmatprep.subr.bf16.mxu1 %v4038_v0  ;;  %v1145_v0 = vld [vmem:[#allocation3 + $0xe8] sm:$0xff]  ;;  %v5349_v62 = vpack.c.bf16 %v1979_v58, %v1977_v55 }
 0x274   :  { %4041 = vmatpush1.bf16.msra.mxu1 %v4040_v4  ;;  %v4074_v4 = vpack.c.bf16 %v1147_v2, %v1145_v0  ;;  %v1981_v2 = vld [vmem:[#allocation5 + $0x20] sm:$0xff] }
 0x275   :  { %4043 = vmatprep.subr.bf16.mxu1 %v4042_v7  ;;  %v1149_v7 = vld [vmem:[#allocation3 + $0x108] sm:$0xff] }
 0x278   :  { %4045 = vmatpush1.bf16.msra.mxu1 %v4044_v10  ;;  %v4078_v10 = vpack.c.bf16 %v1151_v8, %v1149_v7  ;;  %v1988_v7 = vld [vmem:[#allocation5 + $0x58] sm:$0xff] }
 0x279   :  { %4047 = vmatprep.subr.bf16.mxu1 %v4046_v13  ;;  %v1153_v13 = vld [vmem:[#allocation3 + $0x128] sm:$0xff] }
 0x30e   :  { %v5322_v14 = vpop.f32.mrb[12].mxu1  ;;  %v5324_v15 = vpop.f32.mrb[12].mxu0 }
 0x30f   :  { %v1107_v16 = vpop.f32.mrb[13].mxu1  ;;  %v5326_v17 = vpop.f32.mrb[13].mxu0 }
 0x312   :  { %v5328_v18 = vpop.f32.mrb[14].mxu1  ;;  %v5335_v21 = vpop.f32.mrb[14].mxu0 }
 0x313   :  { %v5330_v19 = vpop.f32.mrb[15].mxu1 }
 0x316   :  { %v1247_v24 = vpop.f32.mrb[16].mxu1 }
 0x317   :  { %v1249_v26 = vpop.f32.mrb[17].mxu1 }
 0x318   :  { %3699 = vmatprep.mubr.msk.f32.mxu1 %vm1315_vm5, %v1249_v26  ;;  %v1157_v26 = vld [vmem:[#allocation3 + $0x148] sm:$0xff] }
 0x319   :  { %1387 = vmatmul.mubr.f32.vlgmr.msra.gmra.mrb[20].mxu1 %v1247_v24  ;;  %v1154_v24 = vld [vmem:[#allocation3 + $0x130] sm:$0xff] }
 0x31a   :  { %4049 = vmatpush1.bf16.msra.mxu1 %v4048_v25  ;;  %v1253_v32 = vpop.f32.mrb[18].mxu1  ;;  %v5337_v25 = vpop.f32.mrb[15].mxu0  ;;  %v4084_v28 = vpack.c.bf16 %v1154_v24, %v1152_v23  ;;  %v1576_v23 = vld [vmem:[#allocation3 + $0x3b8] sm:$0xff]  ;;  %v1990_v24 = vld [vmem:[#allocation5 + $0x68] sm:$0xff] }
 0x31b   :  { %v1255_v34 = vpop.f32.mrb[19].mxu1  ;;  %4051 = vmatprep.subr.bf16.mxu1 %v4050_v27  ;;  %v1159_v27 = vld [vmem:[#allocation3 + $0x158] sm:$0xff]  ;;  %v5339_v29 = vpop.f32.mrb[16].mxu0 }
 0x31c   :  { %3700 = vmatprep.mubr.msk.f32.mxu1 %vm1315_vm5, %v1255_v34  ;;  %v4086_v30 = vpack.c.bf16 %v1159_v27, %v1157_v26  ;;  %v1161_v34 = vld [vmem:[#allocation3 + $0x168] sm:$0xff]  ;;  %v1992_v26 = vld [vmem:[#allocation5 + $0x78] sm:$0xff]  ;;  %v5361_v27 = vpack.c.bf16 %v1987_v12, %v1985_v11  ;;  %v2001_v11 = vld [vmem:[#allocation5 + $0xc0] sm:$0xff] }
 0x31d   :  { %1393 = vmatmul.mubr.f32.gmra.mrb[22].mxu1 %v1253_v32  ;;  %v1158_v32 = vld [vmem:[#allocation3 + $0x150] sm:$0xff] }
 0x31e   :  { %4053 = vmatpush1.bf16.msra.mxu1 %v4052_v33  ;;  %3701 = vmatprep.mubr.msk.f32.mxu1 %vm1315_vm5, %v1107_v16  ;;  %v1155_v16 = vld [vmem:[#allocation3 + $0x138] sm:$0xff]  ;;  %v5341_v33 = vpop.f32.mrb[17].mxu0  ;;  %v4088_v36 = vpack.c.bf16 %v1158_v32, %v1156_v31  ;;  %v1991_v31 = vld [vmem:[#allocation5 + $0x70] sm:$0xff] }
 0x31f   :  { %4055 = vmatprep.subr.bf16.mxu1 %v4054_v35  ;;  %v4082_v22 = vpack.c.bf16 %v1155_v16, %v1153_v13  ;;  %v1163_v35 = vld [vmem:[#allocation3 + $0x178] sm:$0xff]  ;;  %v5343_v37 = vpop.f32.mrb[18].mxu0  ;;  %v4112_v13 = vpack.c.bf16 %v1572_v6, %v1570_v5  ;;  %v1569_v16 = vld [vmem:[#allocation3 + $0x380] sm:$0xff]  ;;  %v2003_v12 = vld [vmem:[#allocation5 + $0xd0] sm:$0xff] }
 0x320   :  { %v4090_v38 = vpack.c.bf16 %v1163_v35, %v1161_v34  ;;  %v5345_v43 = vpop.f32.mrb[19].mxu0  ;;  %v1573_v34 = vld [vmem:[#allocation3 + $0x3a0] sm:$0xff]  ;;  %v1575_v35 = vld [vmem:[#allocation3 + $0x3b0] sm:$0xff]  ;;  %v1588_v5 = vld [vmem:[#allocation3 + $0x418] sm:$0xff] }
 0x322   :  { %4057 = vmatpush1.bf16.msra.mxu1 %v4056_v40  ;;  %v1162_v40 = vld [vmem:[#allocation3 + $0x170] sm:$0xff] }
 0x323   :  { %4059 = vmatprep.subr.bf16.mxu1 %v4058_v41  ;;  %v1165_v41 = vld [vmem:[#allocation3 + $0x188] sm:$0xff]  ;;  %v4092_v44 = vpack.c.bf16 %v1162_v40, %v1160_v39  ;;  %v1580_v39 = vld [vmem:[#allocation3 + $0x3d8] sm:$0xff] }
 0x324   :  { %v4094_v45 = vpack.c.bf16 %v1167_v42, %v1165_v41  ;;  %v1994_v40 = vld [vmem:[#allocation5 + $0x88] sm:$0xff]  ;;  %v1996_v41 = vld [vmem:[#allocation5 + $0x98] sm:$0xff] }
 0x326   :  { %4061 = vmatpush1.bf16.msra.mxu1 %v4060_v46  ;;  %v1164_v46 = vld [vmem:[#allocation3 + $0x180] sm:$0xff] }
 0x327   :  { %4063 = vmatprep.subr.bf16.mxu1 %v4062_v48  ;;  %v1166_v48 = vld [vmem:[#allocation3 + $0x190] sm:$0xff] }
 0x328   :  { %v4096_v56 = vpack.c.bf16 %v1166_v48, %v1164_v46  ;;  %v1993_v46 = vld [vmem:[#allocation5 + $0x80] sm:$0xff]  ;;  %v1995_v48 = vld [vmem:[#allocation5 + $0x90] sm:$0xff] }
 0x32a   :  { %4065 = vmatpush1.bf16.msra.mxu1 %v4064_v53  ;;  %v1978_v53 = vld [vmem:[#allocation5 + $0x8] sm:$0xff] }
 0x32b   :  { %4067 = vmatprep.subr.bf16.mxu1 %v4066_v54  ;;  %v1980_v54 = vld [vmem:[#allocation5 + $0x18] sm:$0xff] }
 0x32c   :  { %v5347_v57 = vpack.c.bf16 %v1980_v54, %v1978_v53  ;;  %v1582_v53 = vld [vmem:[#allocation3 + $0x3e8] sm:$0xff]  ;;  %v1584_v54 = vld [vmem:[#allocation3 + $0x3f8] sm:$0xff] }
 0x32e   :  { %4069 = vmatpush1.bf16.msra.mxu1 %v4068_v59  ;;  %v1982_v59 = vld [vmem:[#allocation5 + $0x28] sm:$0xff]  ;;  %4235 = vmatprep.subr.bf16.mxu0 %v5347_v57 }
 0x32f   :  { %4071 = vmatprep.subr.bf16.mxu1 %v4070_v60  ;;  %v1984_v60 = vld [vmem:[#allocation5 + $0x38] sm:$0xff]  ;;  %4237 = vmatpush1.bf16.msra.mxu0 %v5349_v62 }
 0x330   :  { %v5351_v0 = vpack.c.bf16 %v1984_v60, %v1982_v59  ;;  %v1997_v59 = vld [vmem:[#allocation5 + $0xa0] sm:$0xff]  ;;  %v1999_v60 = vld [vmem:[#allocation5 + $0xb0] sm:$0xff] }
 0x331   :  { %v5385_v6 = vpack.c.bf16 %v1999_v60, %v1997_v59 }
 0x332   :  { %4073 = vmatpush1.bf16.msra.mxu1 %v4072_v3  ;;  %v1983_v3 = vld [vmem:[#allocation5 + $0x30] sm:$0xff]  ;;  %4239 = vmatprep.subr.bf16.mxu0 %v5351_v0 }
 0x333   :  { %4075 = vmatprep.subr.bf16.mxu1 %v4074_v4  ;;  %v1986_v4 = vld [vmem:[#allocation5 + $0x48] sm:$0xff]  ;;  %v5355_v8 = vpack.c.bf16 %v1983_v3, %v1981_v2  ;;  %v1583_v2 = vld [vmem:[#allocation3 + $0x3f0] sm:$0xff]  ;;  %v2004_v3 = vld [vmem:[#allocation5 + $0xd8] sm:$0xff] }
 0x335   :  { %4241 = vmatpush1.bf16.msra.mxu0 %v5355_v8 }
 0x336   :  { %4077 = vmatpush1.bf16.msra.mxu1 %v4076_v9  ;;  %v4100_v9 = vpack.c.bf16 %v1170_v52, %v1168_v51  ;;  %v5373_v51 = vpack.c.bf16 %v1996_v41, %v1994_v40  ;;  %v2000_v52 = vld [vmem:[#allocation5 + $0xb8] sm:$0xff] }
 0x337   :  { %4079 = vmatprep.subr.bf16.mxu1 %v4078_v10  ;;  %v5358_v10 = vpack.c.bf16 %v1988_v7, %v1986_v4  ;;  %v1586_v4 = vld [vmem:[#allocation3 + $0x408] sm:$0xff]  ;;  %v1596_v40 = vld [vmem:[#allocation3 + $0x458] sm:$0xff] }
 0x339   :  { %4243 = vmatprep.subr.bf16.mxu0 %v5358_v10 }
 0x33a   :  { %4081 = vmatpush1.bf16.msra.mxu1 %v4080_v20  ;;  %v1571_v20 = vld [vmem:[#allocation3 + $0x390] sm:$0xff]  ;;  %4245 = vmatpush1.bf16.msra.mxu0 %v5361_v27 }
 0x33b   :  { %4083 = vmatprep.subr.bf16.mxu1 %v4082_v22  ;;  %v1574_v22 = vld [vmem:[#allocation3 + $0x3a8] sm:$0xff] }
 0x33c   :  { %v4116_v32 = vpack.c.bf16 %v1576_v23, %v1574_v22  ;;  %v2008_v22 = vld [vmem:[#allocation5 + $0xf8] sm:$0xff]  ;;  %v1590_v23 = vld [vmem:[#allocation3 + $0x428] sm:$0xff] }
 0x33e   :  { %4085 = vmatpush1.bf16.msra.mxu1 %v4084_v28  ;;  %v4114_v28 = vpack.c.bf16 %v1571_v20, %v1569_v16  ;;  %v1587_v16 = vld [vmem:[#allocation3 + $0x410] sm:$0xff]  ;;  %v2006_v20 = vld [vmem:[#allocation5 + $0xe8] sm:$0xff] }
 0x33f   :  { %4087 = vmatprep.subr.bf16.mxu1 %v4086_v30  ;;  %v1989_v30 = vld [vmem:[#allocation5 + $0x60] sm:$0xff] }
 0x340   :  { %v5368_v42 = vpack.c.bf16 %v1991_v31, %v1989_v30  ;;  %v5394_v30 = vpack.c.bf16 %v2008_v22, %v2006_v20  ;;  %v2005_v31 = vld [vmem:[#allocation5 + $0xe0] sm:$0xff]  ;;  %v1611_v22 = vld [vmem:[#allocation3 + $0x4d0] sm:$0xff] }
 0x341   :  { %v1609_v20 = vld [vmem:[#allocation3 + $0x4c0] sm:$0xff] }
 0x342   :  { %4089 = vmatpush1.bf16.msra.mxu1 %v4088_v36  ;;  %v1578_v36 = vld [vmem:[#allocation3 + $0x3c8] sm:$0xff] }
 0x343   :  { %4091 = vmatprep.subr.bf16.mxu1 %v4090_v38  ;;  %v5364_v38 = vpack.c.bf16 %v1992_v26, %v1990_v24  ;;  %v4120_v49 = vpack.c.bf16 %v1580_v39, %v1578_v36  ;;  %v1592_v24 = vld [vmem:[#allocation3 + $0x438] sm:$0xff]  ;;  %v5391_v26 = vpack.c.bf16 %v2003_v12, %v2001_v11  ;;  %v1591_v36 = vld [vmem:[#allocation3 + $0x430] sm:$0xff]  ;;  %v1594_v39 = vld [vmem:[#allocation3 + $0x448] sm:$0xff] }
 0x344   :  { %v1610_v11 = vld [vmem:[#allocation3 + $0x4c8] sm:$0xff]  ;;  %v1612_v12 = vld [vmem:[#allocation3 + $0x4d8] sm:$0xff] }
 0x345   :  { %4247 = vmatprep.subr.bf16.mxu0 %v5364_v38 }
 0x346   :  { %4093 = vmatpush1.bf16.msra.mxu1 %v4092_v44  ;;  %v4118_v44 = vpack.c.bf16 %v1575_v35, %v1573_v34  ;;  %4249 = vmatpush1.bf16.msra.mxu0 %v5368_v42  ;;  %v4132_v34 = vpack.c.bf16 %v1592_v24, %v1590_v23  ;;  %v1589_v35 = vld [vmem:[#allocation3 + $0x420] sm:$0xff]  ;;  %v1614_v23 = vld [vmem:[#allocation3 + $0x4e8] sm:$0xff]  ;;  %v1616_v24 = vld [vmem:[#allocation3 + $0x4f8] sm:$0xff] }
 0x347   :  { %4095 = vmatprep.subr.bf16.mxu1 %v4094_v45  ;;  %v1577_v45 = vld [vmem:[#allocation3 + $0x3c0] sm:$0xff]  ;;  %4251 = vmatprep.subr.bf16.mxu0 %v5373_v51 }
 0x348   :  { %v4122_v55 = vpack.c.bf16 %v1579_v50, %v1577_v45  ;;  %v4136_v45 = vpack.c.bf16 %v1596_v40, %v1594_v39  ;;  %v1600_v50 = vld [vmem:[#allocation3 + $0x478] sm:$0xff] }
 0x34a   :  { %4097 = vmatpush1.bf16.msra.mxu1 %v4096_v56  ;;  %v1581_v56 = vld [vmem:[#allocation3 + $0x3e0] sm:$0xff] }
 0x34b   :  { %4099 = vmatprep.subr.bf16.mxu1 %v4098_v61  ;;  %v4124_v61 = vpack.c.bf16 %v1584_v54, %v1582_v53  ;;  %v4126_v7 = vpack.c.bf16 %v1583_v2, %v1581_v56  ;;  %v1597_v53 = vld [vmem:[#allocation3 + $0x460] sm:$0xff]  ;;  %v1599_v54 = vld [vmem:[#allocation3 + $0x470] sm:$0xff]  ;;  %v1604_v56 = vld [vmem:[#allocation3 + $0x498] sm:$0xff] }
 0x34c   :  { %v4142_v59 = vpack.c.bf16 %v1599_v54, %v1597_v53  ;;  %v1603_v2 = vld [vmem:[#allocation3 + $0x490] sm:$0xff]  ;;  %v1800_v53 = vld [vmem:[#allocation3 + $0x548] sm:$0xff]  ;;  %v1802_v54 = vld [vmem:[#allocation3 + $0x558] sm:$0xff] }
 0x34e   :  { %4101 = vmatpush1.bf16.msra.mxu1 %v4100_v9 }
 0x34f   :  { %4113 = vmatprep.subr.bf16.mxu1 %v4112_v13  ;;  %v4128_v13 = vpack.c.bf16 %v1588_v5, %v1586_v4 }
 0x351   :  { %1470 = vmatmul.mubr.f32.vlgmr.msra.gmra.mrb[20].mxu1 %v5322_v14  ;;  %v1998_v14 = vld [vmem:[#allocation5 + $0xa8] sm:$0xff] }
 0x352   :  { %3702 = vmatprep.mubr.msk.f32.mxu1 %vm1315_vm5, %v5330_v19  ;;  %4115 = vmatpush1.bf16.msra.mxu1 %v4114_v28  ;;  %v5377_v19 = vpack.c.bf16 %v1995_v48, %v1993_v46  ;;  %v5381_v58 = vpack.c.bf16 %v2000_v52, %v1998_v14  ;;  %v1593_v46 = vld [vmem:[#allocation3 + $0x440] sm:$0xff]  ;;  %v1595_v48 = vld [vmem:[#allocation3 + $0x450] sm:$0xff] }
 0x353   :  { %4117 = vmatprep.subr.bf16.mxu1 %v4116_v32  ;;  %v2007_v32 = vld [vmem:[#allocation5 + $0xf0] sm:$0xff]  ;;  %v4138_v14 = vpack.c.bf16 %v1595_v48, %v1593_v46  ;;  %v1622_v46 = vld [vmem:[#allocation3 + $0x528] sm:$0xff]  ;;  %v1624_v48 = vld [vmem:[#allocation3 + $0x538] sm:$0xff] }
 0x354   :  { %4253 = vmatpush1.bf16.msra.mxu0 %v5377_v19  ;;  %v5397_v41 = vpack.c.bf16 %v2007_v32, %v2005_v31  ;;  %v4156_v31 = vpack.c.bf16 %v1616_v24, %v1614_v23  ;;  %v1613_v32 = vld [vmem:[#allocation3 + $0x4e0] sm:$0xff] }
 0x355   :  { %1476 = vmatmul.mubr.f32.gmra.mrb[22].mxu1 %v5328_v18  ;;  %v2002_v18 = vld [vmem:[#allocation5 + $0xc8] sm:$0xff]  ;;  %4255 = vmatprep.subr.bf16.mxu0 %v5381_v58  ;;  %v1811_v24 = vld [vmem:[#allocation3 + $0x5a0] sm:$0xff] }
 0x356   :  { %4119 = vmatpush1.bf16.msra.mxu1 %v4118_v44  ;;  %3709 = vmatprep.mubr.msk.f32.mxu1 %vm1315_vm5, %v5326_v17  ;;  %v1585_v17 = vld [vmem:[#allocation3 + $0x400] sm:$0xff]  ;;  %v5388_v9 = vpack.c.bf16 %v2004_v3, %v2002_v18  ;;  %v4134_v44 = vpack.c.bf16 %v1591_v36, %v1589_v35  ;;  %v1606_v18 = vld [vmem:[#allocation3 + $0x4a8] sm:$0xff]  ;;  %v1608_v3 = vld [vmem:[#allocation3 + $0x4b8] sm:$0xff] }
 0x357   :  { %4121 = vmatprep.subr.bf16.mxu1 %v4120_v49  ;;  %v4130_v28 = vpack.c.bf16 %v1587_v16, %v1585_v17  ;;  %v1598_v49 = vld [vmem:[#allocation3 + $0x468] sm:$0xff]  ;;  %v4148_v5 = vpack.c.bf16 %v1608_v3, %v1606_v18  ;;  %v1607_v17 = vld [vmem:[#allocation3 + $0x4b0] sm:$0xff]  ;;  %v4152_v16 = vpack.c.bf16 %v1612_v12, %v1610_v11  ;;  %v1620_v36 = vld [vmem:[#allocation3 + $0x518] sm:$0xff] }
 0x358   :  { %4257 = vmatpush1.bf16.msra.mxu0 %v5385_v6  ;;  %v4140_v52 = vpack.c.bf16 %v1600_v50, %v1598_v49  ;;  %v1618_v35 = vld [vmem:[#allocation3 + $0x508] sm:$0xff]  ;;  %v4164_v50 = vpack.c.bf16 %v1624_v48, %v1622_v46  ;;  %v1826_v48 = vld [vmem:[#allocation3 + $0x618] sm:$0xff] }
 0x359   :  { %4259 = vmatprep.subr.bf16.mxu0 %v5388_v9  ;;  %v4160_v40 = vpack.c.bf16 %v1620_v36, %v1618_v35  ;;  %v1815_v35 = vld [vmem:[#allocation3 + $0x5c0] sm:$0xff]  ;;  %v1817_v36 = vld [vmem:[#allocation3 + $0x5d0] sm:$0xff]  ;;  %v1824_v46 = vld [vmem:[#allocation3 + $0x608] sm:$0xff] }
 0x35a   :  { %4123 = vmatpush1.bf16.msra.mxu1 %v4122_v55  ;;  %v1602_v55 = vld [vmem:[#allocation3 + $0x488] sm:$0xff] }
 0x35b   :  { %4125 = vmatprep.subr.bf16.mxu1 %v4124_v61  ;;  %v4144_v60 = vpack.c.bf16 %v1604_v56, %v1602_v55  ;;  %v1601_v61 = vld [vmem:[#allocation3 + $0x480] sm:$0xff]  ;;  %v4178_v56 = vpack.c.bf16 %v1802_v54, %v1800_v53  ;;  %v1828_v53 = vld [vmem:[#allocation3 + $0x628] sm:$0xff]  ;;  %v1830_v54 = vld [vmem:[#allocation3 + $0x638] sm:$0xff] }
 0x35c   :  { %4261 = vmatpush1.bf16.msra.mxu0 %v5391_v26  ;;  %v4146_v4 = vpack.c.bf16 %v1603_v2, %v1601_v61  ;;  %v1804_v61 = vld [vmem:[#allocation3 + $0x568] sm:$0xff]  ;;  %v1806_v2 = vld [vmem:[#allocation3 + $0x578] sm:$0xff] }
 0x35d   :  { %4263 = vmatprep.subr.bf16.mxu0 %v5394_v30  ;;  %v4182_v3 = vpack.c.bf16 %v1806_v2, %v1804_v61  ;;  %v1832_v61 = vld [vmem:[#allocation3 + $0x648] sm:$0xff]  ;;  %v1834_v2 = vld [vmem:[#allocation3 + $0x658] sm:$0xff] }
 0x35e   :  { %4127 = vmatpush1.bf16.msra.mxu1 %v4126_v7  ;;  %v1605_v7 = vld [vmem:[#allocation3 + $0x4a0] sm:$0xff] }
 0x35f   :  { %4129 = vmatprep.subr.bf16.mxu1 %v4128_v13  ;;  %v4150_v13 = vpack.c.bf16 %v1607_v17, %v1605_v7  ;;  %v1808_v7 = vld [vmem:[#allocation3 + $0x588] sm:$0xff]  ;;  %v1810_v17 = vld [vmem:[#allocation3 + $0x598] sm:$0xff] }
 0x360   :  { %4265 = vmatpush1.bf16.msra.mxu0 %v5397_v41  ;;  %v4186_v12 = vpack.c.bf16 %v1810_v17, %v1808_v7  ;;  %v1836_v7 = vld [vmem:[#allocation3 + $0x668] sm:$0xff]  ;;  %v1838_v17 = vld [vmem:[#allocation3 + $0x678] sm:$0xff] }
 0x362   :  { %4131 = vmatpush1.bf16.msra.mxu1 %v4130_v28  ;;  %v4154_v28 = vpack.c.bf16 %v1611_v22, %v1609_v20  ;;  %v1812_v20 = vld [vmem:[#allocation3 + $0x5a8] sm:$0xff]  ;;  %v1814_v22 = vld [vmem:[#allocation3 + $0x5b8] sm:$0xff] }
 0x363   :  { %4133 = vmatprep.subr.bf16.mxu1 %v4132_v34  ;;  %v1615_v34 = vld [vmem:[#allocation3 + $0x4f0] sm:$0xff] }
 0x364   :  { %v4158_v39 = vpack.c.bf16 %v1615_v34, %v1613_v32  ;;  %v1818_v32 = vld [vmem:[#allocation3 + $0x5d8] sm:$0xff] }
 0x366   :  { %4135 = vmatpush1.bf16.msra.mxu1 %v4134_v44  ;;  %v1617_v44 = vld [vmem:[#allocation3 + $0x500] sm:$0xff] }
 0x367   :  { %4137 = vmatprep.subr.bf16.mxu1 %v4136_v45  ;;  %v1619_v45 = vld [vmem:[#allocation3 + $0x510] sm:$0xff] }
 0x368   :  { %v4162_v49 = vpack.c.bf16 %v1619_v45, %v1617_v44  ;;  %v1819_v45 = vld [vmem:[#allocation3 + $0x5e0] sm:$0xff] }
 0x36a   :  { %4139 = vmatpush1.bf16.msra.mxu1 %v4138_v14  ;;  %v1621_v14 = vld [vmem:[#allocation3 + $0x520] sm:$0xff] }
 0x36b   :  { %4141 = vmatprep.subr.bf16.mxu1 %v4140_v52  ;;  %v1623_v52 = vld [vmem:[#allocation3 + $0x530] sm:$0xff] }
 0x36c   :  { %v4166_v55 = vpack.c.bf16 %v1623_v52, %v1621_v14  ;;  %v1823_v14 = vld [vmem:[#allocation3 + $0x600] sm:$0xff]  ;;  %v1825_v52 = vld [vmem:[#allocation3 + $0x610] sm:$0xff] }
 0x36e   :  { %4143 = vmatpush1.bf16.msra.mxu1 %v4142_v59  ;;  %v1799_v59 = vld [vmem:[#allocation3 + $0x540] sm:$0xff] }
 0x36f   :  { %4145 = vmatprep.subr.bf16.mxu1 %v4144_v60  ;;  %v1801_v60 = vld [vmem:[#allocation3 + $0x550] sm:$0xff] }
 0x370   :  { %v4180_v18 = vpack.c.bf16 %v1801_v60, %v1799_v59  ;;  %v1827_v59 = vld [vmem:[#allocation3 + $0x620] sm:$0xff]  ;;  %v1829_v60 = vld [vmem:[#allocation3 + $0x630] sm:$0xff] }
 0x372   :  { %4147 = vmatpush1.bf16.msra.mxu1 %v4146_v4  ;;  %v1803_v4 = vld [vmem:[#allocation3 + $0x560] sm:$0xff] }
 0x373   :  { %4149 = vmatprep.subr.bf16.mxu1 %v4148_v5  ;;  %v1805_v5 = vld [vmem:[#allocation3 + $0x570] sm:$0xff] }
 0x374   :  { %v4184_v11 = vpack.c.bf16 %v1805_v5, %v1803_v4  ;;  %v1831_v4 = vld [vmem:[#allocation3 + $0x640] sm:$0xff]  ;;  %v1833_v5 = vld [vmem:[#allocation3 + $0x650] sm:$0xff] }
 0x376   :  { %4151 = vmatpush1.bf16.msra.mxu1 %v4150_v13  ;;  %v1807_v13 = vld [vmem:[#allocation3 + $0x580] sm:$0xff] }
 0x377   :  { %4153 = vmatprep.subr.bf16.mxu1 %v4152_v16  ;;  %v1809_v16 = vld [vmem:[#allocation3 + $0x590] sm:$0xff] }
 0x378   :  { %v4188_v23 = vpack.c.bf16 %v1809_v16, %v1807_v13  ;;  %v1835_v13 = vld [vmem:[#allocation3 + $0x660] sm:$0xff]  ;;  %v1837_v16 = vld [vmem:[#allocation3 + $0x670] sm:$0xff] }
 0x37a   :  { %4155 = vmatpush1.bf16.msra.mxu1 %v4154_v28  ;;  %v1813_v28 = vld [vmem:[#allocation3 + $0x5b0] sm:$0xff] }
 0x37b   :  { %4157 = vmatprep.subr.bf16.mxu1 %v4156_v31  ;;  %v1816_v31 = vld [vmem:[#allocation3 + $0x5c8] sm:$0xff] }
 0x37c   :  { %v4194_v34 = vpack.c.bf16 %v1818_v32, %v1816_v31  ;;  %v1844_v31 = vld [vmem:[#allocation3 + $0x6a8] sm:$0xff]  ;;  %v1846_v32 = vld [vmem:[#allocation3 + $0x6b8] sm:$0xff] }
 0x37e   :  { %4159 = vmatpush1.bf16.msra.mxu1 %v4158_v39  ;;  %v1820_v39 = vld [vmem:[#allocation3 + $0x5e8] sm:$0xff] }
 0x37f   :  { %4161 = vmatprep.subr.bf16.mxu1 %v4160_v40  ;;  %v1822_v40 = vld [vmem:[#allocation3 + $0x5f8] sm:$0xff] }
 0x380   :  { %v4198_v44 = vpack.c.bf16 %v1822_v40, %v1820_v39  ;;  %v1848_v39 = vld [vmem:[#allocation3 + $0x6c8] sm:$0xff]  ;;  %v1850_v40 = vld [vmem:[#allocation3 + $0x6d8] sm:$0xff] }
 0x382   :  { %4163 = vmatpush1.bf16.msra.mxu1 %v4162_v49 }
 0x383   :  { %4165 = vmatprep.subr.bf16.mxu1 %v4164_v50  ;;  %v4202_v50 = vpack.c.bf16 %v1826_v48, %v1824_v46  ;;  %v1852_v46 = vld [vmem:[#allocation3 + $0x6e8] sm:$0xff]  ;;  %v1854_v48 = vld [vmem:[#allocation3 + $0x6f8] sm:$0xff] }
 0x386   :  { %4167 = vmatpush1.bf16.msra.mxu1 %v4166_v55  ;;  %v4204_v55 = vpack.c.bf16 %v1825_v52, %v1823_v14  ;;  %v1851_v14 = vld [vmem:[#allocation3 + $0x6e0] sm:$0xff]  ;;  %v1853_v52 = vld [vmem:[#allocation3 + $0x6f0] sm:$0xff] }
 0x387   :  { %4179 = vmatprep.subr.bf16.mxu1 %v4178_v56  ;;  %v4206_v56 = vpack.c.bf16 %v1830_v54, %v1828_v53  ;;  %v4232_v53 = vpack.c.bf16 %v1853_v52, %v1851_v14  ;;  %v2010_v54 = vld [vmem:[#allocation5 + $0x108] sm:$0xff] }
 0x389   :  { %1696 = vmatmul.mubr.f32.vlgmr.msra.gmra.mrb[20].mxu1 %v5324_v15  ;;  %v4190_v15 = vpack.c.bf16 %v1814_v22, %v1812_v20  ;;  %v1840_v20 = vld [vmem:[#allocation3 + $0x688] sm:$0xff]  ;;  %v1842_v22 = vld [vmem:[#allocation3 + $0x698] sm:$0xff] }
 0x38a   :  { %4181 = vmatpush1.bf16.msra.mxu1 %v4180_v18  ;;  %3710 = vmatprep.mubr.msk.f32.mxu1 %vm1315_vm5, %v5337_v25  ;;  %v4192_v25 = vpack.c.bf16 %v1813_v28, %v1811_v24  ;;  %v4208_v18 = vpack.c.bf16 %v1829_v60, %v1827_v59  ;;  %v1839_v24 = vld [vmem:[#allocation3 + $0x680] sm:$0xff]  ;;  %v1841_v28 = vld [vmem:[#allocation3 + $0x690] sm:$0xff] }
 0x38b   :  { %4183 = vmatprep.subr.bf16.mxu1 %v4182_v3  ;;  %v4210_v3 = vpack.c.bf16 %v1834_v2, %v1832_v61  ;;  %v2009_v59 = vld [vmem:[#allocation5 + $0x100] sm:$0xff]  ;;  %v2011_v60 = vld [vmem:[#allocation5 + $0x110] sm:$0xff]  ;;  %v2014_v2 = vld [vmem:[#allocation5 + $0x128] sm:$0xff] }
 0x38c   :  { %v5413_v61 = vpack.c.bf16 %v2011_v60, %v2009_v59 }
 0x38d   :  { %1702 = vmatmul.mubr.f32.gmra.mrb[22].mxu1 %v5335_v21  ;;  %v4196_v21 = vpack.c.bf16 %v1817_v36, %v1815_v35  ;;  %v1843_v35 = vld [vmem:[#allocation3 + $0x6a0] sm:$0xff]  ;;  %v1845_v36 = vld [vmem:[#allocation3 + $0x6b0] sm:$0xff] }
 0x38e   :  { %4185 = vmatpush1.bf16.msra.mxu1 %v4184_v11  ;;  %3717 = vmatprep.mubr.msk.f32.mxu1 %vm1315_vm5, %v5341_v33  ;;  %v1821_v33 = vld [vmem:[#allocation3 + $0x5f0] sm:$0xff]  ;;  %v4212_v11 = vpack.c.bf16 %v1833_v5, %v1831_v4  ;;  %v2020_v5 = vld [vmem:[#allocation5 + $0x158] sm:$0xff] }
 0x38f   :  { %4187 = vmatprep.subr.bf16.mxu1 %v4186_v12  ;;  %v4200_v49 = vpack.c.bf16 %v1821_v33, %v1819_v45  ;;  %v4214_v12 = vpack.c.bf16 %v1838_v17, %v1836_v7  ;;  %v1847_v45 = vld [vmem:[#allocation3 + $0x6c0] sm:$0xff]  ;;  %v1849_v33 = vld [vmem:[#allocation3 + $0x6d0] sm:$0xff] }
 0x390   :  { %v2017_v17 = vld [vmem:[#allocation5 + $0x140] sm:$0xff] }
 0x392   :  { %4189 = vmatpush1.bf16.msra.mxu1 %v4188_v23  ;;  %v4216_v23 = vpack.c.bf16 %v1837_v16, %v1835_v13  ;;  %v2022_v13 = vld [vmem:[#allocation5 + $0x168] sm:$0xff]  ;;  %v2024_v16 = vld [vmem:[#allocation5 + $0x178] sm:$0xff] }
 0x393   :  { %4191 = vmatprep.subr.bf16.mxu1 %v4190_v15  ;;  %v4218_v15 = vpack.c.bf16 %v1842_v22, %v1840_v20  ;;  %v5429_v20 = vpack.c.bf16 %v2024_v16, %v2022_v13  ;;  %v2021_v22 = vld [vmem:[#allocation5 + $0x160] sm:$0xff] }
 0x396   :  { %4193 = vmatpush1.bf16.msra.mxu1 %v4192_v25  ;;  %v4220_v25 = vpack.c.bf16 %v1841_v28, %v1839_v24  ;;  %v2026_v24 = vld [vmem:[#allocation5 + $0x188] sm:$0xff]  ;;  %v2028_v28 = vld [vmem:[#allocation5 + $0x198] sm:$0xff] }
 0x397   :  { %4195 = vmatprep.subr.bf16.mxu1 %v4194_v34  ;;  %v4222_v34 = vpack.c.bf16 %v1846_v32, %v1844_v31  ;;  %v5435_v31 = vpack.c.bf16 %v2028_v28, %v2026_v24  ;;  %v2025_v32 = vld [vmem:[#allocation5 + $0x180] sm:$0xff] }
 0x39a   :  { %4197 = vmatpush1.bf16.msra.mxu1 %v4196_v21  ;;  %v4224_v21 = vpack.c.bf16 %v1845_v36, %v1843_v35  ;;  %v2030_v35 = vld [vmem:[#allocation5 + $0x1a8] sm:$0xff]  ;;  %v2032_v36 = vld [vmem:[#allocation5 + $0x1b8] sm:$0xff] }
 0x39b   :  { %4199 = vmatprep.subr.bf16.mxu1 %v4198_v44  ;;  %v4226_v44 = vpack.c.bf16 %v1850_v40, %v1848_v39  ;;  %v5441_v39 = vpack.c.bf16 %v2032_v36, %v2030_v35  ;;  %v2029_v40 = vld [vmem:[#allocation5 + $0x1a0] sm:$0xff] }
 0x39e   :  { %4201 = vmatpush1.bf16.msra.mxu1 %v4200_v49  ;;  %v4228_v49 = vpack.c.bf16 %v1849_v33, %v1847_v45  ;;  %v1942_v45 = vld [vmem:[%s5927_s6] ss:$4 sm:$0x3] }
 0x39f   :  { %4203 = vmatprep.subr.bf16.mxu1 %v4202_v50  ;;  %v4230_v50 = vpack.c.bf16 %v1854_v48, %v1852_v46  ;;  %v1951_v46 = vrot.slane %v1942_v45, %v5259_v1 }
 0x3a2   :  { %4205 = vmatpush1.bf16.msra.mxu1 %v4204_v55  ;;  %v2012_v55 = vld [vmem:[#allocation5 + $0x118] sm:$0xff] }
 0x3a3   :  { %4207 = vmatprep.subr.bf16.mxu1 %v4206_v56  ;;  %v5411_v56 = vpack.c.bf16 %v2012_v55, %v2010_v54 }
 0x3a5   :  { %4267 = vmatprep.subr.bf16.mxu0 %v5411_v56 }
 0x3a6   :  { %4209 = vmatpush1.bf16.msra.mxu1 %v4208_v18  ;;  %4269 = vmatpush1.bf16.msra.mxu0 %v5413_v61  ;;  %v2016_v18 = vld [vmem:[#allocation5 + $0x138] sm:$0xff] }
 0x3a7   :  { %4211 = vmatprep.subr.bf16.mxu1 %v4210_v3  ;;  %v2013_v3 = vld [vmem:[#allocation5 + $0x120] sm:$0xff] }
 0x3aa   :  { %4213 = vmatpush1.bf16.msra.mxu1 %v4212_v11  ;;  %v2019_v11 = vld [vmem:[#allocation5 + $0x150] sm:$0xff] }
 0x3ab   :  { %4215 = vmatprep.subr.bf16.mxu1 %v4214_v12  ;;  %v5425_v12 = vpack.c.bf16 %v2019_v11, %v2017_v17 }
 0x3ae   :  { %4217 = vmatpush1.bf16.msra.mxu1 %v4216_v23  ;;  %v2023_v23 = vld [vmem:[#allocation5 + $0x170] sm:$0xff] }
 0x3af   :  { %4219 = vmatprep.subr.bf16.mxu1 %v4218_v15  ;;  %v5431_v15 = vpack.c.bf16 %v2023_v23, %v2021_v22 }
 0x3b2   :  { %4221 = vmatpush1.bf16.msra.mxu1 %v4220_v25  ;;  %v2027_v25 = vld [vmem:[#allocation5 + $0x190] sm:$0xff] }
 0x3b3   :  { %4223 = vmatprep.subr.bf16.mxu1 %v4222_v34  ;;  %v5437_v34 = vpack.c.bf16 %v2027_v25, %v2025_v32 }
 0x3b6   :  { %4225 = vmatpush1.bf16.msra.mxu1 %v4224_v21  ;;  %v2031_v21 = vld [vmem:[#allocation5 + $0x1b0] sm:$0xff] }
 0x3b7   :  { %4227 = vmatprep.subr.bf16.mxu1 %v4226_v44  ;;  %v4288_v44 = vpack.c.bf16 %v2031_v21, %v2029_v40 }
 0x3ba   :  { %4229 = vmatpush1.bf16.msra.mxu1 %v4228_v49  ;;  %v1947_v49 = vrot.slane %v1942_v45, %v5254_v63  ;;  %v3721_v45 = vld [vmem:[%s5927_s6 + $0x1] ss:$4 sm:$0x3] }
 0x3bb   :  { %4231 = vmatprep.subr.bf16.mxu1 %v4230_v50 }
 0x3be   :  { %4233 = vmatpush1.bf16.msra.mxu1 %v4232_v53 }
 0x3c1   :  { %1926 = vmatmul.mubr.f32.vlgmr.msra.gmra.mrb[20].mxu1 %v5339_v29  ;;  %v5417_v29 = vpack.c.bf16 %v2016_v18, %v2014_v2 }
 0x3c2   :  { %3718 = vmatprep.mubr.msk.f32.mxu1 %vm1315_vm5, %v5345_v43  ;;  %v2015_v43 = vld [vmem:[#allocation5 + $0x130] sm:$0xff] }
 0x3c3   :  { %v5419_v4 = vpack.c.bf16 %v2015_v43, %v2013_v3  ;;  %4271 = vmatprep.subr.bf16.mxu0 %v5417_v29 }
 0x3c5   :  { %1932 = vmatmul.mubr.f32.gmra.mrb[22].mxu1 %v5343_v37  ;;  %4273 = vmatpush1.bf16.msra.mxu0 %v5419_v4  ;;  %v2018_v37 = vld [vmem:[#allocation5 + $0x148] sm:$0xff] }
 0x3c6   :  { %v5423_v7 = vpack.c.bf16 %v2020_v5, %v2018_v37 }
 0x3c8   :  { %4275 = vmatprep.subr.bf16.mxu0 %v5423_v7 }
 0x3c9   :  { %4277 = vmatpush1.bf16.msra.mxu0 %v5425_v12 }
 0x3ca   :  { %4279 = vmatprep.subr.bf16.mxu0 %v5429_v20 }
 0x3cd   :  { %4281 = vmatpush1.bf16.msra.mxu0 %v5431_v15 }
 0x3ce   :  { %4283 = vmatprep.subr.bf16.mxu0 %v5435_v31 }
 0x3d1   :  { %4285 = vmatpush1.bf16.msra.mxu0 %v5437_v34 }
 0x3d2   :  { %4287 = vmatprep.subr.bf16.mxu0 %v5441_v39 }
 0x3d5   :  { %4289 = vmatpush1.bf16.msra.mxu0 %v4288_v44 }
 0x3d6   :  { %4291 = vmatprep.subr.bf16.mxu0 %v5347_v57 }
 0x494   :  { %v1927_v33 = vpop.f32.mrb[20].mxu1 }
 0x495   :  { %v1929_v48 = vpop.f32.mrb[21].mxu1  ;;  %v1954_v54 = vadd.f32 %v1947_v49, %v1927_v33 }
 0x496   :  { %v1955_v50 = vadd.f32 %v1951_v46, %v1929_v48 }
 0x498   :  { %v1933_v14 = vpop.f32.mrb[22].mxu1  ;;  %v1967_v59 = vsel %vm1315_vm5, %v1955_v50, 0.0 }
 0x499   :  { %v1956_v52 = vadd.f32 %v1947_v49, %v1933_v14  ;;  %v1935_v53 = vpop.f32.mrb[23].mxu1 }
 0x49a   :  { %v1957_v55 = vadd.f32 %v1951_v46, %v1935_v53  ;;  %v3722_v46 = vld [vmem:[%s5927_s6 + $0x2] ss:$4 sm:$0x3] }
 0x49b   :  { %v1959_v57 = vsel %vm1958_vm6, %v1956_v52, 0.0 }
 0x49c   :  { %v1960_v60 = vadd.f32 %v1959_v57, %v1954_v54  ;;  %v1969_v2 = vsel %vm1968_vm7, %v1957_v55, 0.0 }
 0x49d   :  { %v1970_v18 = vadd.f32 %v1969_v2, %v1967_v59 }
 0x49e   :  { %v1961_v3 = vrot.slane %v1960_v60, 4 }
 0x49f   :  { %v1971_v43 = vrot.slane %v1970_v18, 4 }
 0x4a0   :  { %v1962_v37 = vadd.f32 %v1961_v3, %v1960_v60  ;;  %v2255_v60 = vrot.slane %v3722_v46, %v5259_v1 }
 0x4a1   :  { %v1972_v5 = vadd.f32 %v1971_v43, %v1970_v18 }
 0x4a2   :  { %v1963_v17 = vrot.slane %v1962_v37, 2 }
 0x4a3   :  { %v1973_v11 = vrot.slane %v1972_v5, 2 }
 0x4a4   :  { %v1964_v13 = vadd.f32 %v1963_v17, %v1962_v37 }
 0x4a5   :  { %v1974_v16 = vadd.f32 %v1973_v11, %v1972_v5 }
 0x4a6   :  { %v1965_v22 = vrot.slane %v1964_v13, 1 }
 0x4a7   :  { %v1975_v23 = vrot.slane %v1974_v16, 1 }
 0x4a8   :  { %v1966_v28 = vadd.f32 %v1965_v22, %v1964_v13 }
 0x4a9   :  { %v1976_v24 = vadd.f32 %v1975_v23, %v1974_v16 }
 0x4ab   :  { %3719 = vmatprep.mubr.msk.f32.mxu0 %vm1315_vm5, %v1976_v24 }
 0x4ac   :  { %2101 = vmatmul.mubr.f32.vlgmr.msra.gmra.mrb[20].mxu0 %v1966_v28 }
 0x4ad   :  { %4293 = vmatpush1.bf16.msra.mxu0 %v5349_v62 }
 0x4ae   :  { %4295 = vmatprep.subr.bf16.mxu0 %v5351_v0 }
 0x4b1   :  { %4297 = vmatpush1.bf16.msra.mxu0 %v5355_v8 }
 0x4b2   :  { %4299 = vmatprep.subr.bf16.mxu0 %v5358_v10 }
 0x4b5   :  { %4301 = vmatpush1.bf16.msra.mxu0 %v5361_v27 }
 0x4b6   :  { %4303 = vmatprep.subr.bf16.mxu0 %v5364_v38 }
 0x4b9   :  { %4305 = vmatpush1.bf16.msra.mxu0 %v5368_v42 }
 0x4ba   :  { %4307 = vmatprep.subr.bf16.mxu0 %v5373_v51 }
 0x4bd   :  { %4309 = vmatpush1.bf16.msra.mxu0 %v5377_v19 }
 0x4be   :  { %4311 = vmatprep.subr.bf16.mxu0 %v5381_v58 }
 0x4c1   :  { %4313 = vmatpush1.bf16.msra.mxu0 %v5385_v6 }
 0x4c2   :  { %4315 = vmatprep.subr.bf16.mxu0 %v5388_v9 }
 0x4c5   :  { %4317 = vmatpush1.bf16.msra.mxu0 %v5391_v26 }
 0x4c6   :  { %4319 = vmatprep.subr.bf16.mxu0 %v5394_v30 }
 0x4c9   :  { %4321 = vmatpush1.bf16.msra.mxu0 %v5397_v41 }
 0x4ca   :  { %4323 = vmatprep.subr.bf16.mxu0 %v5411_v56 }
 0x4cd   :  { %4325 = vmatpush1.bf16.msra.mxu0 %v5413_v61 }
 0x4ce   :  { %4327 = vmatprep.subr.bf16.mxu0 %v5417_v29 }
 0x4d1   :  { %4329 = vmatpush1.bf16.msra.mxu0 %v5419_v4 }
 0x4d2   :  { %4331 = vmatprep.subr.bf16.mxu0 %v5423_v7 }
 0x4d5   :  { %4333 = vmatpush1.bf16.msra.mxu0 %v5425_v12 }
 0x4d6   :  { %4335 = vmatprep.subr.bf16.mxu0 %v5429_v20 }
 0x4d9   :  { %4337 = vmatpush1.bf16.msra.mxu0 %v5431_v15 }
 0x4da   :  { %4339 = vmatprep.subr.bf16.mxu0 %v5435_v31 }
 0x4dd   :  { %4341 = vmatpush1.bf16.msra.mxu0 %v5437_v34 }
 0x4de   :  { %4343 = vmatprep.subr.bf16.mxu0 %v5441_v39 }
 0x4e1   :  { %4345 = vmatpush1.bf16.msra.mxu0 %v4288_v44 }
 0x57f   :  { %v2102_v62 = vpop.f32.mrb[20].mxu0 }
 0x580   :  { %v2110_v0 = vrot.slane %v2102_v62, %v5254_v63  ;;  %v2104_v8 = vpop.f32.mrb[21].mxu0 }
 0x581   :  { %v2114_v10 = vrot.slane %v2104_v8, %v5254_v63 }
 0x582   :  { %v2115_v27 = vsub.f32 %v1954_v54, %v2110_v0  ;;  %v2117_v38 = vsub.f32 %v1956_v52, %v2110_v0  ;;  %v2238_v52 = vrot.slane %v3721_v45, %v5259_v1 }
 0x583   :  { %v2116_v42 = vsub.f32 %v1955_v50, %v2114_v10  ;;  %v2118_v51 = vsub.f32 %v1957_v55, %v2114_v10  ;;  %v2234_v50 = vrot.slane %v3721_v45, %v5254_v63  ;;  %v2251_v55 = vrot.slane %v3722_v46, %v5254_v63  ;;  %v2503_v46 = vld [vmem:[#allocation7 + $0x250] sm:$0xff] }
 0x584   :  { %v2119_v19 = vmul.f32 %v2115_v27, %v2115_v27  ;;  %v2121_v58 = vmul.f32 %v2117_v38, %v2117_v38 }
 0x585   :  { %v2120_v6 = vmul.f32 %v2116_v42, %v2116_v42  ;;  %v2122_v9 = vmul.f32 %v2118_v51, %v2118_v51 }
 0x586   :  { %v2123_v26 = vsel %vm1958_vm6, %v2121_v58, 0.0  ;;  %v2485_v58 = vld [vmem:[#allocation7 + $0x1c0] sm:$0xff] }
 0x587   :  { %v2124_v30 = vadd.f32 %v2123_v26, %v2119_v19  ;;  %v2131_v41 = vsel %vm1315_vm5, %v2120_v6, 0.0  ;;  %v2132_v56 = vsel %vm1968_vm7, %v2122_v9, 0.0  ;;  %v2487_v6 = vld [vmem:[#allocation7 + $0x1d0] sm:$0xff]  ;;  %v2490_v9 = vld [vmem:[#allocation7 + $0x1e8] sm:$0xff]  ;;  %v2492_v26 = vld [vmem:[#allocation7 + $0x1f8] sm:$0xff] }
 0x588   :  { %v2133_v61 = vadd.f32 %v2132_v56, %v2131_v41  ;;  %v4360_v41 = vpack.c.bf16 %v2487_v6, %v2485_v58  ;;  %v4362_v56 = vpack.c.bf16 %v2492_v26, %v2490_v9  ;;  %v2528_v58 = vld [vmem:[#allocation7 + $0x318] sm:$0xff]  ;;  %v2525_v26 = vld [vmem:[#allocation7 + $0x300] sm:$0xff] }
 0x589   :  { %v2125_v29 = vrot.slane %v2124_v30, 4 }
 0x58a   :  { %v2134_v4 = vrot.slane %v2133_v61, 4 }
 0x58b   :  { %v2126_v7 = vadd.f32 %v2125_v29, %v2124_v30  ;;  %v3726_v30 = vld [vmem:[%s5929_s8 + $0x8] sm:$0xff]  ;;  %v2491_v29 = vld [vmem:[#allocation7 + $0x1f0] sm:$0xff] }
 0x58c   :  { %v2135_v12 = vadd.f32 %v2134_v4, %v2133_v61  ;;  %v2489_v61 = vld [vmem:[#allocation7 + $0x1e0] sm:$0xff]  ;;  %v2494_v4 = vld [vmem:[#allocation7 + $0x208] sm:$0xff] }
 0x58d   :  { %v2127_v20 = vrot.slane %v2126_v7, 2 }
 0x58e   :  { %v2136_v15 = vrot.slane %v2135_v12, 2 }
 0x58f   :  { %v2128_v31 = vadd.f32 %v2127_v20, %v2126_v7  ;;  %v2496_v7 = vld [vmem:[#allocation7 + $0x218] sm:$0xff] }
 0x590   :  { %v2137_v32 = vadd.f32 %v2136_v15, %v2135_v12  ;;  %v4364_v12 = vpack.c.bf16 %v2491_v29, %v2489_v61  ;;  %v4366_v20 = vpack.c.bf16 %v2496_v7, %v2494_v4  ;;  %v2493_v15 = vld [vmem:[#allocation7 + $0x200] sm:$0xff]  ;;  %v2531_v7 = vld [vmem:[#allocation7 + $0x330] sm:$0xff] }
 0x591   :  { %v2129_v25 = vrot.slane %v2128_v31, 1  ;;  %v2529_v4 = vld [vmem:[#allocation7 + $0x320] sm:$0xff] }
 0x592   :  { %v2138_v34 = vrot.slane %v2137_v32, 1 }
 0x593   :  { %v2130_v36 = vadd.f32 %v2129_v25, %v2128_v31  ;;  %v2495_v31 = vld [vmem:[#allocation7 + $0x210] sm:$0xff]  ;;  %v2500_v25 = vld [vmem:[#allocation7 + $0x238] sm:$0xff] }
 0x594   :  { %v2139_v35 = vadd.f32 %v2138_v34, %v2137_v32  ;;  %v2498_v32 = vld [vmem:[#allocation7 + $0x228] sm:$0xff]  ;;  %v4368_v34 = vpack.c.bf16 %v2495_v31, %v2493_v15  ;;  %v4404_v15 = vpack.c.bf16 %v2531_v7, %v2529_v4  ;;  %v2376_v4 = vld [vmem:[#allocation7 + $0xc0] sm:$0xff]  ;;  %v2378_v7 = vld [vmem:[#allocation7 + $0xd0] sm:$0xff] }
 0x596   :  { %3720 = vmatprep.mubr.msk.f32.mxu0 %vm1315_vm5, %v2139_v35  ;;  %v4370_v35 = vpack.c.bf16 %v2500_v25, %v2498_v32  ;;  %v2533_v32 = vld [vmem:[#allocation7 + $0x340] sm:$0xff]  ;;  %v2535_v25 = vld [vmem:[#allocation7 + $0x350] sm:$0xff] }
 0x597   :  { %2208 = vmatmul.mubr.f32.vlgmr.msra.gmra.mrb[22].mxu0 %v2130_v36  ;;  %v2497_v36 = vld [vmem:[#allocation7 + $0x220] sm:$0xff] }
 0x598   :  { %2345 = vmatprep.mubr.f32.mxu0 %v4790_v47 }
 0x66a   :  { %v2209_v39 = vpop.f32.mrb[22].mxu0 }
 0x66b   :  { %v2210_v40 = vadd.f32 1e-05, %v2209_v39  ;;  %v2211_v21 = vpop.f32.mrb[23].mxu0  ;;  %v2499_v39 = vld [vmem:[#allocation7 + $0x230] sm:$0xff] }
 0x66c   :  { %v2212_v44 = vadd.f32 1e-05, %v2211_v21  ;;  %v2504_v21 = vld [vmem:[#allocation7 + $0x258] sm:$0xff] }
 0x66d   :  { %4707 = vrsqrt.f32 %v2210_v40  ;;  %v2502_v40 = vld [vmem:[#allocation7 + $0x248] sm:$0xff] }
 0x66e   :  { %4709 = vrsqrt.f32 %v2212_v44  ;;  %v4372_v44 = vpack.c.bf16 %v2499_v39, %v2497_v36  ;;  %v4374_v45 = vpack.c.bf16 %v2504_v21, %v2502_v40  ;;  %v2540_v36 = vld [vmem:[#allocation7 + $0x378] sm:$0xff]  ;;  %v2537_v40 = vld [vmem:[#allocation7 + $0x360] sm:$0xff]  ;;  %v2539_v21 = vld [vmem:[#allocation7 + $0x370] sm:$0xff] }
 0x677   :  { %v4708_v33 = vpop.eup %4707 }
 0x678   :  { %v4710_v48 = vpop.eup %4709  ;;  %v2219_v49 = vrot.slane %v4708_v33, %v5254_v63  ;;  %v2501_v33 = vld [vmem:[#allocation7 + $0x240] sm:$0xff] }
 0x679   :  { %v2223_v14 = vrot.slane %v4710_v48, %v5254_v63  ;;  %v2506_v48 = vld [vmem:[#allocation7 + $0x268] sm:$0xff] }
 0x67a   :  { %v2224_v53 = vmul.f32 %v2219_v49, %v2115_v27  ;;  %v2226_v54 = vmul.f32 %v2219_v49, %v2117_v38  ;;  %v2486_v38 = vld [vmem:[#allocation7 + $0x1c8] sm:$0xff]  ;;  %v2508_v49 = vld [vmem:[#allocation7 + $0x278] sm:$0xff] }
 0x67b   :  { %v2225_v57 = vmul.f32 %v2223_v14, %v2116_v42  ;;  %v2227_v59 = vmul.f32 %v2223_v14, %v2118_v51  ;;  %v2488_v42 = vld [vmem:[#allocation7 + $0x1d8] sm:$0xff]  ;;  %v4378_v14 = vpack.c.bf16 %v2508_v49, %v2506_v48 }
 0x67c   :  { %v2241_v2 = vmul.f32 %v2234_v50, %v2224_v53  ;;  %v2243_v18 = vmul.f32 %v2234_v50, %v2226_v54  ;;  %v2270_v51 = vld [vmem:[%s5929_s8] sm:$0xff]  ;;  %v4358_v19 = vpack.c.bf16 %v2488_v42, %v2486_v38  ;;  %v4376_v50 = vpack.c.bf16 %v2503_v46, %v2501_v33  ;;  %v2507_v53 = vld [vmem:[#allocation7 + $0x270] sm:$0xff]  ;;  %v2510_v54 = vld [vmem:[#allocation7 + $0x288] sm:$0xff] }
 0x67d   :  { %v2242_v3 = vmul.f32 %v2238_v52, %v2225_v57  ;;  %v2244_v43 = vmul.f32 %v2238_v52, %v2227_v59  ;;  %v2505_v52 = vld [vmem:[#allocation7 + $0x260] sm:$0xff]  ;;  %v2355_v33 = vld [vmem:[#allocation7 + $0x18] sm:$0xff] }
 0x67e   :  { %v2258_v37 = vadd.f32 %v2251_v55, %v2241_v2  ;;  %v2260_v5 = vadd.f32 %v2251_v55, %v2243_v18  ;;  %v2512_v55 = vld [vmem:[#allocation7 + $0x298] sm:$0xff]  ;;  %v4380_v57 = vpack.c.bf16 %v2507_v53, %v2505_v52  ;;  %v2511_v2 = vld [vmem:[#allocation7 + $0x290] sm:$0xff]  ;;  %v2514_v18 = vld [vmem:[#allocation7 + $0x2a8] sm:$0xff] }
 0x67f   :  { %v2259_v17 = vadd.f32 %v2255_v60, %v2242_v3  ;;  %v2261_v11 = vadd.f32 %v2255_v60, %v2244_v43  ;;  %v4382_v59 = vpack.c.bf16 %v2512_v55, %v2510_v54  ;;  %v2509_v60 = vld [vmem:[#allocation7 + $0x280] sm:$0xff]  ;;  %v2516_v3 = vld [vmem:[#allocation7 + $0x2b8] sm:$0xff]  ;;  %v2357_v52 = vld [vmem:[#allocation7 + $0x28] sm:$0xff] }
 0x680   :  { %v2262_v13 = vmul.f32 0.2, %v2258_v37  ;;  %v2264_v16 = vmul.f32 0.2, %v2260_v5  ;;  %v4384_v43 = vpack.c.bf16 %v2511_v2, %v2509_v60  ;;  %v2521_v42 = vld [vmem:[#allocation7 + $0x2e0] sm:$0xff]  ;;  %v2359_v53 = vld [vmem:[#allocation7 + $0x38] sm:$0xff] }
 0x681   :  { %v2263_v22 = vmul.f32 0.2, %v2259_v17  ;;  %v2265_v23 = vmul.f32 0.2, %v2261_v11  ;;  %v2356_v60 = vld [vmem:[#allocation7 + $0x20] sm:$0xff]  ;;  %v2358_v2 = vld [vmem:[#allocation7 + $0x30] sm:$0xff] }
 0x682   :  { %v2266_v24 = vmax.f32 %v2258_v37, %v2262_v13  ;;  %v2268_v28 = vmax.f32 %v2260_v5, %v2264_v16  ;;  %v4386_v37 = vpack.c.bf16 %v2516_v3, %v2514_v18  ;;  %v2513_v5 = vld [vmem:[#allocation7 + $0x2a0] sm:$0xff]  ;;  %v2520_v13 = vld [vmem:[#allocation7 + $0x2d8] sm:$0xff]  ;;  %v2361_v18 = vld [vmem:[#allocation7 + $0x48] sm:$0xff] }
 0x683   :  { %v2267_v62 = vmax.f32 %v2259_v17, %v2263_v22  ;;  %v2269_v0 = vmax.f32 %v2261_v11, %v2265_v23  ;;  %v2515_v17 = vld [vmem:[#allocation7 + $0x2b0] sm:$0xff]  ;;  %v2518_v11 = vld [vmem:[#allocation7 + $0x2c8] sm:$0xff]  ;;  %v2517_v23 = vld [vmem:[#allocation7 + $0x2c0] sm:$0xff] }
 0x684   :  { %v5507_v27 = vpack.c.bf16 %v2268_v28, %v2266_v24  ;;  %v4388_v16 = vpack.c.bf16 %v2515_v17, %v2513_v5  ;;  %v4390_v22 = vpack.c.bf16 %v2520_v13, %v2518_v11  ;;  %v2519_v24 = vld [vmem:[#allocation7 + $0x2d0] sm:$0xff]  ;;  %v2522_v28 = vld [vmem:[#allocation7 + $0x2e8] sm:$0xff]  ;;  %v2363_v3 = vld [vmem:[#allocation7 + $0x58] sm:$0xff] }
 0x685   :  { %v5505_v10 = vpack.c.bf16 %v2269_v0, %v2267_v62  ;;  %v2524_v62 = vld [vmem:[#allocation7 + $0x2f8] sm:$0xff]  ;;  %v4392_v0 = vpack.c.bf16 %v2519_v24, %v2517_v23  ;;  %v2360_v5 = vld [vmem:[#allocation7 + $0x40] sm:$0xff]  ;;  %v2362_v17 = vld [vmem:[#allocation7 + $0x50] sm:$0xff] }
 0x686   :  { %v4394_v38 = vpack.c.bf16 %v2524_v62, %v2522_v28  ;;  %v2365_v11 = vld [vmem:[#allocation7 + $0x68] sm:$0xff]  ;;  %v2367_v13 = vld [vmem:[#allocation7 + $0x78] sm:$0xff]  ;;  %v2364_v23 = vld [vmem:[#allocation7 + $0x60] sm:$0xff] }
 0x687   :  { %4348 = vmatprep.subr.msk.bf16.mxu0 %vm5501_vm8, %v5505_v10  ;;  %v2366_v24 = vld [vmem:[#allocation7 + $0x70] sm:$0xff]  ;;  %v2369_v28 = vld [vmem:[#allocation7 + $0x88] sm:$0xff]  ;;  %v2371_v62 = vld [vmem:[#allocation7 + $0x98] sm:$0xff] }
 0x688   :  { %4351 = vmatpush1.bf16.msk.msra.mxu0 %vm5501_vm8, %v5507_v27 }
 0x689   :  { %4354 = vmatprep.subr.msk.bf16.mxu0 %vm5501_vm8, %v5505_v10 }
 0x68b   :  { %3725 = vmatmul.mubr.msk.f32.vlgmr.msra.gmra.mrb[24].mxu0 %vm2271_vm9, %v2270_v51  ;;  %v2523_v51 = vld [vmem:[#allocation7 + $0x2f0] sm:$0xff] }
 0x68c   :  { %4357 = vmatpush1.bf16.msk.msra.mxu0 %vm5501_vm8, %v5507_v27  ;;  %2477 = vmatprep.mubr.f32.mxu0 %v4790_v47  ;;  %v4396_v6 = vpack.c.bf16 %v2523_v51, %v2521_v42  ;;  %v2368_v42 = vld [vmem:[#allocation7 + $0x80] sm:$0xff]  ;;  %v2370_v51 = vld [vmem:[#allocation7 + $0x90] sm:$0xff] }
 0x68d   :  { %4359 = vmatprep.subr.bf16.mxu0 %v4358_v19  ;;  %v2526_v19 = vld [vmem:[#allocation7 + $0x308] sm:$0xff] }
 0x68e   :  { %v4398_v9 = vpack.c.bf16 %v2528_v58, %v2526_v19  ;;  %v2373_v19 = vld [vmem:[#allocation7 + $0xa8] sm:$0xff]  ;;  %v2375_v58 = vld [vmem:[#allocation7 + $0xb8] sm:$0xff] }
 0x68f   :  { %3729 = vmatmul.mubr.msk.f32.vlgmr.msra.gmra.mrb[26].mxu0 %vm2271_vm9, %v3726_v30  ;;  %v2527_v30 = vld [vmem:[#allocation7 + $0x310] sm:$0xff] }
 0x690   :  { %4361 = vmatpush1.bf16.msra.mxu0 %v4360_v41  ;;  %v2530_v41 = vld [vmem:[#allocation7 + $0x328] sm:$0xff]  ;;  %v4400_v61 = vpack.c.bf16 %v2527_v30, %v2525_v26  ;;  %v2372_v26 = vld [vmem:[#allocation7 + $0xa0] sm:$0xff]  ;;  %v2374_v30 = vld [vmem:[#allocation7 + $0xb0] sm:$0xff] }
 0x691   :  { %4363 = vmatprep.subr.bf16.mxu0 %v4362_v56  ;;  %v2532_v56 = vld [vmem:[#allocation7 + $0x338] sm:$0xff] }
 0x692   :  { %v4402_v29 = vpack.c.bf16 %v2532_v56, %v2530_v41  ;;  %v2377_v41 = vld [vmem:[#allocation7 + $0xc8] sm:$0xff]  ;;  %v2379_v56 = vld [vmem:[#allocation7 + $0xd8] sm:$0xff] }
 0x694   :  { %4365 = vmatpush1.bf16.msra.mxu0 %v4364_v12  ;;  %v2534_v12 = vld [vmem:[#allocation7 + $0x348] sm:$0xff] }
 0x695   :  { %4367 = vmatprep.subr.bf16.mxu0 %v4366_v20  ;;  %v2536_v20 = vld [vmem:[#allocation7 + $0x358] sm:$0xff] }
 0x696   :  { %v4406_v31 = vpack.c.bf16 %v2536_v20, %v2534_v12  ;;  %v2381_v12 = vld [vmem:[#allocation7 + $0xe8] sm:$0xff]  ;;  %v2383_v20 = vld [vmem:[#allocation7 + $0xf8] sm:$0xff] }
 0x698   :  { %4369 = vmatpush1.bf16.msra.mxu0 %v4368_v34  ;;  %v4408_v34 = vpack.c.bf16 %v2535_v25, %v2533_v32  ;;  %v2380_v32 = vld [vmem:[#allocation7 + $0xe0] sm:$0xff]  ;;  %v2382_v25 = vld [vmem:[#allocation7 + $0xf0] sm:$0xff] }
 0x699   :  { %4371 = vmatprep.subr.bf16.mxu0 %v4370_v35  ;;  %v2538_v35 = vld [vmem:[#allocation7 + $0x368] sm:$0xff] }
 0x69a   :  { %v4410_v39 = vpack.c.bf16 %v2540_v36, %v2538_v35  ;;  %v2387_v35 = vld [vmem:[#allocation7 + $0x118] sm:$0xff]  ;;  %v4444_v36 = vpack.c.bf16 %v2382_v25, %v2380_v32  ;;  %v2778_v32 = vld [vmem:[#allocation7 + $0x3e0] sm:$0xff]  ;;  %v2780_v25 = vld [vmem:[#allocation7 + $0x3f0] sm:$0xff] }
 0x69c   :  { %4373 = vmatpush1.bf16.msra.mxu0 %v4372_v44  ;;  %v4412_v44 = vpack.c.bf16 %v2539_v21, %v2537_v40  ;;  %v2384_v40 = vld [vmem:[#allocation7 + $0x100] sm:$0xff]  ;;  %v2386_v21 = vld [vmem:[#allocation7 + $0x110] sm:$0xff] }
 0x69d   :  { %4375 = vmatprep.subr.bf16.mxu0 %v4374_v45  ;;  %v2353_v45 = vld [vmem:[#allocation7 + $0x8] sm:$0xff] }
 0x69e   :  { %v4414_v46 = vpack.c.bf16 %v2355_v33, %v2353_v45  ;;  %v2391_v45 = vld [vmem:[#allocation7 + $0x138] sm:$0xff]  ;;  %v4448_v33 = vpack.c.bf16 %v2386_v21, %v2384_v40  ;;  %v2782_v40 = vld [vmem:[#allocation7 + $0x400] sm:$0xff]  ;;  %v2784_v21 = vld [vmem:[#allocation7 + $0x410] sm:$0xff] }
 0x6a0   :  { %4377 = vmatpush1.bf16.msra.mxu0 %v4376_v50  ;;  %v2352_v50 = vld [vmem:[#allocation7] sm:$0xff] }
 0x6a1   :  { %4379 = vmatprep.subr.bf16.mxu0 %v4378_v14  ;;  %v2354_v14 = vld [vmem:[#allocation7 + $0x10] sm:$0xff] }
 0x6a2   :  { %v4416_v55 = vpack.c.bf16 %v2354_v14, %v2352_v50  ;;  %v2390_v50 = vld [vmem:[#allocation7 + $0x130] sm:$0xff]  ;;  %v2393_v14 = vld [vmem:[#allocation7 + $0x148] sm:$0xff] }
 0x6a4   :  { %4381 = vmatpush1.bf16.msra.mxu0 %v4380_v57 }
 0x6a5   :  { %4383 = vmatprep.subr.bf16.mxu0 %v4382_v59  ;;  %v4418_v59 = vpack.c.bf16 %v2359_v53, %v2357_v52  ;;  %v2395_v52 = vld [vmem:[#allocation7 + $0x158] sm:$0xff] }
 0x6a8   :  { %4385 = vmatpush1.bf16.msra.mxu0 %v4384_v43  ;;  %v4420_v43 = vpack.c.bf16 %v2358_v2, %v2356_v60  ;;  %v2399_v60 = vld [vmem:[#allocation7 + $0x178] sm:$0xff] }
 0x6a9   :  { %4387 = vmatprep.subr.bf16.mxu0 %v4386_v37  ;;  %v4422_v37 = vpack.c.bf16 %v2363_v3, %v2361_v18  ;;  %v2396_v3 = vld [vmem:[#allocation7 + $0x160] sm:$0xff] }
 0x6ac   :  { %4389 = vmatpush1.bf16.msra.mxu0 %v4388_v16  ;;  %v4424_v16 = vpack.c.bf16 %v2362_v17, %v2360_v5  ;;  %v2403_v5 = vld [vmem:[#allocation7 + $0x198] sm:$0xff] }
 0x6ad   :  { %4391 = vmatprep.subr.bf16.mxu0 %v4390_v22  ;;  %v4426_v22 = vpack.c.bf16 %v2367_v13, %v2365_v11  ;;  %v2400_v13 = vld [vmem:[#allocation7 + $0x180] sm:$0xff] }
 0x6b0   :  { %4393 = vmatpush1.bf16.msra.mxu0 %v4392_v0  ;;  %v4428_v0 = vpack.c.bf16 %v2366_v24, %v2364_v23  ;;  %v2407_v23 = vld [vmem:[#allocation7 + $0x1b8] sm:$0xff] }
 0x6b1   :  { %4395 = vmatprep.subr.bf16.mxu0 %v4394_v38  ;;  %v4430_v38 = vpack.c.bf16 %v2371_v62, %v2369_v28  ;;  %v2404_v62 = vld [vmem:[#allocation7 + $0x1a0] sm:$0xff] }
 0x6b4   :  { %4397 = vmatpush1.bf16.msra.mxu0 %v4396_v6  ;;  %v4432_v6 = vpack.c.bf16 %v2370_v51, %v2368_v42  ;;  %v2767_v42 = vld [vmem:[#allocation7 + $0x388] sm:$0xff]  ;;  %v2769_v51 = vld [vmem:[#allocation7 + $0x398] sm:$0xff] }
 0x6b5   :  { %4399 = vmatprep.subr.bf16.mxu0 %v4398_v9  ;;  %v4434_v9 = vpack.c.bf16 %v2375_v58, %v2373_v19  ;;  %v4476_v19 = vpack.c.bf16 %v2769_v51, %v2767_v42  ;;  %v2766_v58 = vld [vmem:[#allocation7 + $0x380] sm:$0xff]  ;;  %v2809_v42 = vld [vmem:[#allocation7 + $0x4d8] sm:$0xff] }
 0x6b8   :  { %4401 = vmatpush1.bf16.msra.mxu0 %v4400_v61  ;;  %v4436_v61 = vpack.c.bf16 %v2374_v30, %v2372_v26  ;;  %v2773_v26 = vld [vmem:[#allocation7 + $0x3b8] sm:$0xff]  ;;  %v3732_v30 = vld [vmem:[%s5929_s8 + $0x10] sm:$0xff] }
 0x6b9   :  { %4403 = vmatprep.subr.bf16.mxu0 %v4402_v29  ;;  %v4438_v29 = vpack.c.bf16 %v2379_v56, %v2377_v41  ;;  %v2770_v56 = vld [vmem:[#allocation7 + $0x3a0] sm:$0xff] }
 0x6bc   :  { %4405 = vmatpush1.bf16.msra.mxu0 %v4404_v15  ;;  %v4440_v15 = vpack.c.bf16 %v2378_v7, %v2376_v4  ;;  %v2777_v4 = vld [vmem:[#allocation7 + $0x3d8] sm:$0xff]  ;;  %v2776_v7 = vld [vmem:[#allocation7 + $0x3d0] sm:$0xff] }
 0x6bd   :  { %4407 = vmatprep.subr.bf16.mxu0 %v4406_v31  ;;  %v4442_v31 = vpack.c.bf16 %v2383_v20, %v2381_v12  ;;  %v2779_v12 = vld [vmem:[#allocation7 + $0x3e8] sm:$0xff]  ;;  %v2781_v20 = vld [vmem:[#allocation7 + $0x3f8] sm:$0xff] }
 0x6c0   :  { %4409 = vmatpush1.bf16.msra.mxu0 %v4408_v34  ;;  %v2385_v34 = vld [vmem:[#allocation7 + $0x108] sm:$0xff] }
 0x6c1   :  { %4411 = vmatprep.subr.bf16.mxu0 %v4410_v39  ;;  %v4446_v39 = vpack.c.bf16 %v2387_v35, %v2385_v34  ;;  %v2783_v34 = vld [vmem:[#allocation7 + $0x408] sm:$0xff]  ;;  %v2785_v35 = vld [vmem:[#allocation7 + $0x418] sm:$0xff] }
 0x6c4   :  { %4413 = vmatpush1.bf16.msra.mxu0 %v4412_v44  ;;  %v2389_v44 = vld [vmem:[#allocation7 + $0x128] sm:$0xff] }
 0x6c5   :  { %4415 = vmatprep.subr.bf16.mxu0 %v4414_v46  ;;  %v4450_v46 = vpack.c.bf16 %v2391_v45, %v2389_v44  ;;  %v2787_v44 = vld [vmem:[#allocation7 + $0x428] sm:$0xff]  ;;  %v2789_v45 = vld [vmem:[#allocation7 + $0x438] sm:$0xff] }
 0x75e   :  { %v5530_v48 = vpop.f32.mrb[24].mxu0 }
 0x75f   :  { %v2349_v49 = vpop.f32.mrb[25].mxu0 }
 0x762   :  { %v2479_v54 = vpop.f32.mrb[26].mxu0 }
 0x763   :  { %v2481_v57 = vpop.f32.mrb[27].mxu0 }
 0x764   :  { %3730 = vmatprep.mubr.msk.f32.mxu0 %vm1315_vm5, %v2481_v57  ;;  %v2394_v57 = vld [vmem:[#allocation7 + $0x150] sm:$0xff] }
 0x765   :  { %2609 = vmatmul.mubr.f32.vlgmr.msra.gmra.mrb[28].mxu0 %v2479_v54  ;;  %v4454_v54 = vpack.c.bf16 %v2395_v52, %v2393_v14  ;;  %v2791_v14 = vld [vmem:[#allocation7 + $0x448] sm:$0xff]  ;;  %v2793_v52 = vld [vmem:[#allocation7 + $0x458] sm:$0xff] }
 0x766   :  { %4417 = vmatpush1.bf16.msra.mxu0 %v4416_v55  ;;  %3731 = vmatprep.mubr.msk.f32.mxu0 %vm1315_vm5, %v2349_v49  ;;  %v2388_v49 = vld [vmem:[#allocation7 + $0x120] sm:$0xff] }
 0x767   :  { %4419 = vmatprep.subr.bf16.mxu0 %v4418_v59  ;;  %v4452_v53 = vpack.c.bf16 %v2390_v50, %v2388_v49  ;;  %v2392_v55 = vld [vmem:[#allocation7 + $0x140] sm:$0xff]  ;;  %v2397_v59 = vld [vmem:[#allocation7 + $0x168] sm:$0xff]  ;;  %v2788_v50 = vld [vmem:[#allocation7 + $0x430] sm:$0xff] }
 0x768   :  { %v4456_v2 = vpack.c.bf16 %v2394_v57, %v2392_v55  ;;  %v4458_v18 = vpack.c.bf16 %v2399_v60, %v2397_v59  ;;  %v2786_v49 = vld [vmem:[#allocation7 + $0x420] sm:$0xff]  ;;  %v2792_v57 = vld [vmem:[#allocation7 + $0x450] sm:$0xff]  ;;  %v2795_v59 = vld [vmem:[#allocation7 + $0x468] sm:$0xff] }
 0x769   :  { %v2790_v55 = vld [vmem:[#allocation7 + $0x440] sm:$0xff]  ;;  %v2797_v60 = vld [vmem:[#allocation7 + $0x478] sm:$0xff] }
 0x76a   :  { %4421 = vmatpush1.bf16.msra.mxu0 %v4420_v43  ;;  %v2398_v43 = vld [vmem:[#allocation7 + $0x170] sm:$0xff] }
 0x76b   :  { %4423 = vmatprep.subr.bf16.mxu0 %v4422_v37  ;;  %v2401_v37 = vld [vmem:[#allocation7 + $0x188] sm:$0xff]  ;;  %v4460_v17 = vpack.c.bf16 %v2398_v43, %v2396_v3  ;;  %v2794_v3 = vld [vmem:[#allocation7 + $0x460] sm:$0xff]  ;;  %v2796_v43 = vld [vmem:[#allocation7 + $0x470] sm:$0xff] }
 0x76c   :  { %v4462_v11 = vpack.c.bf16 %v2403_v5, %v2401_v37  ;;  %v2799_v37 = vld [vmem:[#allocation7 + $0x488] sm:$0xff]  ;;  %v2801_v5 = vld [vmem:[#allocation7 + $0x498] sm:$0xff] }
 0x76e   :  { %4425 = vmatpush1.bf16.msra.mxu0 %v4424_v16  ;;  %v2402_v16 = vld [vmem:[#allocation7 + $0x190] sm:$0xff] }
 0x76f   :  { %4427 = vmatprep.subr.bf16.mxu0 %v4426_v22  ;;  %v2405_v22 = vld [vmem:[#allocation7 + $0x1a8] sm:$0xff]  ;;  %v4464_v24 = vpack.c.bf16 %v2402_v16, %v2400_v13  ;;  %v2798_v13 = vld [vmem:[#allocation7 + $0x480] sm:$0xff]  ;;  %v2800_v16 = vld [vmem:[#allocation7 + $0x490] sm:$0xff] }
 0x770   :  { %v4466_v28 = vpack.c.bf16 %v2407_v23, %v2405_v22  ;;  %v2803_v22 = vld [vmem:[#allocation7 + $0x4a8] sm:$0xff]  ;;  %v2805_v23 = vld [vmem:[#allocation7 + $0x4b8] sm:$0xff] }
 0x772   :  { %4429 = vmatpush1.bf16.msra.mxu0 %v4428_v0  ;;  %v2406_v0 = vld [vmem:[#allocation7 + $0x1b0] sm:$0xff] }
 0x773   :  { %4431 = vmatprep.subr.bf16.mxu0 %v4430_v38  ;;  %v4468_v38 = vpack.c.bf16 %v2406_v0, %v2404_v62  ;;  %v2802_v62 = vld [vmem:[#allocation7 + $0x4a0] sm:$0xff]  ;;  %v2804_v0 = vld [vmem:[#allocation7 + $0x4b0] sm:$0xff] }
 0x774   :  { %v4514_v51 = vpack.c.bf16 %v2804_v0, %v2802_v62  ;;  %v2946_v62 = vld [vmem:[%s5932_s11 + $0xb0] sm:$0xff]  ;;  %v2949_v0 = vld [vmem:[%s5932_s11 + $0xc8] sm:$0xff] }
 0x776   :  { %4433 = vmatpush1.bf16.msra.mxu0 %v4432_v6  ;;  %v2768_v6 = vld [vmem:[#allocation7 + $0x390] sm:$0xff] }
 0x777   :  { %4435 = vmatprep.subr.bf16.mxu0 %v4434_v9  ;;  %v2771_v9 = vld [vmem:[#allocation7 + $0x3a8] sm:$0xff]  ;;  %v4478_v41 = vpack.c.bf16 %v2768_v6, %v2766_v58  ;;  %v2806_v58 = vld [vmem:[#allocation7 + $0x4c0] sm:$0xff]  ;;  %v2808_v6 = vld [vmem:[#allocation7 + $0x4d0] sm:$0xff] }
 0x77a   :  { %4437 = vmatpush1.bf16.msra.mxu0 %v4436_v61  ;;  %v2772_v61 = vld [vmem:[#allocation7 + $0x3b0] sm:$0xff] }
 0x77b   :  { %4439 = vmatprep.subr.bf16.mxu0 %v4438_v29  ;;  %v2775_v29 = vld [vmem:[#allocation7 + $0x3c8] sm:$0xff] }
 0x77c   :  { %v4484_v8 = vpack.c.bf16 %v2777_v4, %v2775_v29  ;;  %v2817_v29 = vld [vmem:[#allocation7 + $0x518] sm:$0xff] }
 0x77e   :  { %4441 = vmatpush1.bf16.msra.mxu0 %v4440_v15 }
 0x77f   :  { %4443 = vmatprep.subr.bf16.mxu0 %v4442_v31  ;;  %v4488_v31 = vpack.c.bf16 %v2781_v20, %v2779_v12  ;;  %v2821_v12 = vld [vmem:[#allocation7 + $0x538] sm:$0xff] }
 0x782   :  { %4445 = vmatpush1.bf16.msra.mxu0 %v4444_v36  ;;  %v4490_v36 = vpack.c.bf16 %v2780_v25, %v2778_v32  ;;  %v2820_v32 = vld [vmem:[#allocation7 + $0x530] sm:$0xff] }
 0x783   :  { %4447 = vmatprep.subr.bf16.mxu0 %v4446_v39  ;;  %v4492_v39 = vpack.c.bf16 %v2785_v35, %v2783_v34  ;;  %v2925_v34 = vld [vmem:[%s5932_s11 + $0x8] sm:$0xff]  ;;  %v2927_v35 = vld [vmem:[%s5932_s11 + $0x18] sm:$0xff] }
 0x786   :  { %4449 = vmatpush1.bf16.msra.mxu0 %v4448_v33  ;;  %v4494_v33 = vpack.c.bf16 %v2784_v21, %v2782_v40  ;;  %v2926_v40 = vld [vmem:[%s5932_s11 + $0x10] sm:$0xff]  ;;  %v2929_v21 = vld [vmem:[%s5932_s11 + $0x28] sm:$0xff] }
 0x787   :  { %4451 = vmatprep.subr.bf16.mxu0 %v4450_v46  ;;  %v4496_v46 = vpack.c.bf16 %v2789_v45, %v2787_v44  ;;  %v2931_v44 = vld [vmem:[%s5932_s11 + $0x38] sm:$0xff] }
 0x78a   :  { %4453 = vmatpush1.bf16.msra.mxu0 %v4452_v53  ;;  %v4498_v53 = vpack.c.bf16 %v2788_v50, %v2786_v49  ;;  %v2930_v49 = vld [vmem:[%s5932_s11 + $0x30] sm:$0xff]  ;;  %v2933_v50 = vld [vmem:[%s5932_s11 + $0x48] sm:$0xff] }
 0x78b   :  { %4455 = vmatprep.subr.bf16.mxu0 %v4454_v54  ;;  %v4500_v54 = vpack.c.bf16 %v2793_v52, %v2791_v14  ;;  %v2935_v14 = vld [vmem:[%s5932_s11 + $0x58] sm:$0xff] }
 0x78e   :  { %4457 = vmatpush1.bf16.msra.mxu0 %v4456_v2  ;;  %v4502_v2 = vpack.c.bf16 %v2792_v57, %v2790_v55  ;;  %v2934_v55 = vld [vmem:[%s5932_s11 + $0x50] sm:$0xff]  ;;  %v2937_v57 = vld [vmem:[%s5932_s11 + $0x68] sm:$0xff] }
 0x78f   :  { %4459 = vmatprep.subr.bf16.mxu0 %v4458_v18  ;;  %v4504_v18 = vpack.c.bf16 %v2797_v60, %v2795_v59  ;;  %v2939_v59 = vld [vmem:[%s5932_s11 + $0x78] sm:$0xff] }
 0x792   :  { %4461 = vmatpush1.bf16.msra.mxu0 %v4460_v17  ;;  %v4506_v17 = vpack.c.bf16 %v2796_v43, %v2794_v3  ;;  %v2938_v3 = vld [vmem:[%s5932_s11 + $0x70] sm:$0xff]  ;;  %v2941_v43 = vld [vmem:[%s5932_s11 + $0x88] sm:$0xff] }
 0x793   :  { %4463 = vmatprep.subr.bf16.mxu0 %v4462_v11  ;;  %v4508_v11 = vpack.c.bf16 %v2801_v5, %v2799_v37  ;;  %v2943_v37 = vld [vmem:[%s5932_s11 + $0x98] sm:$0xff] }
 0x796   :  { %4465 = vmatpush1.bf16.msra.mxu0 %v4464_v24  ;;  %v4510_v24 = vpack.c.bf16 %v2800_v16, %v2798_v13  ;;  %v2942_v13 = vld [vmem:[%s5932_s11 + $0x90] sm:$0xff]  ;;  %v2945_v16 = vld [vmem:[%s5932_s11 + $0xa8] sm:$0xff] }
 0x797   :  { %4467 = vmatprep.subr.bf16.mxu0 %v4466_v28  ;;  %v4512_v28 = vpack.c.bf16 %v2805_v23, %v2803_v22  ;;  %v2947_v22 = vld [vmem:[%s5932_s11 + $0xb8] sm:$0xff] }
 0x79a   :  { %4469 = vmatpush1.bf16.msra.mxu0 %v4468_v38  ;;  %v2807_v38 = vld [vmem:[#allocation7 + $0x4c8] sm:$0xff] }
 0x79b   :  { %4472 = vmatprep.subr.msk.bf16.mxu0 %vm5501_vm8, %v5505_v10  ;;  %v4480_v10 = vpack.c.bf16 %v2773_v26, %v2771_v9  ;;  %v2811_v9 = vld [vmem:[#allocation7 + $0x4e8] sm:$0xff]  ;;  %v2813_v26 = vld [vmem:[#allocation7 + $0x4f8] sm:$0xff] }
 0x79d   :  { %2683 = vmatmul.mubr.f32.vlgmr.msra.gmra.mrb[28].mxu0 %v5530_v48  ;;  %v4482_v48 = vpack.c.bf16 %v2772_v61, %v2770_v56  ;;  %v2812_v56 = vld [vmem:[#allocation7 + $0x4f0] sm:$0xff]  ;;  %v2815_v61 = vld [vmem:[#allocation7 + $0x508] sm:$0xff] }
 0x79e   :  { %4475 = vmatpush1.bf16.msk.msra.mxu0 %vm5501_vm8, %v5507_v27  ;;  %2758 = vmatprep.mubr.f32.mxu0 %v4790_v47  ;;  %v2774_v27 = vld [vmem:[#allocation7 + $0x3c0] sm:$0xff] }
 0x79f   :  { %4477 = vmatprep.subr.bf16.mxu0 %v4476_v19  ;;  %v4486_v15 = vpack.c.bf16 %v2776_v7, %v2774_v27  ;;  %v4516_v19 = vpack.c.bf16 %v2809_v42, %v2807_v38  ;;  %v2816_v27 = vld [vmem:[#allocation7 + $0x510] sm:$0xff]  ;;  %v2819_v7 = vld [vmem:[#allocation7 + $0x528] sm:$0xff] }
 0x7a0   :  { %v2951_v38 = vld [vmem:[%s5932_s11 + $0xd8] sm:$0xff] }
 0x7a1   :  { %3735 = vmatmul.mubr.msk.f32.vlgmr.msra.gmra.mrb[30].mxu0 %vm2271_vm9, %v3732_v30  ;;  %v4518_v30 = vpack.c.bf16 %v2808_v6, %v2806_v58  ;;  %v2950_v58 = vld [vmem:[%s5932_s11 + $0xd0] sm:$0xff]  ;;  %v2953_v6 = vld [vmem:[%s5932_s11 + $0xe8] sm:$0xff] }
 0x7a2   :  { %4479 = vmatpush1.bf16.msra.mxu0 %v4478_v41  ;;  %v4520_v41 = vpack.c.bf16 %v2813_v26, %v2811_v9  ;;  %v2955_v9 = vld [vmem:[%s5932_s11 + $0xf8] sm:$0xff] }
 0x7a3   :  { %4481 = vmatprep.subr.bf16.mxu0 %v4480_v10  ;;  %v2810_v10 = vld [vmem:[#allocation7 + $0x4e0] sm:$0xff] }
 0x7a4   :  { %v4522_v4 = vpack.c.bf16 %v2812_v56, %v2810_v10  ;;  %v2954_v10 = vld [vmem:[%s5932_s11 + $0xf0] sm:$0xff]  ;;  %v2957_v56 = vld [vmem:[%s5932_s11 + $0x108] sm:$0xff] }
 0x7a6   :  { %4483 = vmatpush1.bf16.msra.mxu0 %v4482_v48  ;;  %v4524_v48 = vpack.c.bf16 %v2817_v29, %v2815_v61  ;;  %v2959_v61 = vld [vmem:[%s5932_s11 + $0x118] sm:$0xff] }
 0x7a7   :  { %4485 = vmatprep.subr.bf16.mxu0 %v4484_v8  ;;  %v2814_v8 = vld [vmem:[#allocation7 + $0x500] sm:$0xff] }
 0x7a8   :  { %v4526_v20 = vpack.c.bf16 %v2816_v27, %v2814_v8  ;;  %v2958_v8 = vld [vmem:[%s5932_s11 + $0x110] sm:$0xff]  ;;  %v2961_v27 = vld [vmem:[%s5932_s11 + $0x128] sm:$0xff] }
 0x7aa   :  { %4487 = vmatpush1.bf16.msra.mxu0 %v4486_v15  ;;  %v4528_v15 = vpack.c.bf16 %v2821_v12, %v2819_v7  ;;  %v2963_v7 = vld [vmem:[%s5932_s11 + $0x138] sm:$0xff] }
 0x7ab   :  { %4489 = vmatprep.subr.bf16.mxu0 %v4488_v31  ;;  %v2818_v31 = vld [vmem:[#allocation7 + $0x520] sm:$0xff] }
 0x7ac   :  { %v4530_v25 = vpack.c.bf16 %v2820_v32, %v2818_v31  ;;  %v2962_v31 = vld [vmem:[%s5932_s11 + $0x130] sm:$0xff]  ;;  %v2965_v32 = vld [vmem:[%s5932_s11 + $0x148] sm:$0xff] }
 0x7ae   :  { %4491 = vmatpush1.bf16.msra.mxu0 %v4490_v36  ;;  %v2924_v36 = vld [vmem:[%s5932_s11] sm:$0xff] }
 0x7af   :  { %4493 = vmatprep.subr.bf16.mxu0 %v4492_v39  ;;  %v5555_v39 = vpack.c.bf16 %v2927_v35, %v2925_v34  ;;  %v5566_v45 = vpack.c.bf16 %v2926_v40, %v2924_v36  ;;  %v2964_v36 = vld [vmem:[%s5932_s11 + $0x140] sm:$0xff]  ;;  %v2966_v40 = vld [vmem:[%s5932_s11 + $0x150] sm:$0xff] }
 0x7b1   :  { %4533 = vmatprep.subr.bf16.mxu1 %v5555_v39 }
 0x7b2   :  { %4495 = vmatpush1.bf16.msra.mxu0 %v4494_v33  ;;  %v5568_v33 = vpack.c.bf16 %v2931_v44, %v2929_v21  ;;  %4535 = vmatpush1.bf16.msra.mxu1 %v5566_v45  ;;  %v2969_v21 = vld [vmem:[%s5932_s11 + $0x168] sm:$0xff]  ;;  %v2971_v44 = vld [vmem:[%s5932_s11 + $0x178] sm:$0xff] }
 0x7b3   :  { %4497 = vmatprep.subr.bf16.mxu0 %v4496_v46  ;;  %v2928_v46 = vld [vmem:[%s5932_s11 + $0x20] sm:$0xff] }
 0x7b4   :  { %v5584_v52 = vpack.c.bf16 %v2930_v49, %v2928_v46  ;;  %4537 = vmatprep.subr.bf16.mxu1 %v5568_v33  ;;  %v5746_v46 = vpack.c.bf16 %v2966_v40, %v2964_v36  ;;  %v5749_v49 = vpack.c.bf16 %v2971_v44, %v2969_v21 }
 0x7b6   :  { %4499 = vmatpush1.bf16.msra.mxu0 %v4498_v53  ;;  %v5587_v53 = vpack.c.bf16 %v2935_v14, %v2933_v50  ;;  %4539 = vmatpush1.bf16.msra.mxu1 %v5584_v52  ;;  %v2968_v50 = vld [vmem:[%s5932_s11 + $0x160] sm:$0xff]  ;;  %v2970_v14 = vld [vmem:[%s5932_s11 + $0x170] sm:$0xff] }
 0x7b7   :  { %4501 = vmatprep.subr.bf16.mxu0 %v4500_v54  ;;  %v2932_v54 = vld [vmem:[%s5932_s11 + $0x40] sm:$0xff] }
 0x7b8   :  { %v5602_v60 = vpack.c.bf16 %v2934_v55, %v2932_v54  ;;  %4541 = vmatprep.subr.bf16.mxu1 %v5587_v53  ;;  %v5758_v54 = vpack.c.bf16 %v2970_v14, %v2968_v50 }
 0x7ba   :  { %4503 = vmatpush1.bf16.msra.mxu0 %v4502_v2  ;;  %v5605_v2 = vpack.c.bf16 %v2939_v59, %v2937_v57  ;;  %4543 = vmatpush1.bf16.msra.mxu1 %v5602_v60  ;;  %v2973_v59 = vld [vmem:[%s5932_s11 + $0x188] sm:$0xff] }
 0x7bb   :  { %4505 = vmatprep.subr.bf16.mxu0 %v4504_v18  ;;  %v2936_v18 = vld [vmem:[%s5932_s11 + $0x60] sm:$0xff] }
 0x7bc   :  { %v5620_v5 = vpack.c.bf16 %v2938_v3, %v2936_v18  ;;  %4545 = vmatprep.subr.bf16.mxu1 %v5605_v2  ;;  %v2975_v18 = vld [vmem:[%s5932_s11 + $0x198] sm:$0xff] }
 0x7bd   :  { %v5770_v3 = vpack.c.bf16 %v2975_v18, %v2973_v59 }
 0x7be   :  { %4507 = vmatpush1.bf16.msra.mxu0 %v4506_v17  ;;  %v5623_v17 = vpack.c.bf16 %v2943_v37, %v2941_v43  ;;  %4547 = vmatpush1.bf16.msra.mxu1 %v5620_v5  ;;  %v2972_v43 = vld [vmem:[%s5932_s11 + $0x180] sm:$0xff]  ;;  %v2974_v37 = vld [vmem:[%s5932_s11 + $0x190] sm:$0xff] }
 0x7bf   :  { %4509 = vmatprep.subr.bf16.mxu0 %v4508_v11  ;;  %v2940_v11 = vld [vmem:[%s5932_s11 + $0x80] sm:$0xff] }
 0x7c0   :  { %v5638_v23 = vpack.c.bf16 %v2942_v13, %v2940_v11  ;;  %4549 = vmatprep.subr.bf16.mxu1 %v5623_v17  ;;  %v5778_v11 = vpack.c.bf16 %v2974_v37, %v2972_v43  ;;  %v2977_v13 = vld [vmem:[%s5932_s11 + $0x1a8] sm:$0xff] }
 0x7c2   :  { %4511 = vmatpush1.bf16.msra.mxu0 %v4510_v24  ;;  %v5641_v24 = vpack.c.bf16 %v2947_v22, %v2945_v16  ;;  %4551 = vmatpush1.bf16.msra.mxu1 %v5638_v23  ;;  %v2979_v16 = vld [vmem:[%s5932_s11 + $0x1b8] sm:$0xff] }
 0x7c3   :  { %4513 = vmatprep.subr.bf16.mxu0 %v4512_v28  ;;  %v2944_v28 = vld [vmem:[%s5932_s11 + $0xa0] sm:$0xff]  ;;  %v5788_v22 = vpack.c.bf16 %v2979_v16, %v2977_v13 }
 0x7c4   :  { %v5656_v42 = vpack.c.bf16 %v2946_v62, %v2944_v28  ;;  %4553 = vmatprep.subr.bf16.mxu1 %v5641_v24  ;;  %v2976_v28 = vld [vmem:[%s5932_s11 + $0x1a0] sm:$0xff]  ;;  %v2978_v62 = vld [vmem:[%s5932_s11 + $0x1b0] sm:$0xff] }
 0x7c6   :  { %4515 = vmatpush1.bf16.msra.mxu0 %v4514_v51  ;;  %v5659_v51 = vpack.c.bf16 %v2951_v38, %v2949_v0  ;;  %4555 = vmatpush1.bf16.msra.mxu1 %v5656_v42  ;;  %v5796_v0 = vpack.c.bf16 %v2978_v62, %v2976_v28  ;;  %v2981_v38 = vld [vmem:[%s5932_s11 + $0x1c8] sm:$0xff] }
 0x7c7   :  { %4517 = vmatprep.subr.bf16.mxu0 %v4516_v19  ;;  %v2948_v19 = vld [vmem:[%s5932_s11 + $0xc0] sm:$0xff] }
 0x7c8   :  { %v5674_v26 = vpack.c.bf16 %v2950_v58, %v2948_v19  ;;  %4557 = vmatprep.subr.bf16.mxu1 %v5659_v51  ;;  %v2983_v19 = vld [vmem:[%s5932_s11 + $0x1d8] sm:$0xff] }
 0x7c9   :  { %v4588_v58 = vpack.c.bf16 %v2983_v19, %v2981_v38 }
 0x7ca   :  { %4519 = vmatpush1.bf16.msra.mxu0 %v4518_v30  ;;  %v5677_v30 = vpack.c.bf16 %v2955_v9, %v2953_v6  ;;  %4559 = vmatpush1.bf16.msra.mxu1 %v5674_v26  ;;  %v2980_v6 = vld [vmem:[%s5932_s11 + $0x1c0] sm:$0xff]  ;;  %v2982_v9 = vld [vmem:[%s5932_s11 + $0x1d0] sm:$0xff] }
 0x7cb   :  { %4521 = vmatprep.subr.bf16.mxu0 %v4520_v41  ;;  %v2952_v41 = vld [vmem:[%s5932_s11 + $0xe0] sm:$0xff] }
 0x7cc   :  { %v5692_v29 = vpack.c.bf16 %v2954_v10, %v2952_v41  ;;  %4561 = vmatprep.subr.bf16.mxu1 %v5677_v30  ;;  %v4590_v41 = vpack.c.bf16 %v2982_v9, %v2980_v6  ;;  %v2985_v10 = vld [vmem:[%s5932_s11 + $0x1e8] sm:$0xff] }
 0x7ce   :  { %4523 = vmatpush1.bf16.msra.mxu0 %v4522_v4  ;;  %v5695_v4 = vpack.c.bf16 %v2959_v61, %v2957_v56  ;;  %4563 = vmatpush1.bf16.msra.mxu1 %v5692_v29  ;;  %v2987_v56 = vld [vmem:[%s5932_s11 + $0x1f8] sm:$0xff] }
 0x7cf   :  { %4525 = vmatprep.subr.bf16.mxu0 %v4524_v48  ;;  %v2956_v48 = vld [vmem:[%s5932_s11 + $0x100] sm:$0xff]  ;;  %v4592_v61 = vpack.c.bf16 %v2987_v56, %v2985_v10 }
 0x7d0   :  { %v5710_v12 = vpack.c.bf16 %v2958_v8, %v2956_v48  ;;  %4565 = vmatprep.subr.bf16.mxu1 %v5695_v4  ;;  %v2984_v48 = vld [vmem:[%s5932_s11 + $0x1e0] sm:$0xff]  ;;  %v2986_v8 = vld [vmem:[%s5932_s11 + $0x1f0] sm:$0xff] }
 0x7d2   :  { %4527 = vmatpush1.bf16.msra.mxu0 %v4526_v20  ;;  %v5713_v20 = vpack.c.bf16 %v2963_v7, %v2961_v27  ;;  %4567 = vmatpush1.bf16.msra.mxu1 %v5710_v12  ;;  %v4594_v27 = vpack.c.bf16 %v2986_v8, %v2984_v48  ;;  %v2898_v7 = vld [vmem:[%s5931_s10] ss:$4 sm:$0x3] }
 0x7d3   :  { %4529 = vmatprep.subr.bf16.mxu0 %v4528_v15  ;;  %v2960_v15 = vld [vmem:[%s5932_s11 + $0x120] sm:$0xff] }
 0x7d4   :  { %v5728_v34 = vpack.c.bf16 %v2962_v31, %v2960_v15  ;;  %4569 = vmatprep.subr.bf16.mxu1 %v5713_v20  ;;  %v2903_v15 = vrot.slane %v2898_v7, %v5254_v63  ;;  %v2907_v31 = vrot.slane %v2898_v7, %v5259_v1 }
 0x7d6   :  { %4531 = vmatpush1.bf16.msra.mxu0 %v4530_v25  ;;  %v2967_v25 = vld [vmem:[%s5932_s11 + $0x158] sm:$0xff]  ;;  %4571 = vmatpush1.bf16.msra.mxu1 %v5728_v34 }
 0x7d7   :  { %v5731_v35 = vpack.c.bf16 %v2967_v25, %v2965_v32 }
 0x7d9   :  { %4573 = vmatprep.subr.bf16.mxu1 %v5731_v35 }
 0x7da   :  { %4575 = vmatpush1.bf16.msra.mxu1 %v5746_v46 }
 0x7db   :  { %4577 = vmatprep.subr.bf16.mxu1 %v5749_v49 }
 0x7de   :  { %4579 = vmatpush1.bf16.msra.mxu1 %v5758_v54 }
 0x7df   :  { %4581 = vmatprep.subr.bf16.mxu1 %v5770_v3 }
 0x7e2   :  { %4583 = vmatpush1.bf16.msra.mxu1 %v5778_v11 }
 0x7e3   :  { %4585 = vmatprep.subr.bf16.mxu1 %v5788_v22 }
 0x7e6   :  { %4587 = vmatpush1.bf16.msra.mxu1 %v5796_v0 }
 0x7e7   :  { %4589 = vmatprep.subr.bf16.mxu1 %v4588_v58 }
 0x7ea   :  { %4591 = vmatpush1.bf16.msra.mxu1 %v4590_v41 }
 0x7eb   :  { %4593 = vmatprep.subr.bf16.mxu1 %v4592_v61 }
 0x7ee   :  { %4595 = vmatpush1.bf16.msra.mxu1 %v4594_v27 }
 0x7ef   :  { %4597 = vmatprep.subr.bf16.mxu1 %v5555_v39 }
 0x874   :  { %v2760_v55 = vpop.f32.mrb[30].mxu0 }
 0x875   :  { %v2762_v57 = vpop.f32.mrb[31].mxu0 }
 0x876   :  { %3736 = vmatprep.mubr.msk.f32.mxu0 %vm1315_vm5, %v2762_v57 }
 0x877   :  { %2890 = vmatmul.mubr.f32.vlgmr.msra.gmra.mrb[28].mxu0 %v2760_v55 }
 0x878   :  { %3269 = vmatprep.mubr.f32.mxu0 %v4790_v47 }
 0x94a   :  { %v2891_v32 = vpop.f32.mrb[28].mxu0 }
 0x94b   :  { %v2910_v25 = vadd.f32 %v2903_v15, %v2891_v32  ;;  %v2893_v36 = vpop.f32.mrb[29].mxu0  ;;  %v3740_v32 = vld [vmem:[%s5933_s12 + $0x2] sm:$0x3] }
 0x94c   :  { %v2911_v40 = vadd.f32 %v2907_v31, %v2893_v36  ;;  %v3200_v31 = vld [vmem:[%s5933_s12] sm:$0x3]  ;;  %v3746_v36 = vld [vmem:[%s5933_s12 + $0x6] sm:$0x3] }
 0x94d   :  { %v2912_v21 = vrot.slane %v2910_v25, 4 }
 0x94e   :  { %v2918_v44 = vrot.slane %v2911_v40, 4 }
 0x94f   :  { %v2913_v50 = vadd.f32 %v2912_v21, %v2910_v25 }
 0x950   :  { %v2919_v14 = vadd.f32 %v2918_v44, %v2911_v40 }
 0x951   :  { %v2914_v55 = vrot.slane %v2913_v50, 2 }
 0x952   :  { %v2920_v57 = vrot.slane %v2919_v14, 2 }
 0x953   :  { %v2915_v59 = vadd.f32 %v2914_v55, %v2913_v50  ;;  %v3742_v50 = vld [vmem:[%s5934_s13 + $0x2] sm:$0x3] }
 0x954   :  { %v2921_v39 = vadd.f32 %v2920_v57, %v2919_v14  ;;  %v3378_v57 = vrot.slane %v3742_v50, %v5254_v63 }
 0x955   :  { %v2916_v18 = vrot.slane %v2915_v59, 1 }
 0x956   :  { %v2922_v43 = vrot.slane %v2921_v39, 1 }
 0x957   :  { %v2917_v13 = vadd.f32 %v2916_v18, %v2915_v59  ;;  %v3745_v18 = vld [vmem:[%s5934_s13 + $0x4] sm:$0x3] }
 0x958   :  { %v2923_v37 = vadd.f32 %v2922_v43, %v2921_v39  ;;  %v3382_v39 = vrot.slane %v3742_v50, %v5259_v1 }
 0x95a   :  { %3052 = vmatprep.mubr.f32.mxu1 %v2923_v37 }
 0x95b   :  { %3053 = vmatmul.mubr.f32.vlgmr.msra.gmra.mrb[24].mxu1 %v2917_v13 }
 0x95c   :  { %4599 = vmatpush1.bf16.msra.mxu1 %v5566_v45 }
 0x95d   :  { %4601 = vmatprep.subr.bf16.mxu1 %v5568_v33 }
 0x960   :  { %4603 = vmatpush1.bf16.msra.mxu1 %v5584_v52 }
 0x961   :  { %4605 = vmatprep.subr.bf16.mxu1 %v5587_v53 }
 0x964   :  { %4607 = vmatpush1.bf16.msra.mxu1 %v5602_v60 }
 0x965   :  { %4609 = vmatprep.subr.bf16.mxu1 %v5605_v2 }
 0x968   :  { %4611 = vmatpush1.bf16.msra.mxu1 %v5620_v5 }
 0x969   :  { %4613 = vmatprep.subr.bf16.mxu1 %v5623_v17 }
 0x96c   :  { %4615 = vmatpush1.bf16.msra.mxu1 %v5638_v23 }
 0x96d   :  { %4617 = vmatprep.subr.bf16.mxu1 %v5641_v24 }
 0x970   :  { %4619 = vmatpush1.bf16.msra.mxu1 %v5656_v42 }
 0x971   :  { %4621 = vmatprep.subr.bf16.mxu1 %v5659_v51 }
 0x974   :  { %4623 = vmatpush1.bf16.msra.mxu1 %v5674_v26 }
 0x975   :  { %4625 = vmatprep.subr.bf16.mxu1 %v5677_v30 }
 0x978   :  { %4627 = vmatpush1.bf16.msra.mxu1 %v5692_v29 }
 0x979   :  { %4629 = vmatprep.subr.bf16.mxu1 %v5695_v4 }
 0x97c   :  { %4631 = vmatpush1.bf16.msra.mxu1 %v5710_v12 }
 0x97d   :  { %4633 = vmatprep.subr.bf16.mxu1 %v5713_v20 }
 0x980   :  { %4635 = vmatpush1.bf16.msra.mxu1 %v5728_v34 }
 0x981   :  { %4637 = vmatprep.subr.bf16.mxu1 %v5731_v35 }
 0x984   :  { %4639 = vmatpush1.bf16.msra.mxu1 %v5746_v46 }
 0x985   :  { %4641 = vmatprep.subr.bf16.mxu1 %v5749_v49 }
 0x988   :  { %4643 = vmatpush1.bf16.msra.mxu1 %v5758_v54 }
 0x989   :  { %4645 = vmatprep.subr.bf16.mxu1 %v5770_v3 }
 0x98c   :  { %4647 = vmatpush1.bf16.msra.mxu1 %v5778_v11  ;;  %v3737_v11 = vld [vmem:[%s5931_s10 + $0x1] ss:$4 sm:$0x3] }
 0x98d   :  { %4649 = vmatprep.subr.bf16.mxu1 %v5788_v22  ;;  %v3738_v22 = vld [vmem:[%s5931_s10 + $0x2] ss:$4 sm:$0x3]  ;;  %v3176_v19 = vrot.slane %v3737_v11, %v5259_v1 }
 0x98e   :  { %v3187_v6 = vrot.slane %v3738_v22, %v5254_v63 }
 0x990   :  { %4651 = vmatpush1.bf16.msra.mxu1 %v5796_v0  ;;  %v3172_v0 = vrot.slane %v3737_v11, %v5254_v63 }
 0x991   :  { %4653 = vmatprep.subr.bf16.mxu1 %v4588_v58 }
 0x994   :  { %4655 = vmatpush1.bf16.msra.mxu1 %v4590_v41  ;;  %v3191_v41 = vrot.slane %v3738_v22, %v5259_v1 }
 0x995   :  { %4657 = vmatprep.subr.bf16.mxu1 %v4592_v61 }
 0x998   :  { %4659 = vmatpush1.bf16.msra.mxu1 %v4594_v27 }
 0xa2e   :  { %v3054_v45 = vpop.f32.mrb[24].mxu1 }
 0xa2f   :  { %v3062_v33 = vrot.slane %v3054_v45, %v5254_v63  ;;  %v3056_v52 = vpop.f32.mrb[25].mxu1 }
 0xa30   :  { %v3066_v53 = vrot.slane %v3056_v52, %v5254_v63 }
 0xa31   :  { %v3067_v60 = vsub.f32 %v2910_v25, %v3062_v33  ;;  %v3743_v25 = vld [vmem:[%s5933_s12 + $0x4] sm:$0x3] }
 0xa32   :  { %v3068_v2 = vsub.f32 %v2911_v40, %v3066_v53  ;;  %v3276_v40 = vld [vmem:[%s5934_s13] sm:$0x3]  ;;  %v3475_v53 = vrot.slane %v3745_v18, %v5254_v63 }
 0xa33   :  { %v3069_v5 = vmul.f32 %v3067_v60, %v3067_v60  ;;  %v3281_v21 = vrot.slane %v3276_v40, %v5254_v63  ;;  %v3285_v44 = vrot.slane %v3276_v40, %v5259_v1 }
 0xa34   :  { %v3070_v17 = vmul.f32 %v3068_v2, %v3068_v2 }
 0xa35   :  { %v3071_v23 = vrot.slane %v3069_v5, 4 }
 0xa36   :  { %v3077_v24 = vrot.slane %v3070_v17, 4 }
 0xa37   :  { %v3072_v42 = vadd.f32 %v3071_v23, %v3069_v5  ;;  %v3748_v5 = vld [vmem:[%s5934_s13 + $0x6] sm:$0x3] }
 0xa38   :  { %v3078_v51 = vadd.f32 %v3077_v24, %v3070_v17 }
 0xa39   :  { %v3073_v26 = vrot.slane %v3072_v42, 2 }
 0xa3a   :  { %v3079_v30 = vrot.slane %v3078_v51, 2 }
 0xa3b   :  { %v3074_v29 = vadd.f32 %v3073_v26, %v3072_v42 }
 0xa3c   :  { %v3080_v4 = vadd.f32 %v3079_v30, %v3078_v51  ;;  %v3572_v30 = vrot.slane %v3748_v5, %v5254_v63 }
 0xa3d   :  { %v3075_v12 = vrot.slane %v3074_v29, 1 }
 0xa3e   :  { %v3081_v20 = vrot.slane %v3080_v4, 1 }
 0xa3f   :  { %v3076_v35 = vadd.f32 %v3075_v12, %v3074_v29 }
 0xa40   :  { %v3082_v34 = vadd.f32 %v3081_v20, %v3080_v4  ;;  %v3576_v4 = vrot.slane %v3748_v5, %v5259_v1 }
 0xa42   :  { %3147 = vmatprep.mubr.f32.mxu1 %v3082_v34 }
 0xa43   :  { %3148 = vmatmul.mubr.f32.vlgmr.msra.gmra.mrb[26].mxu1 %v3076_v35 }
 0xb16   :  { %v3149_v46 = vpop.f32.mrb[26].mxu1 }
 0xb17   :  { %v3150_v49 = vadd.f32 1e-05, %v3149_v46  ;;  %v3151_v54 = vpop.f32.mrb[27].mxu1 }
 0xb18   :  { %v3152_v3 = vadd.f32 1e-05, %v3151_v54 }
 0xb19   :  { %4711 = vrsqrt.f32 %v3150_v49 }
 0xb1a   :  { %4713 = vrsqrt.f32 %v3152_v3 }
 0xb23   :  { %v4712_v16 = vpop.eup %4711 }
 0xb24   :  { %v4714_v28 = vpop.eup %4713  ;;  %v3159_v62 = vrot.slane %v4712_v16, %v5254_v63 }
 0xb25   :  { %v3163_v38 = vrot.slane %v4714_v28, %v5254_v63 }
 0xb26   :  { %v3164_v58 = vmul.f32 %v3159_v62, %v3067_v60 }
 0xb27   :  { %v3165_v9 = vmul.f32 %v3163_v38, %v3068_v2  ;;  %v3479_v2 = vrot.slane %v3745_v18, %v5259_v1 }
 0xb28   :  { %v3179_v10 = vmul.f32 %v3172_v0, %v3164_v58  ;;  %v3749_v0 = vld [vmem:[#allocation2] ss:$0 sm:$0xff] }
 0xb29   :  { %v3180_v56 = vmul.f32 %v3176_v19, %v3165_v9 }
 0xb2a   :  { %v3194_v61 = vadd.f32 %v3187_v6, %v3179_v10 }
 0xb2b   :  { %v3195_v48 = vadd.f32 %v3191_v41, %v3180_v56 }
 0xb2c   :  { %v3196_v8 = vmul.f32 0.2, %v3194_v61 }
 0xb2d   :  { %v3197_v27 = vmul.f32 0.2, %v3195_v48 }
 0xb2e   :  { %v3198_v15 = vmax.f32 %v3194_v61, %v3196_v8 }
 0xb2f   :  { %v3199_v7 = vmax.f32 %v3195_v48, %v3197_v27 }
 0xb31   :  { %3205 = vmatprep.subr.mxu0 %v3199_v7 }
 0xb32   :  { %3206 = vmatpush1.msra.mxu0 %v3198_v15 }
 0xb33   :  { %3739 = vmatmul.mubr.msk.f32.vlgmr.msra.gmra.mrb[32].mxu0 %vm3201_vm10, %v3200_v31  ;;  %3301 = vmatprep.subr.mxu0 %v3199_v7 }
 0xb34   :  { %3302 = vmatpush1.msra.mxu0 %v3198_v15  ;;  %3365 = vmatprep.mubr.f32.mxu0 %v4790_v47 }
 0xb35   :  { %3398 = vmatprep.subr.mxu0 %v3199_v7 }
 0xb37   :  { %3741 = vmatmul.mubr.msk.f32.vlgmr.msra.gmra.mrb[34].mxu0 %vm3201_vm10, %v3740_v32 }
 0xb38   :  { %3399 = vmatpush1.msra.mxu0 %v3198_v15  ;;  %3462 = vmatprep.mubr.f32.mxu0 %v4790_v47 }
 0xb39   :  { %3495 = vmatprep.subr.mxu0 %v3199_v7 }
 0xb3b   :  { %3744 = vmatmul.mubr.msk.f32.vlgmr.msra.gmra.mrb[36].mxu0 %vm3201_vm10, %v3743_v25 }
 0xb3c   :  { %3496 = vmatpush1.msra.mxu0 %v3198_v15  ;;  %3559 = vmatprep.mubr.f32.mxu0 %v4790_v47 }
 0xb3f   :  { %3747 = vmatmul.mubr.msk.f32.vlgmr.msra.gmra.mrb[38].mxu0 %vm3201_vm10, %v3746_v36 }
 0xc06   :  { %v3271_v14 = vpop.f32.mrb[32].mxu0 }
 0xc07   :  { %v3288_v47 = vmul.f32 %v3281_v21, %v3271_v14  ;;  %v3273_v55 = vpop.f32.mrb[33].mxu0 }
 0xc08   :  { %v3289_v59 = vmul.f32 %v3285_v44, %v3273_v55 }
 0xc09   :  { %v3291_v43 = vsel %vm3290_vm11, %v3288_v47, 0.0 }
 0xc0a   :  { %v3367_v37 = vpop.f32.mrb[34].mxu0  ;;  %v3292_v13 = vsel %vm3290_vm11, %v3289_v59, 0.0 }
 0xc0b   :  { %v3385_v45 = vmul.f32 %v3378_v57, %v3367_v37  ;;  %v3369_v33 = vpop.f32.mrb[35].mxu0  ;;  %v3293_v52 = vadd.f32 %v3292_v13, %v3291_v43 }
 0xc0c   :  { %v3386_v60 = vmul.f32 %v3382_v39, %v3369_v33 }
 0xc0d   :  { %3294 = vadd.xlane.f32.xlu0 %v3293_v52  ;;  %v3387_v17 = vsel %vm3290_vm11, %v3385_v45, 0.0 }
 0xc0e   :  { %v3464_v23 = vpop.f32.mrb[36].mxu0  ;;  %v3388_v24 = vsel %vm3290_vm11, %v3386_v60, 0.0 }
 0xc0f   :  { %v3482_v42 = vmul.f32 %v3475_v53, %v3464_v23  ;;  %v3466_v51 = vpop.f32.mrb[37].mxu0  ;;  %v3389_v26 = vadd.f32 %v3388_v24, %v3387_v17 }
 0xc10   :  { %v3483_v29 = vmul.f32 %v3479_v2, %v3466_v51 }
 0xc11   :  { %3390 = vadd.xlane.f32.xlu0 %v3389_v26  ;;  %v3484_v12 = vsel %vm3290_vm11, %v3482_v42, 0.0 }
 0xc12   :  { %v3561_v20 = vpop.f32.mrb[38].mxu0  ;;  %v3485_v34 = vsel %vm3290_vm11, %v3483_v29, 0.0 }
 0xc13   :  { %v3579_v35 = vmul.f32 %v3572_v30, %v3561_v20  ;;  %v3563_v46 = vpop.f32.mrb[39].mxu0  ;;  %v3486_v49 = vadd.f32 %v3485_v34, %v3484_v12 }
 0xc14   :  { %v3580_v54 = vmul.f32 %v3576_v4, %v3563_v46 }
 0xc15   :  { %3487 = vadd.xlane.f32.xlu1 %v3486_v49  ;;  %v3581_v3 = vsel %vm3290_vm11, %v3579_v35, 0.0 }
 0xc16   :  { %v3582_v11 = vsel %vm3290_vm11, %v3580_v54, 0.0 }
 0xc17   :  { %v3583_v16 = vadd.f32 %v3582_v11, %v3581_v3 }
 0xc19   :  { %3584 = vadd.xlane.f32.xlu1 %v3583_v16 }
 0xc9a   :  { %v3295_v63 = vpop.xlane.xlu0 %3294 }
 0xc9e   :  { %v3391_v22 = vpop.xlane.xlu0 %3390 }
 0xc9f   :  { %v3392_v28 = vadd.f32 %v3391_v22, %v3295_v63 }
 0xca2   :  { %v3488_v1 = vpop.xlane.xlu1 %3487 }
 0xca3   :  { %v3489_v62 = vadd.f32 %v3488_v1, %v3392_v28 }
 0xca6   :  { %v3585_v38 = vpop.xlane.xlu1 %3584 }
 0xca7   :  { %v3586_v19 = vadd.f32 %v3585_v38, %v3489_v62 }
 0xca9   :  { %v3594_v58 = vadd.f32 %v3749_v0, %v3586_v19 }
 0xcab   :  { %3596 = vst.msk [vmem:[%s5936_s15] sm:$0x3] %vm3595_vm12, %v3594_v58 }
 0xcac   :  { %3601 = vsyncpa [#allocation4], 1 }
 0xcad   :  { %3602 = vsyncpa [#allocation6], 1 }

</bundles_post_ra>
